<compile_context>
chip_gen: v6e
topology: v6e:2x2x1
jax: 0.10.0
libtpu: 0.0.40
codegen_flags: <defaults>
</compile_context>

<pallas_src>
import numpy as np

import jax
import jax.numpy as jnp
from jax import lax
from jax.experimental import pallas as pl
from jax.experimental.pallas import tpu as pltpu


_APPROX_RECIP = True   # False -> exact reciprocals (closer PyTorch parity)


# ------------------------------------------------------------------ helpers

def _recip(x):
    return pl.reciprocal(x, approx=_APPROX_RECIP)


def _sigmoid(x):
    # exact sigmoid via tanh -> EUP slot, no VPU divide
    return 0.5 * (jnp.tanh(0.5 * x) + 1.0)


def _softplus(x):
    # matches torch.nn.functional.softplus (beta=1) up to the threshold=20
    # shortcut, whose difference is < 2e-9.
    return jnp.maximum(x, 0.0) + jnp.log(1.0 + jnp.exp(-jnp.abs(x)))


def _softmax_lastdim(x):
    m = jnp.max(x, axis=-1, keepdims=True)
    e = jnp.exp(x - m)
    return e * _recip(jnp.sum(e, axis=-1, keepdims=True))


# ------------------------------------------------------------------ kernel

def make_ntm_chunk_kernel(C, L, H, N, M, TT):
    HD_R = M + 6            # read-head fc output width
    HD_W = 3 * M + 6        # write-head fc output width
    HD = HD_R + HD_W        # per-head fused width

    def kernel(*refs):
        it = iter(refs)
        # ---- inputs -------------------------------------------------------
        xp_ref = next(it)        # [TT, B, 4C]  pre-projected x (chunk block)
        r0_ref = next(it)        # [B, H*M]     initial reads
        h0_ref = next(it)        # [B, L*C]
        c0_ref = next(it)        # [B, L*C]
        w0_ref = next(it)        # [B, 2H*N]    initial head weightings
        m0_ref = next(it)        # [B, N, M]    initial memory
        lstm_refs = [(next(it), next(it)) for _ in range(L)]  # (W_l_T, b_l)
        wheads_ref = next(it)    # [C, HDP]     all head FCs fused + padded
        bheads_ref = next(it)    # [1, HDP]
        wout_ref = next(it)      # [C + H*M, NO]
        bout_ref = next(it)      # [1, NO]
        # ---- outputs ------------------------------------------------------
        o_ref = next(it)         # [TT, B, NO]  per-chunk output block
        r_out = next(it)         # [B, H*M]     final state
        h_out = next(it)
        c_out = next(it)
        w_out = next(it)
        m_out = next(it)
        # ---- VMEM scratch (persists across grid steps) ---------------------
        r_s = next(it)
        h_s = next(it)
        c_s = next(it)
        w_s = next(it)
        m_s = next(it)

        chunk = pl.program_id(0)

        @pl.when(chunk == 0)
        def _init():
            r_s[...] = r0_ref[...]
            h_s[...] = h0_ref[...]
            c_s[...] = c0_ref[...]
            w_s[...] = w0_ref[...]
            m_s[...] = m0_ref[...]

        # ---- hoist weight loads out of the unrolled timestep loop ----------
        lstm_w = [(w[...], b[...]) for (w, b) in lstm_refs]
        wheads = wheads_ref[...]
        bheads = bheads_ref[...]
        wout = wout_ref[...]
        bout = bout_ref[...]

        # ---- load recurrent state once per chunk; carry as values ----------
        reads = [r_s[:, hh * M:(hh + 1) * M] for hh in range(H)]
        h_list = [h_s[:, l * C:(l + 1) * C] for l in range(L)]
        c_list = [c_s[:, l * C:(l + 1) * C] for l in range(L)]
        w_list = [w_s[:, j * N:(j + 1) * N] for j in range(2 * H)]
        mem = m_s[...]
        B = mem.shape[0]

        for tt in range(TT):                      # fully unrolled chunk loop
            xp = xp_ref[tt]                       # [B, 4C]

            # ------------- LSTM controller: one fused matmul per layer ------
            layer_in = None
            for l in range(L):
                w_T, b = lstm_w[l]
                h_prev = h_list[l]
                c_prev = c_list[l]
                if l == 0:
                    inp = jnp.concatenate(reads + [h_prev], axis=1)
                    gates = (xp
                             + jnp.dot(inp, w_T,
                                       preferred_element_type=jnp.float32)
                             + b)
                else:
                    inp = jnp.concatenate([layer_in, h_prev], axis=1)
                    gates = (jnp.dot(inp, w_T,
                                     preferred_element_type=jnp.float32)
                             + b)
                # whole-vreg activations, then slice (PyTorch order i,f,g,o)
                sg = _sigmoid(gates)
                tg = jnp.tanh(gates)
                i_g = sg[:, 0:C]
                f_g = sg[:, C:2 * C]
                o_g = sg[:, 3 * C:4 * C]
                g_g = tg[:, 2 * C:3 * C]
                c_new = f_g * c_prev + i_g * g_g
                h_new = o_g * jnp.tanh(c_new)
                h_list[l] = h_new
                c_list[l] = c_new
                layer_in = h_new
            ctrl = layer_in                       # [B, C]

            # ------------- all head FCs in ONE lane-dense (padded) matmul ---
            head_o = (jnp.dot(ctrl, wheads,
                              preferred_element_type=jnp.float32)
                      + bheads)                   # [B, HDP]

            for hh in range(H):
                off = hh * HD
                o_r = head_o[:, off:off + HD_R]
                o_w = head_o[:, off + HD_R:off + HD]

                # ---- fused read/write addressing: stack along sublanes -----
                p2 = jnp.concatenate([o_r[:, 0:M + 6], o_w[:, 0:M + 6]],
                                     axis=0)      # [2B, M+6]
                k2 = p2[:, 0:M] + 1e-16
                beta2 = _softplus(p2[:, M:M + 1])
                g2 = _sigmoid(p2[:, M + 1:M + 2])
                s2 = _softmax_lastdim(p2[:, M + 2:M + 5])
                gamma2 = 1.0 + _softplus(p2[:, M + 5:M + 6])
                wprev2 = jnp.concatenate([w_list[2 * hh], w_list[2 * hh + 1]],
                                         axis=0)  # [2B, N]

                mem_e = mem + 1e-16
                nmem2 = jnp.sum(mem_e * mem_e, axis=-1)        # [B, N] (once)
                mem2 = jnp.concatenate([mem_e, mem_e], axis=0)  # [2B, N, M]
                nmem2_2 = jnp.concatenate([nmem2, nmem2], axis=0)

                dotkm = jnp.sum(mem2 * k2[:, None, :], axis=-1)  # [2B, N]
                nk2 = jnp.sum(k2 * k2, axis=-1, keepdims=True)   # [2B, 1]
                cos = dotkm * lax.rsqrt(jnp.maximum(nmem2_2 * nk2, 1e-16))
                wc = _softmax_lastdim(beta2 * cos)
                wg = g2 * wc + (1.0 - g2) * wprev2
                # 3-tap circular convolution via lane slice+concat
                w_m1 = jnp.concatenate([wg[:, N - 1:N], wg[:, 0:N - 1]], axis=1)
                w_p1 = jnp.concatenate([wg[:, 1:N], wg[:, 0:1]], axis=1)
                w_sh = (w_m1 * s2[:, 0:1] + wg * s2[:, 1:2]
                        + w_p1 * s2[:, 2:3])
                # sharpening
                logw = jnp.log(jnp.maximum(w_sh, 1e-38))
                w_pow = jnp.where(w_sh > 0.0, jnp.exp(gamma2 * logw), 0.0)
                den = jnp.sum(w_pow, axis=1, keepdims=True) + 1e-16
                w_all = w_pow * _recip(den)       # [2B, N]
                w_r = w_all[0:B]
                w_w = w_all[B:2 * B]

                # ---- read (from memory BEFORE this head pair's write) ------
                reads[hh] = jnp.sum(w_r[:, :, None] * mem, axis=1)   # [B, M]

                # ---- write (erase + add) ------------------------------------
                e = _sigmoid(o_w[:, M + 6:2 * M + 6])
                a = o_w[:, 2 * M + 6:3 * M + 6]
                ww3 = w_w[:, :, None]
                mem = mem * (1.0 - ww3 * e[:, None, :]) + ww3 * a[:, None, :]

                w_list[2 * hh] = w_r
                w_list[2 * hh + 1] = w_w

            # ------------- output layer: single fused matmul ----------------
            out_in = jnp.concatenate([ctrl] + reads, axis=1)   # [B, C + H*M]
            logits = (jnp.dot(out_in, wout,
                              preferred_element_type=jnp.float32)
                      + bout)
            o_ref[tt] = _sigmoid(logits)

        # ---- write recurrent state back to scratch once per chunk ----------
        reads_full = jnp.concatenate(reads, axis=1)
        h_full = jnp.concatenate(h_list, axis=1)
        c_full = jnp.concatenate(c_list, axis=1)
        w_full = jnp.concatenate(w_list, axis=1)
        r_s[...] = reads_full
        h_s[...] = h_full
        c_s[...] = c_full
        w_s[...] = w_full
        m_s[...] = mem

        # ---- final state to HBM only once, on the last chunk ---------------
        @pl.when(chunk == pl.num_programs(0) - 1)
        def _final():
            r_out[...] = reads_full
            h_out[...] = h_full
            c_out[...] = c_full
            w_out[...] = w_full
            m_out[...] = mem

    return kernel


# ------------------------------------------------------------------ wrapper

class EncapsulatedNTMPallas:
    def __init__(self, num_inputs, num_outputs, controller_size,
                 controller_layers, num_heads, N, M, key, max_chunk=8):
        self.num_inputs = num_inputs
        self.num_outputs = num_outputs
        self.C = controller_size
        self.L = controller_layers
        self.H = num_heads
        self.N = N
        self.M = M
        self.max_chunk = max_chunk
        HD = 4 * M + 12
        self.HDP = ((num_heads * HD + 127) // 128) * 128   # lane-dense pad
        self._call_cache = {}
        self._init_params(key)

    # deterministic in-script init (shapes follow the torch module __init__)
    def _init_params(self, key):
        C, L, H, N, M = self.C, self.L, self.H, self.N, self.M
        NI, NO = self.num_inputs, self.num_outputs
        HD = 4 * M + 12
        keys = iter(jax.random.split(key, 8 + 2 * L + 5 * H))

        def xavier(k, shape, gain):
            bound = gain * np.sqrt(6.0 / (shape[0] + shape[1]))
            return jax.random.uniform(k, shape, jnp.float32, -bound, bound)

        std_mem = 1.0 / np.sqrt(N + M)
        self.mem_bias = jax.random.uniform(next(keys), (N, M), jnp.float32,
                                           -std_mem, std_mem)

        lstm_in0 = NI + M * H
        std_l = 5.0 / np.sqrt(lstm_in0 + C)
        self.lstm_packed = []        # per layer: fused [in_l, 4C] weight, bias
        for l in range(L):
            in_l = lstm_in0 if l == 0 else C
            Wih = jax.random.uniform(next(keys), (4 * C, in_l), jnp.float32,
                                     -std_l, std_l)
            Whh = jax.random.uniform(next(keys), (4 * C, C), jnp.float32,
                                     -std_l, std_l)
            b = jnp.zeros((1, 4 * C), jnp.float32)   # b_ih + b_hh (both zero)
            if l == 0:
                WihT = Wih.T                          # [NI + H*M, 4C]
                self.W_x = WihT[:NI]                  # x rows -> hoisted proj
                W_l = jnp.concatenate([WihT[NI:], Whh.T], axis=0)  # [H*M+C,4C]
            else:
                W_l = jnp.concatenate([Wih.T, Whh.T], axis=0)      # [2C, 4C]
            self.lstm_packed += [W_l, b]
        self.h0 = jax.random.normal(next(keys), (L, 1, C), jnp.float32) * 0.05
        self.c0 = jax.random.normal(next(keys), (L, 1, C), jnp.float32) * 0.05

        # per-head FCs fused offline into one lane-dense, zero-padded matrix
        w_cols, b_cols, self.init_r = [], [], []
        for _ in range(H):
            Wr = xavier(next(keys), (M + 6, C), gain=1.4)
            br = jax.random.normal(next(keys), (1, M + 6), jnp.float32) * 0.01
            Ww = xavier(next(keys), (3 * M + 6, C), gain=1.4)
            bw = jax.random.normal(next(keys), (1, 3 * M + 6), jnp.float32) * 0.01
            w_cols += [Wr.T, Ww.T]
            b_cols += [br, bw]
            self.init_r.append(
                jax.random.normal(next(keys), (1, M), jnp.float32) * 0.01)
        Wh = jnp.concatenate(w_cols, axis=1)          # [C, H*HD]
        bh = jnp.concatenate(b_cols, axis=1)          # [1, H*HD]
        pad = self.HDP - H * HD
        self.W_heads = jnp.pad(Wh, ((0, 0), (0, pad)))   # [C, HDP]
        self.b_heads = jnp.pad(bh, ((0, 0), (0, pad)))   # [1, HDP]

        Wout = xavier(next(keys), (NO, C + H * M), gain=1.0)
        self.W_out = Wout.T                           # [(C + H*M), NO]
        self.b_out = jax.random.normal(next(keys), (1, NO), jnp.float32) * 0.01

    @staticmethod
    def _pick_chunk(T, max_tt):
        for tt in range(min(T, max_tt), 0, -1):
            if T % tt == 0:
                return tt
        return 1

    def _build_call(self, T, B):
        C, L, H, N, M = self.C, self.L, self.H, self.N, self.M
        NO = self.num_outputs
        HDP = self.HDP
        TT = self._pick_chunk(T, self.max_chunk)
        num_chunks = T // TT
        kernel = make_ntm_chunk_kernel(C, L, H, N, M, TT)

        def full(shape):
            # whole array resident in VMEM, constant block index across chunks
            nd = len(shape)
            return pl.BlockSpec(shape, lambda c, _nd=nd: (0,) * _nd)

        in_specs = [pl.BlockSpec((TT, B, 4 * C), lambda c: (c, 0, 0)),  # xp
                    full((B, H * M)),            # initial reads
                    full((B, L * C)),            # initial h
                    full((B, L * C)),            # initial c
                    full((B, 2 * H * N)),        # initial head weightings
                    full((B, N, M))]             # initial memory
        for l in range(L):
            in_l = (H * M + C) if l == 0 else 2 * C
            in_specs += [full((in_l, 4 * C)), full((1, 4 * C))]
        in_specs += [full((C, HDP)), full((1, HDP)),
                     full((C + H * M, NO)), full((1, NO))]

        out_shape = (
            jax.ShapeDtypeStruct((T, B, NO), jnp.float32),
            jax.ShapeDtypeStruct((B, H * M), jnp.float32),
            jax.ShapeDtypeStruct((B, L * C), jnp.float32),
            jax.ShapeDtypeStruct((B, L * C), jnp.float32),
            jax.ShapeDtypeStruct((B, 2 * H * N), jnp.float32),
            jax.ShapeDtypeStruct((B, N, M), jnp.float32),
        )
        out_specs = (pl.BlockSpec((TT, B, NO), lambda c: (c, 0, 0)),
                     full((B, H * M)),
                     full((B, L * C)),
                     full((B, L * C)),
                     full((B, 2 * H * N)),
                     full((B, N, M)))

        scratch_shapes = [pltpu.VMEM((B, H * M), jnp.float32),
                          pltpu.VMEM((B, L * C), jnp.float32),
                          pltpu.VMEM((B, L * C), jnp.float32),
                          pltpu.VMEM((B, 2 * H * N), jnp.float32),
                          pltpu.VMEM((B, N, M), jnp.float32)]

        call = pl.pallas_call(
            kernel,
            grid=(num_chunks,),
            out_shape=out_shape,
            in_specs=in_specs,
            out_specs=out_specs,
            scratch_shapes=scratch_shapes,
            compiler_params=pltpu.CompilerParams(
                dimension_semantics=("arbitrary",)),   # time is sequential
        )

        weights = (list(self.lstm_packed)
                   + [self.W_heads, self.b_heads, self.W_out, self.b_out])
        W_x = self.W_x

        @jax.jit
        def run(xs, reads, h, c, w, mem):
            # hoisted layer-0 input projection: one big lane-dense matmul
            xp = jnp.einsum('tbi,ic->tbc', xs, W_x)
            return call(xp, reads, h, c, w, mem, *weights)

        return run

    # --- mimics EncapsulatedNTM.init_sequence ------------------------------
    def init_sequence(self, batch_size):
        B = batch_size
        self.batch_size = B
        self.memory_state = jnp.broadcast_to(self.mem_bias[None],
                                             (B, self.N, self.M))
        self.prev_reads = jnp.concatenate(
            [jnp.broadcast_to(r, (B, self.M)) for r in self.init_r], axis=1)
        h = jnp.broadcast_to(self.h0, (self.L, B, self.C))
        c = jnp.broadcast_to(self.c0, (self.L, B, self.C))
        self.h = jnp.transpose(h, (1, 0, 2)).reshape(B, self.L * self.C)
        self.c = jnp.transpose(c, (1, 0, 2)).reshape(B, self.L * self.C)
        self.w = jnp.zeros((B, 2 * self.H * self.N), jnp.float32)

    # --- whole sequence in ONE pallas_call ----------------------------------
    def forward_sequence(self, xs):
        T, B = xs.shape[0], xs.shape[1]
        key = (T, B)
        if key not in self._call_cache:
            self._call_cache[key] = self._build_call(T, B)
        run = self._call_cache[key]
        o_seq, reads, h, c, w, mem = run(xs, self.prev_reads, self.h, self.c,
                                         self.w, self.memory_state)
        self.prev_reads, self.h, self.c, self.w, self.memory_state = \
            reads, h, c, w, mem
        previous_state = (reads, (h, c), w)
        return o_seq, previous_state

    # --- mimics EncapsulatedNTM.forward (single timestep) --------------------
    def forward(self, x=None):
        if x is None:
            x = jnp.zeros((self.batch_size, self.num_inputs), jnp.float32)
        o_seq, previous_state = self.forward_sequence(x[None])
        return o_seq[0], previous_state


# ------------------------------------------------------------------ main

if __name__ == "__main__":
    key = jax.random.PRNGKey(0)
    k_param, k_x = jax.random.split(key)

    # small config consistent with the module's constructor
    num_inputs, num_outputs = 8, 8
    controller_size, controller_layers = 32, 1
    num_heads, N, M = 1, 16, 8
    batch, seq = 2, 4

    ntm = EncapsulatedNTMPallas(num_inputs, num_outputs, controller_size,
                                controller_layers, num_heads, N, M, k_param)
    ntm.init_sequence(batch)

    xs = jax.random.normal(k_x, (seq, batch, num_inputs), jnp.float32)
    o_seq, state = ntm.forward_sequence(xs)    # whole sequence, one kernel call
    o_seq = jax.block_until_ready(o_seq)
    o = o_seq[-1]

    assert o_seq.shape == (seq, batch, num_outputs)
    assert o.shape == (batch, num_outputs)
    assert bool(jnp.all(jnp.isfinite(o_seq)))
    assert bool(jnp.all(jnp.isfinite(ntm.memory_state)))
    print("KERNEL_OK")
</pallas_src>

<mosaic_0001>
module attributes {stable_mosaic.version = 11 : i64} {
  func.func @kernel(%arg0: i32, %arg1: memref<4x2x128xf32, #tpu.memory_space<vmem>>, %arg2: memref<2x8xf32, #tpu.memory_space<vmem>>, %arg3: memref<2x32xf32, #tpu.memory_space<vmem>>, %arg4: memref<2x32xf32, #tpu.memory_space<vmem>>, %arg5: memref<2x32xf32, #tpu.memory_space<vmem>>, %arg6: memref<2x16x8xf32, #tpu.memory_space<vmem>>, %arg7: memref<40x128xf32, #tpu.memory_space<vmem>>, %arg8: memref<1x128xf32, #tpu.memory_space<vmem>>, %arg9: memref<32x128xf32, #tpu.memory_space<vmem>>, %arg10: memref<1x128xf32, #tpu.memory_space<vmem>>, %arg11: memref<40x8xf32, #tpu.memory_space<vmem>>, %arg12: memref<1x8xf32, #tpu.memory_space<vmem>>, %arg13: memref<4x2x8xf32, #tpu.memory_space<vmem>>, %arg14: memref<2x8xf32, #tpu.memory_space<vmem>>, %arg15: memref<2x32xf32, #tpu.memory_space<vmem>>, %arg16: memref<2x32xf32, #tpu.memory_space<vmem>>, %arg17: memref<2x32xf32, #tpu.memory_space<vmem>>, %arg18: memref<2x16x8xf32, #tpu.memory_space<vmem>>, %arg19: memref<2x8xf32, #tpu.memory_space<vmem>>, %arg20: memref<2x32xf32, #tpu.memory_space<vmem>>, %arg21: memref<2x32xf32, #tpu.memory_space<vmem>>, %arg22: memref<2x32xf32, #tpu.memory_space<vmem>>, %arg23: memref<2x16x8xf32, #tpu.memory_space<vmem>>) attributes {dimension_semantics = [#tpu.dimension_semantics<arbitrary>], iteration_bounds = array<i64: 1>, scalar_prefetch = 0 : i64, scratch_operands = 5 : i64, tpu.core_type = #tpu.core_type<tc>, window_params = [{transform_indices = @transform_0, window_bounds = array<i64: 4, 2, 128>}, {pipeline_mode = #tpu.pipeline_mode<synchronous>, transform_indices = @transform_1, window_bounds = array<i64: 2, 8>}, {pipeline_mode = #tpu.pipeline_mode<synchronous>, transform_indices = @transform_2, window_bounds = array<i64: 2, 32>}, {pipeline_mode = #tpu.pipeline_mode<synchronous>, transform_indices = @transform_3, window_bounds = array<i64: 2, 32>}, {pipeline_mode = #tpu.pipeline_mode<synchronous>, transform_indices = @transform_4, window_bounds = array<i64: 2, 32>}, {pipeline_mode = #tpu.pipeline_mode<synchronous>, transform_indices = @transform_5, window_bounds = array<i64: 2, 16, 8>}, {pipeline_mode = #tpu.pipeline_mode<synchronous>, transform_indices = @transform_6, window_bounds = array<i64: 40, 128>}, {pipeline_mode = #tpu.pipeline_mode<synchronous>, transform_indices = @transform_7, window_bounds = array<i64: 1, 128>}, {pipeline_mode = #tpu.pipeline_mode<synchronous>, transform_indices = @transform_8, window_bounds = array<i64: 32, 128>}, {pipeline_mode = #tpu.pipeline_mode<synchronous>, transform_indices = @transform_9, window_bounds = array<i64: 1, 128>}, {pipeline_mode = #tpu.pipeline_mode<synchronous>, transform_indices = @transform_10, window_bounds = array<i64: 40, 8>}, {pipeline_mode = #tpu.pipeline_mode<synchronous>, transform_indices = @transform_11, window_bounds = array<i64: 1, 8>}, {transform_indices = @transform_12, window_bounds = array<i64: 4, 2, 8>}, {pipeline_mode = #tpu.pipeline_mode<synchronous>, transform_indices = @transform_13, window_bounds = array<i64: 2, 8>}, {pipeline_mode = #tpu.pipeline_mode<synchronous>, transform_indices = @transform_14, window_bounds = array<i64: 2, 32>}, {pipeline_mode = #tpu.pipeline_mode<synchronous>, transform_indices = @transform_15, window_bounds = array<i64: 2, 32>}, {pipeline_mode = #tpu.pipeline_mode<synchronous>, transform_indices = @transform_16, window_bounds = array<i64: 2, 32>}, {pipeline_mode = #tpu.pipeline_mode<synchronous>, transform_indices = @transform_17, window_bounds = array<i64: 2, 16, 8>}]} {
    %c0_i32 = arith.constant 0 : i32
    %0 = arith.cmpi eq, %arg0, %c0_i32 : i32
    %1 = arith.extui %0 : i1 to i32
    %c0_i32_0 = arith.constant 0 : i32
    %2 = arith.cmpi ne, %1, %c0_i32_0 : i32
    scf.if %2 {
      %c0_217 = arith.constant 0 : index
      %c0_218 = arith.constant 0 : index
      %792 = vector.load %arg2[%c0_217, %c0_218] : memref<2x8xf32, #tpu.memory_space<vmem>>, vector<2x8xf32>
      %c0_219 = arith.constant 0 : index
      %c0_220 = arith.constant 0 : index
      %793 = vector.load %arg19[%c0_219, %c0_220] : memref<2x8xf32, #tpu.memory_space<vmem>>, vector<2x8xf32>
      tpu.vector_store %arg19[%c0_219, %c0_220], %792 {strides = array<i32>} : memref<2x8xf32, #tpu.memory_space<vmem>>, vector<2x8xf32>,
      %c0_221 = arith.constant 0 : index
      %c0_222 = arith.constant 0 : index
      %794 = vector.load %arg3[%c0_221, %c0_222] : memref<2x32xf32, #tpu.memory_space<vmem>>, vector<2x32xf32>
      %c0_223 = arith.constant 0 : index
      %c0_224 = arith.constant 0 : index
      %795 = vector.load %arg20[%c0_223, %c0_224] : memref<2x32xf32, #tpu.memory_space<vmem>>, vector<2x32xf32>
      tpu.vector_store %arg20[%c0_223, %c0_224], %794 {strides = array<i32>} : memref<2x32xf32, #tpu.memory_space<vmem>>, vector<2x32xf32>,
      %c0_225 = arith.constant 0 : index
      %c0_226 = arith.constant 0 : index
      %796 = vector.load %arg4[%c0_225, %c0_226] : memref<2x32xf32, #tpu.memory_space<vmem>>, vector<2x32xf32>
      %c0_227 = arith.constant 0 : index
      %c0_228 = arith.constant 0 : index
      %797 = vector.load %arg21[%c0_227, %c0_228] : memref<2x32xf32, #tpu.memory_space<vmem>>, vector<2x32xf32>
      tpu.vector_store %arg21[%c0_227, %c0_228], %796 {strides = array<i32>} : memref<2x32xf32, #tpu.memory_space<vmem>>, vector<2x32xf32>,
      %c0_229 = arith.constant 0 : index
      %c0_230 = arith.constant 0 : index
      %798 = vector.load %arg5[%c0_229, %c0_230] : memref<2x32xf32, #tpu.memory_space<vmem>>, vector<2x32xf32>
      %c0_231 = arith.constant 0 : index
      %c0_232 = arith.constant 0 : index
      %799 = vector.load %arg22[%c0_231, %c0_232] : memref<2x32xf32, #tpu.memory_space<vmem>>, vector<2x32xf32>
      tpu.vector_store %arg22[%c0_231, %c0_232], %798 {strides = array<i32>} : memref<2x32xf32, #tpu.memory_space<vmem>>, vector<2x32xf32>,
      %c0_233 = arith.constant 0 : index
      %c0_234 = arith.constant 0 : index
      %c0_235 = arith.constant 0 : index
      %800 = vector.load %arg6[%c0_233, %c0_234, %c0_235] : memref<2x16x8xf32, #tpu.memory_space<vmem>>, vector<2x16x8xf32>
      %c0_236 = arith.constant 0 : index
      %c0_237 = arith.constant 0 : index
      %c0_238 = arith.constant 0 : index
      %801 = vector.load %arg23[%c0_236, %c0_237, %c0_238] : memref<2x16x8xf32, #tpu.memory_space<vmem>>, vector<2x16x8xf32>
      tpu.vector_store %arg23[%c0_236, %c0_237, %c0_238], %800 {strides = array<i32>} : memref<2x16x8xf32, #tpu.memory_space<vmem>>, vector<2x16x8xf32>,
    } else {
    }
    %c0 = arith.constant 0 : index
    %c0_1 = arith.constant 0 : index
    %3 = vector.load %arg7[%c0, %c0_1] : memref<40x128xf32, #tpu.memory_space<vmem>>, vector<40x128xf32>
    %c0_2 = arith.constant 0 : index
    %c0_3 = arith.constant 0 : index
    %4 = vector.load %arg8[%c0_2, %c0_3] : memref<1x128xf32, #tpu.memory_space<vmem>>, vector<1x128xf32>
    %c0_4 = arith.constant 0 : index
    %c0_5 = arith.constant 0 : index
    %5 = vector.load %arg9[%c0_4, %c0_5] : memref<32x128xf32, #tpu.memory_space<vmem>>, vector<32x128xf32>
    %c0_6 = arith.constant 0 : index
    %c0_7 = arith.constant 0 : index
    %6 = vector.load %arg10[%c0_6, %c0_7] : memref<1x128xf32, #tpu.memory_space<vmem>>, vector<1x128xf32>
    %c0_8 = arith.constant 0 : index
    %c0_9 = arith.constant 0 : index
    %7 = vector.load %arg11[%c0_8, %c0_9] : memref<40x8xf32, #tpu.memory_space<vmem>>, vector<40x8xf32>
    %c0_10 = arith.constant 0 : index
    %c0_11 = arith.constant 0 : index
    %8 = vector.load %arg12[%c0_10, %c0_11] : memref<1x8xf32, #tpu.memory_space<vmem>>, vector<1x8xf32>
    %c0_12 = arith.constant 0 : index
    %c0_13 = arith.constant 0 : index
    %9 = vector.load %arg19[%c0_12, %c0_13] : memref<2x8xf32, #tpu.memory_space<vmem>>, vector<2x8xf32>
    %c0_14 = arith.constant 0 : index
    %c0_15 = arith.constant 0 : index
    %10 = vector.load %arg20[%c0_14, %c0_15] : memref<2x32xf32, #tpu.memory_space<vmem>>, vector<2x32xf32>
    %c0_16 = arith.constant 0 : index
    %c0_17 = arith.constant 0 : index
    %11 = vector.load %arg21[%c0_16, %c0_17] : memref<2x32xf32, #tpu.memory_space<vmem>>, vector<2x32xf32>
    %c0_18 = arith.constant 0 : index
    %c0_19 = arith.constant 0 : index
    %12 = vector.load %arg22[%c0_18, %c0_19] : memref<2x32xf32, #tpu.memory_space<vmem>>, vector<2x16xf32>
    %c0_20 = arith.constant 0 : index
    %c16 = arith.constant 16 : index
    %13 = vector.load %arg22[%c0_20, %c16] : memref<2x32xf32, #tpu.memory_space<vmem>>, vector<2x16xf32>
    %c0_21 = arith.constant 0 : index
    %c0_22 = arith.constant 0 : index
    %c0_23 = arith.constant 0 : index
    %14 = vector.load %arg23[%c0_21, %c0_22, %c0_23] : memref<2x16x8xf32, #tpu.memory_space<vmem>>, vector<2x16x8xf32>
    %c0_24 = arith.constant 0 : index
    %c0_25 = arith.constant 0 : index
    %c0_26 = arith.constant 0 : index
    %15 = vector.load %arg1[%c0_24, %c0_25, %c0_26] : memref<4x2x128xf32, #tpu.memory_space<vmem>>, vector<1x2x128xf32>
    %16 = vector.shape_cast %15 : vector<1x2x128xf32> to vector<2x128xf32>
    %17 = tpu.concatenate %9, %10 in 1 : vector<2x8xf32>, vector<2x32xf32> -> vector<2x40xf32>
    %cst = arith.constant dense<0.000000e+00> : vector<2x128xf32>
    %18 = tpu.matmul %17, %3, %cst {dimension_numbers = #tpu.dot_dimension_numbers<[1], [0], [0], [1], [0, 0, 1, 1], [], []>} : vector<2x40xf32>, vector<40x128xf32>, vector<2x128xf32> -> vector<2x128xf32>
    %19 = arith.addf %16, %18 : vector<2x128xf32>
    %20 = vector.broadcast %4 : vector<1x128xf32> to vector<2x128xf32>
    %21 = arith.addf %19, %20 : vector<2x128xf32>
    %cst_27 = arith.constant 5.000000e-01 : f32
    %22 = vector.broadcast %cst_27 : f32 to vector<2x128xf32>
    %23 = arith.mulf %22, %21 : vector<2x128xf32>
    %24 = math.tanh %23 : vector<2x128xf32>
    %cst_28 = arith.constant 1.000000e+00 : f32
    %25 = vector.broadcast %cst_28 : f32 to vector<2x128xf32>
    %26 = arith.addf %24, %25 : vector<2x128xf32>
    %cst_29 = arith.constant 5.000000e-01 : f32
    %27 = vector.broadcast %cst_29 : f32 to vector<2x128xf32>
    %28 = arith.mulf %27, %26 : vector<2x128xf32>
    %29 = math.tanh %21 : vector<2x128xf32>
    %30 = vector.extract_strided_slice %28 {offsets = [0, 0], sizes = [2, 32], strides = [1, 1]} : vector<2x128xf32> to vector<2x32xf32>
    %31 = vector.extract_strided_slice %28 {offsets = [0, 32], sizes = [2, 32], strides = [1, 1]} : vector<2x128xf32> to vector<2x32xf32>
    %32 = vector.extract_strided_slice %28 {offsets = [0, 96], sizes = [2, 32], strides = [1, 1]} : vector<2x128xf32> to vector<2x32xf32>
    %33 = vector.extract_strided_slice %29 {offsets = [0, 64], sizes = [2, 32], strides = [1, 1]} : vector<2x128xf32> to vector<2x32xf32>
    %34 = arith.mulf %31, %11 : vector<2x32xf32>
    %35 = arith.mulf %30, %33 : vector<2x32xf32>
    %36 = arith.addf %34, %35 : vector<2x32xf32>
    %37 = math.tanh %36 : vector<2x32xf32>
    %38 = arith.mulf %32, %37 : vector<2x32xf32>
    %cst_30 = arith.constant dense<0.000000e+00> : vector<2x128xf32>
    %39 = tpu.matmul %38, %5, %cst_30 {dimension_numbers = #tpu.dot_dimension_numbers<[1], [0], [0], [1], [0, 0, 1, 1], [], []>} : vector<2x32xf32>, vector<32x128xf32>, vector<2x128xf32> -> vector<2x128xf32>
    %40 = vector.broadcast %6 : vector<1x128xf32> to vector<2x128xf32>
    %41 = arith.addf %39, %40 : vector<2x128xf32>
    %42 = vector.extract_strided_slice %41 {offsets = [0, 0], sizes = [2, 14], strides = [1, 1]} : vector<2x128xf32> to vector<2x14xf32>
    %43 = vector.extract_strided_slice %41 {offsets = [0, 14], sizes = [2, 30], strides = [1, 1]} : vector<2x128xf32> to vector<2x30xf32>
    %44 = vector.extract_strided_slice %43 {offsets = [0, 0], sizes = [2, 14], strides = [1, 1]} : vector<2x30xf32> to vector<2x14xf32>
    %45 = tpu.concatenate %42, %44 in 0 : vector<2x14xf32>, vector<2x14xf32> -> vector<4x14xf32>
    %46 = vector.extract_strided_slice %45 {offsets = [0, 0], sizes = [4, 8], strides = [1, 1]} : vector<4x14xf32> to vector<4x8xf32>
    %cst_31 = arith.constant 1.000000e-16 : f32
    %47 = vector.broadcast %cst_31 : f32 to vector<4x8xf32>
    %48 = arith.addf %46, %47 : vector<4x8xf32>
    %49 = vector.extract_strided_slice %45 {offsets = [0, 8], sizes = [4, 1], strides = [1, 1]} : vector<4x14xf32> to vector<4x1xf32>
    %cst_32 = arith.constant 0.000000e+00 : f32
    %50 = vector.broadcast %cst_32 : f32 to vector<4x1xf32>
    %51 = arith.maximumf %49, %50 : vector<4x1xf32>
    %52 = math.absf %49 : vector<4x1xf32>
    %cst_33 = arith.constant 0.000000e+00 : f32
    %53 = vector.broadcast %cst_33 : f32 to vector<4x1xf32>
    %54 = arith.subf %53, %52 : vector<4x1xf32>
    %55 = math.exp %54 : vector<4x1xf32>
    %cst_34 = arith.constant 1.000000e+00 : f32
    %56 = vector.broadcast %cst_34 : f32 to vector<4x1xf32>
    %57 = arith.addf %56, %55 : vector<4x1xf32>
    %58 = math.log %57 : vector<4x1xf32>
    %59 = arith.addf %51, %58 : vector<4x1xf32>
    %60 = vector.extract_strided_slice %45 {offsets = [0, 9], sizes = [4, 1], strides = [1, 1]} : vector<4x14xf32> to vector<4x1xf32>
    %cst_35 = arith.constant 5.000000e-01 : f32
    %61 = vector.broadcast %cst_35 : f32 to vector<4x1xf32>
    %62 = arith.mulf %61, %60 : vector<4x1xf32>
    %63 = math.tanh %62 : vector<4x1xf32>
    %cst_36 = arith.constant 1.000000e+00 : f32
    %64 = vector.broadcast %cst_36 : f32 to vector<4x1xf32>
    %65 = arith.addf %63, %64 : vector<4x1xf32>
    %cst_37 = arith.constant 5.000000e-01 : f32
    %66 = vector.broadcast %cst_37 : f32 to vector<4x1xf32>
    %67 = arith.mulf %66, %65 : vector<4x1xf32>
    %68 = vector.extract_strided_slice %45 {offsets = [0, 10], sizes = [4, 3], strides = [1, 1]} : vector<4x14xf32> to vector<4x3xf32>
    %cst_38 = arith.constant dense<0xFF800000> : vector<4xf32>
    %69 = vector.multi_reduction <maximumf>, %68, %cst_38 [1] : vector<4x3xf32> to vector<4xf32>
    %70 = vector.shape_cast %69 : vector<4xf32> to vector<4x1xf32>
    %71 = vector.broadcast %70 : vector<4x1xf32> to vector<4x3xf32>
    %72 = arith.subf %68, %71 : vector<4x3xf32>
    %73 = math.exp %72 : vector<4x3xf32>
    %cst_39 = arith.constant dense<0.000000e+00> : vector<4xf32>
    %74 = vector.multi_reduction <add>, %73, %cst_39 [1] : vector<4x3xf32> to vector<4xf32>
    %75 = vector.shape_cast %74 : vector<4xf32> to vector<4x1xf32>
    %76 = tpu.reciprocal %75 {approx = true} : vector<4x1xf32> -> vector<4x1xf32>
    %77 = vector.broadcast %76 : vector<4x1xf32> to vector<4x3xf32>
    %78 = arith.mulf %73, %77 : vector<4x3xf32>
    %79 = vector.extract_strided_slice %45 {offsets = [0, 13], sizes = [4, 1], strides = [1, 1]} : vector<4x14xf32> to vector<4x1xf32>
    %cst_40 = arith.constant 0.000000e+00 : f32
    %80 = vector.broadcast %cst_40 : f32 to vector<4x1xf32>
    %81 = arith.maximumf %79, %80 : vector<4x1xf32>
    %82 = math.absf %79 : vector<4x1xf32>
    %cst_41 = arith.constant 0.000000e+00 : f32
    %83 = vector.broadcast %cst_41 : f32 to vector<4x1xf32>
    %84 = arith.subf %83, %82 : vector<4x1xf32>
    %85 = math.exp %84 : vector<4x1xf32>
    %cst_42 = arith.constant 1.000000e+00 : f32
    %86 = vector.broadcast %cst_42 : f32 to vector<4x1xf32>
    %87 = arith.addf %86, %85 : vector<4x1xf32>
    %88 = math.log %87 : vector<4x1xf32>
    %89 = arith.addf %81, %88 : vector<4x1xf32>
    %cst_43 = arith.constant 1.000000e+00 : f32
    %90 = vector.broadcast %cst_43 : f32 to vector<4x1xf32>
    %91 = arith.addf %90, %89 : vector<4x1xf32>
    %92 = tpu.concatenate %12, %13 in 0 : vector<2x16xf32>, vector<2x16xf32> -> vector<4x16xf32>
    %cst_44 = arith.constant 1.000000e-16 : f32
    %93 = vector.broadcast %cst_44 : f32 to vector<2x16x8xf32>
    %94 = arith.addf %14, %93 : vector<2x16x8xf32>
    %95 = arith.mulf %94, %94 : vector<2x16x8xf32>
    %cst_45 = arith.constant dense<0.000000e+00> : vector<2x16xf32>
    %96 = vector.multi_reduction <add>, %95, %cst_45 [2] : vector<2x16x8xf32> to vector<2x16xf32>
    %97 = tpu.concatenate %94, %94 in 0 : vector<2x16x8xf32>, vector<2x16x8xf32> -> vector<4x16x8xf32>
    %98 = tpu.concatenate %96, %96 in 0 : vector<2x16xf32>, vector<2x16xf32> -> vector<4x16xf32>
    %99 = vector.shape_cast %48 : vector<4x8xf32> to vector<4x1x8xf32>
    %100 = vector.broadcast %99 : vector<4x1x8xf32> to vector<4x16x8xf32>
    %101 = arith.mulf %97, %100 : vector<4x16x8xf32>
    %cst_46 = arith.constant dense<0.000000e+00> : vector<4x16xf32>
    %102 = vector.multi_reduction <add>, %101, %cst_46 [2] : vector<4x16x8xf32> to vector<4x16xf32>
    %103 = arith.mulf %48, %48 : vector<4x8xf32>
    %cst_47 = arith.constant dense<0.000000e+00> : vector<4xf32>
    %104 = vector.multi_reduction <add>, %103, %cst_47 [1] : vector<4x8xf32> to vector<4xf32>
    %105 = vector.shape_cast %104 : vector<4xf32> to vector<4x1xf32>
    %106 = vector.broadcast %105 : vector<4x1xf32> to vector<4x16xf32>
    %107 = arith.mulf %98, %106 : vector<4x16xf32>
    %cst_48 = arith.constant 1.000000e-16 : f32
    %108 = vector.broadcast %cst_48 : f32 to vector<4x16xf32>
    %109 = arith.maximumf %107, %108 : vector<4x16xf32>
    %110 = math.rsqrt %109 : vector<4x16xf32>
    %111 = arith.mulf %102, %110 : vector<4x16xf32>
    %112 = vector.broadcast %59 : vector<4x1xf32> to vector<4x16xf32>
    %113 = arith.mulf %112, %111 : vector<4x16xf32>
    %cst_49 = arith.constant dense<0xFF800000> : vector<4xf32>
    %114 = vector.multi_reduction <maximumf>, %113, %cst_49 [1] : vector<4x16xf32> to vector<4xf32>
    %115 = vector.shape_cast %114 : vector<4xf32> to vector<4x1xf32>
    %116 = vector.broadcast %115 : vector<4x1xf32> to vector<4x16xf32>
    %117 = arith.subf %113, %116 : vector<4x16xf32>
    %118 = math.exp %117 : vector<4x16xf32>
    %cst_50 = arith.constant dense<0.000000e+00> : vector<4xf32>
    %119 = vector.multi_reduction <add>, %118, %cst_50 [1] : vector<4x16xf32> to vector<4xf32>
    %120 = vector.shape_cast %119 : vector<4xf32> to vector<4x1xf32>
    %121 = tpu.reciprocal %120 {approx = true} : vector<4x1xf32> -> vector<4x1xf32>
    %122 = vector.broadcast %121 : vector<4x1xf32> to vector<4x16xf32>
    %123 = arith.mulf %118, %122 : vector<4x16xf32>
    %124 = vector.broadcast %67 : vector<4x1xf32> to vector<4x16xf32>
    %125 = arith.mulf %124, %123 : vector<4x16xf32>
    %cst_51 = arith.constant 1.000000e+00 : f32
    %126 = vector.broadcast %cst_51 : f32 to vector<4x1xf32>
    %127 = arith.subf %126, %67 : vector<4x1xf32>
    %128 = vector.broadcast %127 : vector<4x1xf32> to vector<4x16xf32>
    %129 = arith.mulf %128, %92 : vector<4x16xf32>
    %130 = arith.addf %125, %129 : vector<4x16xf32>
    %131 = vector.extract_strided_slice %130 {offsets = [0, 15], sizes = [4, 1], strides = [1, 1]} : vector<4x16xf32> to vector<4x1xf32>
    %132 = vector.extract_strided_slice %130 {offsets = [0, 0], sizes = [4, 15], strides = [1, 1]} : vector<4x16xf32> to vector<4x15xf32>
    %133 = tpu.concatenate %131, %132 in 1 : vector<4x1xf32>, vector<4x15xf32> -> vector<4x16xf32>
    %134 = vector.extract_strided_slice %130 {offsets = [0, 1], sizes = [4, 15], strides = [1, 1]} : vector<4x16xf32> to vector<4x15xf32>
    %135 = vector.extract_strided_slice %130 {offsets = [0, 0], sizes = [4, 1], strides = [1, 1]} : vector<4x16xf32> to vector<4x1xf32>
    %136 = tpu.concatenate %134, %135 in 1 : vector<4x15xf32>, vector<4x1xf32> -> vector<4x16xf32>
    %137 = vector.extract_strided_slice %78 {offsets = [0, 0], sizes = [4, 1], strides = [1, 1]} : vector<4x3xf32> to vector<4x1xf32>
    %138 = vector.broadcast %137 : vector<4x1xf32> to vector<4x16xf32>
    %139 = arith.mulf %133, %138 : vector<4x16xf32>
    %140 = vector.extract_strided_slice %78 {offsets = [0, 1], sizes = [4, 1], strides = [1, 1]} : vector<4x3xf32> to vector<4x1xf32>
    %141 = vector.broadcast %140 : vector<4x1xf32> to vector<4x16xf32>
    %142 = arith.mulf %130, %141 : vector<4x16xf32>
    %143 = arith.addf %139, %142 : vector<4x16xf32>
    %144 = vector.extract_strided_slice %78 {offsets = [0, 2], sizes = [4, 1], strides = [1, 1]} : vector<4x3xf32> to vector<4x1xf32>
    %145 = vector.broadcast %144 : vector<4x1xf32> to vector<4x16xf32>
    %146 = arith.mulf %136, %145 : vector<4x16xf32>
    %147 = arith.addf %143, %146 : vector<4x16xf32>
    %cst_52 = arith.constant 9.99999935E-39 : f32
    %148 = vector.broadcast %cst_52 : f32 to vector<4x16xf32>
    %149 = arith.maximumf %147, %148 : vector<4x16xf32>
    %150 = math.log %149 : vector<4x16xf32>
    %cst_53 = arith.constant 0.000000e+00 : f32
    %151 = vector.broadcast %cst_53 : f32 to vector<4x16xf32>
    %152 = arith.cmpf ogt, %147, %151 : vector<4x16xf32>
    %153 = vector.broadcast %91 : vector<4x1xf32> to vector<4x16xf32>
    %154 = arith.mulf %153, %150 : vector<4x16xf32>
    %155 = math.exp %154 : vector<4x16xf32>
    %cst_54 = arith.constant 0.000000e+00 : f32
    %156 = vector.broadcast %cst_54 : f32 to vector<4x16xf32>
    %157 = arith.select %152, %155, %156 : vector<4x16xi1>, vector<4x16xf32>
    %cst_55 = arith.constant dense<0.000000e+00> : vector<4xf32>
    %158 = vector.multi_reduction <add>, %157, %cst_55 [1] : vector<4x16xf32> to vector<4xf32>
    %159 = vector.shape_cast %158 : vector<4xf32> to vector<4x1xf32>
    %cst_56 = arith.constant 1.000000e-16 : f32
    %160 = vector.broadcast %cst_56 : f32 to vector<4x1xf32>
    %161 = arith.addf %159, %160 : vector<4x1xf32>
    %162 = tpu.reciprocal %161 {approx = true} : vector<4x1xf32> -> vector<4x1xf32>
    %163 = vector.broadcast %162 : vector<4x1xf32> to vector<4x16xf32>
    %164 = arith.mulf %157, %163 : vector<4x16xf32>
    %165 = vector.extract_strided_slice %164 {offsets = [0, 0], sizes = [2, 16], strides = [1, 1]} : vector<4x16xf32> to vector<2x16xf32>
    %166 = vector.extract_strided_slice %164 {offsets = [2, 0], sizes = [2, 16], strides = [1, 1]} : vector<4x16xf32> to vector<2x16xf32>
    %167 = vector.shape_cast %165 : vector<2x16xf32> to vector<2x16x1xf32>
    %168 = vector.broadcast %167 : vector<2x16x1xf32> to vector<2x16x8xf32>
    %169 = arith.mulf %168, %14 : vector<2x16x8xf32>
    %cst_57 = arith.constant dense<0.000000e+00> : vector<2x8xf32>
    %170 = vector.multi_reduction <add>, %169, %cst_57 [1] : vector<2x16x8xf32> to vector<2x8xf32>
    %171 = vector.extract_strided_slice %43 {offsets = [0, 14], sizes = [2, 8], strides = [1, 1]} : vector<2x30xf32> to vector<2x8xf32>
    %cst_58 = arith.constant 5.000000e-01 : f32
    %172 = vector.broadcast %cst_58 : f32 to vector<2x8xf32>
    %173 = arith.mulf %172, %171 : vector<2x8xf32>
    %174 = math.tanh %173 : vector<2x8xf32>
    %cst_59 = arith.constant 1.000000e+00 : f32
    %175 = vector.broadcast %cst_59 : f32 to vector<2x8xf32>
    %176 = arith.addf %174, %175 : vector<2x8xf32>
    %cst_60 = arith.constant 5.000000e-01 : f32
    %177 = vector.broadcast %cst_60 : f32 to vector<2x8xf32>
    %178 = arith.mulf %177, %176 : vector<2x8xf32>
    %179 = vector.extract_strided_slice %43 {offsets = [0, 22], sizes = [2, 8], strides = [1, 1]} : vector<2x30xf32> to vector<2x8xf32>
    %180 = vector.shape_cast %166 : vector<2x16xf32> to vector<2x16x1xf32>
    %181 = vector.shape_cast %178 : vector<2x8xf32> to vector<2x1x8xf32>
    %182 = vector.broadcast %180 : vector<2x16x1xf32> to vector<2x16x8xf32>
    %183 = vector.broadcast %181 : vector<2x1x8xf32> to vector<2x16x8xf32>
    %184 = arith.mulf %182, %183 : vector<2x16x8xf32>
    %cst_61 = arith.constant 1.000000e+00 : f32
    %185 = vector.broadcast %cst_61 : f32 to vector<2x16x8xf32>
    %186 = arith.subf %185, %184 : vector<2x16x8xf32>
    %187 = arith.mulf %14, %186 : vector<2x16x8xf32>
    %188 = vector.shape_cast %179 : vector<2x8xf32> to vector<2x1x8xf32>
    %189 = vector.broadcast %180 : vector<2x16x1xf32> to vector<2x16x8xf32>
    %190 = vector.broadcast %188 : vector<2x1x8xf32> to vector<2x16x8xf32>
    %191 = arith.mulf %189, %190 : vector<2x16x8xf32>
    %192 = arith.addf %187, %191 : vector<2x16x8xf32>
    %193 = tpu.concatenate %38, %170 in 1 : vector<2x32xf32>, vector<2x8xf32> -> vector<2x40xf32>
    %cst_62 = arith.constant dense<0.000000e+00> : vector<2x8xf32>
    %194 = tpu.matmul %193, %7, %cst_62 {dimension_numbers = #tpu.dot_dimension_numbers<[1], [0], [0], [1], [0, 0, 1, 1], [], []>} : vector<2x40xf32>, vector<40x8xf32>, vector<2x8xf32> -> vector<2x8xf32>
    %195 = vector.broadcast %8 : vector<1x8xf32> to vector<2x8xf32>
    %196 = arith.addf %194, %195 : vector<2x8xf32>
    %cst_63 = arith.constant 5.000000e-01 : f32
    %197 = vector.broadcast %cst_63 : f32 to vector<2x8xf32>
    %198 = arith.mulf %197, %196 : vector<2x8xf32>
    %199 = math.tanh %198 : vector<2x8xf32>
    %cst_64 = arith.constant 1.000000e+00 : f32
    %200 = vector.broadcast %cst_64 : f32 to vector<2x8xf32>
    %201 = arith.addf %199, %200 : vector<2x8xf32>
    %cst_65 = arith.constant 5.000000e-01 : f32
    %202 = vector.broadcast %cst_65 : f32 to vector<2x8xf32>
    %203 = arith.mulf %202, %201 : vector<2x8xf32>
    %c0_66 = arith.constant 0 : index
    %c0_67 = arith.constant 0 : index
    %c0_68 = arith.constant 0 : index
    %204 = vector.load %arg13[%c0_66, %c0_67, %c0_68] : memref<4x2x8xf32, #tpu.memory_space<vmem>>, vector<1x2x8xf32>
    %205 = vector.shape_cast %204 : vector<1x2x8xf32> to vector<2x8xf32>
    %206 = vector.shape_cast %203 : vector<2x8xf32> to vector<1x2x8xf32>
    tpu.vector_store %arg13[%c0_66, %c0_67, %c0_68], %206 {strides = array<i32>} : memref<4x2x8xf32, #tpu.memory_space<vmem>>, vector<1x2x8xf32>,
    %c1 = arith.constant 1 : index
    %c0_69 = arith.constant 0 : index
    %c0_70 = arith.constant 0 : index
    %207 = vector.load %arg1[%c1, %c0_69, %c0_70] : memref<4x2x128xf32, #tpu.memory_space<vmem>>, vector<1x2x128xf32>
    %208 = vector.shape_cast %207 : vector<1x2x128xf32> to vector<2x128xf32>
    %209 = tpu.concatenate %170, %38 in 1 : vector<2x8xf32>, vector<2x32xf32> -> vector<2x40xf32>
    %cst_71 = arith.constant dense<0.000000e+00> : vector<2x128xf32>
    %210 = tpu.matmul %209, %3, %cst_71 {dimension_numbers = #tpu.dot_dimension_numbers<[1], [0], [0], [1], [0, 0, 1, 1], [], []>} : vector<2x40xf32>, vector<40x128xf32>, vector<2x128xf32> -> vector<2x128xf32>
    %211 = arith.addf %208, %210 : vector<2x128xf32>
    %212 = vector.broadcast %4 : vector<1x128xf32> to vector<2x128xf32>
    %213 = arith.addf %211, %212 : vector<2x128xf32>
    %cst_72 = arith.constant 5.000000e-01 : f32
    %214 = vector.broadcast %cst_72 : f32 to vector<2x128xf32>
    %215 = arith.mulf %214, %213 : vector<2x128xf32>
    %216 = math.tanh %215 : vector<2x128xf32>
    %cst_73 = arith.constant 1.000000e+00 : f32
    %217 = vector.broadcast %cst_73 : f32 to vector<2x128xf32>
    %218 = arith.addf %216, %217 : vector<2x128xf32>
    %cst_74 = arith.constant 5.000000e-01 : f32
    %219 = vector.broadcast %cst_74 : f32 to vector<2x128xf32>
    %220 = arith.mulf %219, %218 : vector<2x128xf32>
    %221 = math.tanh %213 : vector<2x128xf32>
    %222 = vector.extract_strided_slice %220 {offsets = [0, 0], sizes = [2, 32], strides = [1, 1]} : vector<2x128xf32> to vector<2x32xf32>
    %223 = vector.extract_strided_slice %220 {offsets = [0, 32], sizes = [2, 32], strides = [1, 1]} : vector<2x128xf32> to vector<2x32xf32>
    %224 = vector.extract_strided_slice %220 {offsets = [0, 96], sizes = [2, 32], strides = [1, 1]} : vector<2x128xf32> to vector<2x32xf32>
    %225 = vector.extract_strided_slice %221 {offsets = [0, 64], sizes = [2, 32], strides = [1, 1]} : vector<2x128xf32> to vector<2x32xf32>
    %226 = arith.mulf %223, %36 : vector<2x32xf32>
    %227 = arith.mulf %222, %225 : vector<2x32xf32>
    %228 = arith.addf %226, %227 : vector<2x32xf32>
    %229 = math.tanh %228 : vector<2x32xf32>
    %230 = arith.mulf %224, %229 : vector<2x32xf32>
    %cst_75 = arith.constant dense<0.000000e+00> : vector<2x128xf32>
    %231 = tpu.matmul %230, %5, %cst_75 {dimension_numbers = #tpu.dot_dimension_numbers<[1], [0], [0], [1], [0, 0, 1, 1], [], []>} : vector<2x32xf32>, vector<32x128xf32>, vector<2x128xf32> -> vector<2x128xf32>
    %232 = vector.broadcast %6 : vector<1x128xf32> to vector<2x128xf32>
    %233 = arith.addf %231, %232 : vector<2x128xf32>
    %234 = vector.extract_strided_slice %233 {offsets = [0, 0], sizes = [2, 14], strides = [1, 1]} : vector<2x128xf32> to vector<2x14xf32>
    %235 = vector.extract_strided_slice %233 {offsets = [0, 14], sizes = [2, 30], strides = [1, 1]} : vector<2x128xf32> to vector<2x30xf32>
    %236 = vector.extract_strided_slice %235 {offsets = [0, 0], sizes = [2, 14], strides = [1, 1]} : vector<2x30xf32> to vector<2x14xf32>
    %237 = tpu.concatenate %234, %236 in 0 : vector<2x14xf32>, vector<2x14xf32> -> vector<4x14xf32>
    %238 = vector.extract_strided_slice %237 {offsets = [0, 0], sizes = [4, 8], strides = [1, 1]} : vector<4x14xf32> to vector<4x8xf32>
    %cst_76 = arith.constant 1.000000e-16 : f32
    %239 = vector.broadcast %cst_76 : f32 to vector<4x8xf32>
    %240 = arith.addf %238, %239 : vector<4x8xf32>
    %241 = vector.extract_strided_slice %237 {offsets = [0, 8], sizes = [4, 1], strides = [1, 1]} : vector<4x14xf32> to vector<4x1xf32>
    %cst_77 = arith.constant 0.000000e+00 : f32
    %242 = vector.broadcast %cst_77 : f32 to vector<4x1xf32>
    %243 = arith.maximumf %241, %242 : vector<4x1xf32>
    %244 = math.absf %241 : vector<4x1xf32>
    %cst_78 = arith.constant 0.000000e+00 : f32
    %245 = vector.broadcast %cst_78 : f32 to vector<4x1xf32>
    %246 = arith.subf %245, %244 : vector<4x1xf32>
    %247 = math.exp %246 : vector<4x1xf32>
    %cst_79 = arith.constant 1.000000e+00 : f32
    %248 = vector.broadcast %cst_79 : f32 to vector<4x1xf32>
    %249 = arith.addf %248, %247 : vector<4x1xf32>
    %250 = math.log %249 : vector<4x1xf32>
    %251 = arith.addf %243, %250 : vector<4x1xf32>
    %252 = vector.extract_strided_slice %237 {offsets = [0, 9], sizes = [4, 1], strides = [1, 1]} : vector<4x14xf32> to vector<4x1xf32>
    %cst_80 = arith.constant 5.000000e-01 : f32
    %253 = vector.broadcast %cst_80 : f32 to vector<4x1xf32>
    %254 = arith.mulf %253, %252 : vector<4x1xf32>
    %255 = math.tanh %254 : vector<4x1xf32>
    %cst_81 = arith.constant 1.000000e+00 : f32
    %256 = vector.broadcast %cst_81 : f32 to vector<4x1xf32>
    %257 = arith.addf %255, %256 : vector<4x1xf32>
    %cst_82 = arith.constant 5.000000e-01 : f32
    %258 = vector.broadcast %cst_82 : f32 to vector<4x1xf32>
    %259 = arith.mulf %258, %257 : vector<4x1xf32>
    %260 = vector.extract_strided_slice %237 {offsets = [0, 10], sizes = [4, 3], strides = [1, 1]} : vector<4x14xf32> to vector<4x3xf32>
    %cst_83 = arith.constant dense<0xFF800000> : vector<4xf32>
    %261 = vector.multi_reduction <maximumf>, %260, %cst_83 [1] : vector<4x3xf32> to vector<4xf32>
    %262 = vector.shape_cast %261 : vector<4xf32> to vector<4x1xf32>
    %263 = vector.broadcast %262 : vector<4x1xf32> to vector<4x3xf32>
    %264 = arith.subf %260, %263 : vector<4x3xf32>
    %265 = math.exp %264 : vector<4x3xf32>
    %cst_84 = arith.constant dense<0.000000e+00> : vector<4xf32>
    %266 = vector.multi_reduction <add>, %265, %cst_84 [1] : vector<4x3xf32> to vector<4xf32>
    %267 = vector.shape_cast %266 : vector<4xf32> to vector<4x1xf32>
    %268 = tpu.reciprocal %267 {approx = true} : vector<4x1xf32> -> vector<4x1xf32>
    %269 = vector.broadcast %268 : vector<4x1xf32> to vector<4x3xf32>
    %270 = arith.mulf %265, %269 : vector<4x3xf32>
    %271 = vector.extract_strided_slice %237 {offsets = [0, 13], sizes = [4, 1], strides = [1, 1]} : vector<4x14xf32> to vector<4x1xf32>
    %cst_85 = arith.constant 0.000000e+00 : f32
    %272 = vector.broadcast %cst_85 : f32 to vector<4x1xf32>
    %273 = arith.maximumf %271, %272 : vector<4x1xf32>
    %274 = math.absf %271 : vector<4x1xf32>
    %cst_86 = arith.constant 0.000000e+00 : f32
    %275 = vector.broadcast %cst_86 : f32 to vector<4x1xf32>
    %276 = arith.subf %275, %274 : vector<4x1xf32>
    %277 = math.exp %276 : vector<4x1xf32>
    %cst_87 = arith.constant 1.000000e+00 : f32
    %278 = vector.broadcast %cst_87 : f32 to vector<4x1xf32>
    %279 = arith.addf %278, %277 : vector<4x1xf32>
    %280 = math.log %279 : vector<4x1xf32>
    %281 = arith.addf %273, %280 : vector<4x1xf32>
    %cst_88 = arith.constant 1.000000e+00 : f32
    %282 = vector.broadcast %cst_88 : f32 to vector<4x1xf32>
    %283 = arith.addf %282, %281 : vector<4x1xf32>
    %284 = tpu.concatenate %165, %166 in 0 : vector<2x16xf32>, vector<2x16xf32> -> vector<4x16xf32>
    %cst_89 = arith.constant 1.000000e-16 : f32
    %285 = vector.broadcast %cst_89 : f32 to vector<2x16x8xf32>
    %286 = arith.addf %192, %285 : vector<2x16x8xf32>
    %287 = arith.mulf %286, %286 : vector<2x16x8xf32>
    %cst_90 = arith.constant dense<0.000000e+00> : vector<2x16xf32>
    %288 = vector.multi_reduction <add>, %287, %cst_90 [2] : vector<2x16x8xf32> to vector<2x16xf32>
    %289 = tpu.concatenate %286, %286 in 0 : vector<2x16x8xf32>, vector<2x16x8xf32> -> vector<4x16x8xf32>
    %290 = tpu.concatenate %288, %288 in 0 : vector<2x16xf32>, vector<2x16xf32> -> vector<4x16xf32>
    %291 = vector.shape_cast %240 : vector<4x8xf32> to vector<4x1x8xf32>
    %292 = vector.broadcast %291 : vector<4x1x8xf32> to vector<4x16x8xf32>
    %293 = arith.mulf %289, %292 : vector<4x16x8xf32>
    %cst_91 = arith.constant dense<0.000000e+00> : vector<4x16xf32>
    %294 = vector.multi_reduction <add>, %293, %cst_91 [2] : vector<4x16x8xf32> to vector<4x16xf32>
    %295 = arith.mulf %240, %240 : vector<4x8xf32>
    %cst_92 = arith.constant dense<0.000000e+00> : vector<4xf32>
    %296 = vector.multi_reduction <add>, %295, %cst_92 [1] : vector<4x8xf32> to vector<4xf32>
    %297 = vector.shape_cast %296 : vector<4xf32> to vector<4x1xf32>
    %298 = vector.broadcast %297 : vector<4x1xf32> to vector<4x16xf32>
    %299 = arith.mulf %290, %298 : vector<4x16xf32>
    %cst_93 = arith.constant 1.000000e-16 : f32
    %300 = vector.broadcast %cst_93 : f32 to vector<4x16xf32>
    %301 = arith.maximumf %299, %300 : vector<4x16xf32>
    %302 = math.rsqrt %301 : vector<4x16xf32>
    %303 = arith.mulf %294, %302 : vector<4x16xf32>
    %304 = vector.broadcast %251 : vector<4x1xf32> to vector<4x16xf32>
    %305 = arith.mulf %304, %303 : vector<4x16xf32>
    %cst_94 = arith.constant dense<0xFF800000> : vector<4xf32>
    %306 = vector.multi_reduction <maximumf>, %305, %cst_94 [1] : vector<4x16xf32> to vector<4xf32>
    %307 = vector.shape_cast %306 : vector<4xf32> to vector<4x1xf32>
    %308 = vector.broadcast %307 : vector<4x1xf32> to vector<4x16xf32>
    %309 = arith.subf %305, %308 : vector<4x16xf32>
    %310 = math.exp %309 : vector<4x16xf32>
    %cst_95 = arith.constant dense<0.000000e+00> : vector<4xf32>
    %311 = vector.multi_reduction <add>, %310, %cst_95 [1] : vector<4x16xf32> to vector<4xf32>
    %312 = vector.shape_cast %311 : vector<4xf32> to vector<4x1xf32>
    %313 = tpu.reciprocal %312 {approx = true} : vector<4x1xf32> -> vector<4x1xf32>
    %314 = vector.broadcast %313 : vector<4x1xf32> to vector<4x16xf32>
    %315 = arith.mulf %310, %314 : vector<4x16xf32>
    %316 = vector.broadcast %259 : vector<4x1xf32> to vector<4x16xf32>
    %317 = arith.mulf %316, %315 : vector<4x16xf32>
    %cst_96 = arith.constant 1.000000e+00 : f32
    %318 = vector.broadcast %cst_96 : f32 to vector<4x1xf32>
    %319 = arith.subf %318, %259 : vector<4x1xf32>
    %320 = vector.broadcast %319 : vector<4x1xf32> to vector<4x16xf32>
    %321 = arith.mulf %320, %284 : vector<4x16xf32>
    %322 = arith.addf %317, %321 : vector<4x16xf32>
    %323 = vector.extract_strided_slice %322 {offsets = [0, 15], sizes = [4, 1], strides = [1, 1]} : vector<4x16xf32> to vector<4x1xf32>
    %324 = vector.extract_strided_slice %322 {offsets = [0, 0], sizes = [4, 15], strides = [1, 1]} : vector<4x16xf32> to vector<4x15xf32>
    %325 = tpu.concatenate %323, %324 in 1 : vector<4x1xf32>, vector<4x15xf32> -> vector<4x16xf32>
    %326 = vector.extract_strided_slice %322 {offsets = [0, 1], sizes = [4, 15], strides = [1, 1]} : vector<4x16xf32> to vector<4x15xf32>
    %327 = vector.extract_strided_slice %322 {offsets = [0, 0], sizes = [4, 1], strides = [1, 1]} : vector<4x16xf32> to vector<4x1xf32>
    %328 = tpu.concatenate %326, %327 in 1 : vector<4x15xf32>, vector<4x1xf32> -> vector<4x16xf32>
    %329 = vector.extract_strided_slice %270 {offsets = [0, 0], sizes = [4, 1], strides = [1, 1]} : vector<4x3xf32> to vector<4x1xf32>
    %330 = vector.broadcast %329 : vector<4x1xf32> to vector<4x16xf32>
    %331 = arith.mulf %325, %330 : vector<4x16xf32>
    %332 = vector.extract_strided_slice %270 {offsets = [0, 1], sizes = [4, 1], strides = [1, 1]} : vector<4x3xf32> to vector<4x1xf32>
    %333 = vector.broadcast %332 : vector<4x1xf32> to vector<4x16xf32>
    %334 = arith.mulf %322, %333 : vector<4x16xf32>
    %335 = arith.addf %331, %334 : vector<4x16xf32>
    %336 = vector.extract_strided_slice %270 {offsets = [0, 2], sizes = [4, 1], strides = [1, 1]} : vector<4x3xf32> to vector<4x1xf32>
    %337 = vector.broadcast %336 : vector<4x1xf32> to vector<4x16xf32>
    %338 = arith.mulf %328, %337 : vector<4x16xf32>
    %339 = arith.addf %335, %338 : vector<4x16xf32>
    %cst_97 = arith.constant 9.99999935E-39 : f32
    %340 = vector.broadcast %cst_97 : f32 to vector<4x16xf32>
    %341 = arith.maximumf %339, %340 : vector<4x16xf32>
    %342 = math.log %341 : vector<4x16xf32>
    %cst_98 = arith.constant 0.000000e+00 : f32
    %343 = vector.broadcast %cst_98 : f32 to vector<4x16xf32>
    %344 = arith.cmpf ogt, %339, %343 : vector<4x16xf32>
    %345 = vector.broadcast %283 : vector<4x1xf32> to vector<4x16xf32>
    %346 = arith.mulf %345, %342 : vector<4x16xf32>
    %347 = math.exp %346 : vector<4x16xf32>
    %cst_99 = arith.constant 0.000000e+00 : f32
    %348 = vector.broadcast %cst_99 : f32 to vector<4x16xf32>
    %349 = arith.select %344, %347, %348 : vector<4x16xi1>, vector<4x16xf32>
    %cst_100 = arith.constant dense<0.000000e+00> : vector<4xf32>
    %350 = vector.multi_reduction <add>, %349, %cst_100 [1] : vector<4x16xf32> to vector<4xf32>
    %351 = vector.shape_cast %350 : vector<4xf32> to vector<4x1xf32>
    %cst_101 = arith.constant 1.000000e-16 : f32
    %352 = vector.broadcast %cst_101 : f32 to vector<4x1xf32>
    %353 = arith.addf %351, %352 : vector<4x1xf32>
    %354 = tpu.reciprocal %353 {approx = true} : vector<4x1xf32> -> vector<4x1xf32>
    %355 = vector.broadcast %354 : vector<4x1xf32> to vector<4x16xf32>
    %356 = arith.mulf %349, %355 : vector<4x16xf32>
    %357 = vector.extract_strided_slice %356 {offsets = [0, 0], sizes = [2, 16], strides = [1, 1]} : vector<4x16xf32> to vector<2x16xf32>
    %358 = vector.extract_strided_slice %356 {offsets = [2, 0], sizes = [2, 16], strides = [1, 1]} : vector<4x16xf32> to vector<2x16xf32>
    %359 = vector.shape_cast %357 : vector<2x16xf32> to vector<2x16x1xf32>
    %360 = vector.broadcast %359 : vector<2x16x1xf32> to vector<2x16x8xf32>
    %361 = arith.mulf %360, %192 : vector<2x16x8xf32>
    %cst_102 = arith.constant dense<0.000000e+00> : vector<2x8xf32>
    %362 = vector.multi_reduction <add>, %361, %cst_102 [1] : vector<2x16x8xf32> to vector<2x8xf32>
    %363 = vector.extract_strided_slice %235 {offsets = [0, 14], sizes = [2, 8], strides = [1, 1]} : vector<2x30xf32> to vector<2x8xf32>
    %cst_103 = arith.constant 5.000000e-01 : f32
    %364 = vector.broadcast %cst_103 : f32 to vector<2x8xf32>
    %365 = arith.mulf %364, %363 : vector<2x8xf32>
    %366 = math.tanh %365 : vector<2x8xf32>
    %cst_104 = arith.constant 1.000000e+00 : f32
    %367 = vector.broadcast %cst_104 : f32 to vector<2x8xf32>
    %368 = arith.addf %366, %367 : vector<2x8xf32>
    %cst_105 = arith.constant 5.000000e-01 : f32
    %369 = vector.broadcast %cst_105 : f32 to vector<2x8xf32>
    %370 = arith.mulf %369, %368 : vector<2x8xf32>
    %371 = vector.extract_strided_slice %235 {offsets = [0, 22], sizes = [2, 8], strides = [1, 1]} : vector<2x30xf32> to vector<2x8xf32>
    %372 = vector.shape_cast %358 : vector<2x16xf32> to vector<2x16x1xf32>
    %373 = vector.shape_cast %370 : vector<2x8xf32> to vector<2x1x8xf32>
    %374 = vector.broadcast %372 : vector<2x16x1xf32> to vector<2x16x8xf32>
    %375 = vector.broadcast %373 : vector<2x1x8xf32> to vector<2x16x8xf32>
    %376 = arith.mulf %374, %375 : vector<2x16x8xf32>
    %cst_106 = arith.constant 1.000000e+00 : f32
    %377 = vector.broadcast %cst_106 : f32 to vector<2x16x8xf32>
    %378 = arith.subf %377, %376 : vector<2x16x8xf32>
    %379 = arith.mulf %192, %378 : vector<2x16x8xf32>
    %380 = vector.shape_cast %371 : vector<2x8xf32> to vector<2x1x8xf32>
    %381 = vector.broadcast %372 : vector<2x16x1xf32> to vector<2x16x8xf32>
    %382 = vector.broadcast %380 : vector<2x1x8xf32> to vector<2x16x8xf32>
    %383 = arith.mulf %381, %382 : vector<2x16x8xf32>
    %384 = arith.addf %379, %383 : vector<2x16x8xf32>
    %385 = tpu.concatenate %230, %362 in 1 : vector<2x32xf32>, vector<2x8xf32> -> vector<2x40xf32>
    %cst_107 = arith.constant dense<0.000000e+00> : vector<2x8xf32>
    %386 = tpu.matmul %385, %7, %cst_107 {dimension_numbers = #tpu.dot_dimension_numbers<[1], [0], [0], [1], [0, 0, 1, 1], [], []>} : vector<2x40xf32>, vector<40x8xf32>, vector<2x8xf32> -> vector<2x8xf32>
    %387 = vector.broadcast %8 : vector<1x8xf32> to vector<2x8xf32>
    %388 = arith.addf %386, %387 : vector<2x8xf32>
    %cst_108 = arith.constant 5.000000e-01 : f32
    %389 = vector.broadcast %cst_108 : f32 to vector<2x8xf32>
    %390 = arith.mulf %389, %388 : vector<2x8xf32>
    %391 = math.tanh %390 : vector<2x8xf32>
    %cst_109 = arith.constant 1.000000e+00 : f32
    %392 = vector.broadcast %cst_109 : f32 to vector<2x8xf32>
    %393 = arith.addf %391, %392 : vector<2x8xf32>
    %cst_110 = arith.constant 5.000000e-01 : f32
    %394 = vector.broadcast %cst_110 : f32 to vector<2x8xf32>
    %395 = arith.mulf %394, %393 : vector<2x8xf32>
    %c1_111 = arith.constant 1 : index
    %c0_112 = arith.constant 0 : index
    %c0_113 = arith.constant 0 : index
    %396 = vector.load %arg13[%c1_111, %c0_112, %c0_113] : memref<4x2x8xf32, #tpu.memory_space<vmem>>, vector<1x2x8xf32>
    %397 = vector.shape_cast %396 : vector<1x2x8xf32> to vector<2x8xf32>
    %398 = vector.shape_cast %395 : vector<2x8xf32> to vector<1x2x8xf32>
    tpu.vector_store %arg13[%c1_111, %c0_112, %c0_113], %398 {strides = array<i32>} : memref<4x2x8xf32, #tpu.memory_space<vmem>>, vector<1x2x8xf32>,
    %c2 = arith.constant 2 : index
    %c0_114 = arith.constant 0 : index
    %c0_115 = arith.constant 0 : index
    %399 = vector.load %arg1[%c2, %c0_114, %c0_115] : memref<4x2x128xf32, #tpu.memory_space<vmem>>, vector<1x2x128xf32>
    %400 = vector.shape_cast %399 : vector<1x2x128xf32> to vector<2x128xf32>
    %401 = tpu.concatenate %362, %230 in 1 : vector<2x8xf32>, vector<2x32xf32> -> vector<2x40xf32>
    %cst_116 = arith.constant dense<0.000000e+00> : vector<2x128xf32>
    %402 = tpu.matmul %401, %3, %cst_116 {dimension_numbers = #tpu.dot_dimension_numbers<[1], [0], [0], [1], [0, 0, 1, 1], [], []>} : vector<2x40xf32>, vector<40x128xf32>, vector<2x128xf32> -> vector<2x128xf32>
    %403 = arith.addf %400, %402 : vector<2x128xf32>
    %404 = vector.broadcast %4 : vector<1x128xf32> to vector<2x128xf32>
    %405 = arith.addf %403, %404 : vector<2x128xf32>
    %cst_117 = arith.constant 5.000000e-01 : f32
    %406 = vector.broadcast %cst_117 : f32 to vector<2x128xf32>
    %407 = arith.mulf %406, %405 : vector<2x128xf32>
    %408 = math.tanh %407 : vector<2x128xf32>
    %cst_118 = arith.constant 1.000000e+00 : f32
    %409 = vector.broadcast %cst_118 : f32 to vector<2x128xf32>
    %410 = arith.addf %408, %409 : vector<2x128xf32>
    %cst_119 = arith.constant 5.000000e-01 : f32
    %411 = vector.broadcast %cst_119 : f32 to vector<2x128xf32>
    %412 = arith.mulf %411, %410 : vector<2x128xf32>
    %413 = math.tanh %405 : vector<2x128xf32>
    %414 = vector.extract_strided_slice %412 {offsets = [0, 0], sizes = [2, 32], strides = [1, 1]} : vector<2x128xf32> to vector<2x32xf32>
    %415 = vector.extract_strided_slice %412 {offsets = [0, 32], sizes = [2, 32], strides = [1, 1]} : vector<2x128xf32> to vector<2x32xf32>
    %416 = vector.extract_strided_slice %412 {offsets = [0, 96], sizes = [2, 32], strides = [1, 1]} : vector<2x128xf32> to vector<2x32xf32>
    %417 = vector.extract_strided_slice %413 {offsets = [0, 64], sizes = [2, 32], strides = [1, 1]} : vector<2x128xf32> to vector<2x32xf32>
    %418 = arith.mulf %415, %228 : vector<2x32xf32>
    %419 = arith.mulf %414, %417 : vector<2x32xf32>
    %420 = arith.addf %418, %419 : vector<2x32xf32>
    %421 = math.tanh %420 : vector<2x32xf32>
    %422 = arith.mulf %416, %421 : vector<2x32xf32>
    %cst_120 = arith.constant dense<0.000000e+00> : vector<2x128xf32>
    %423 = tpu.matmul %422, %5, %cst_120 {dimension_numbers = #tpu.dot_dimension_numbers<[1], [0], [0], [1], [0, 0, 1, 1], [], []>} : vector<2x32xf32>, vector<32x128xf32>, vector<2x128xf32> -> vector<2x128xf32>
    %424 = vector.broadcast %6 : vector<1x128xf32> to vector<2x128xf32>
    %425 = arith.addf %423, %424 : vector<2x128xf32>
    %426 = vector.extract_strided_slice %425 {offsets = [0, 0], sizes = [2, 14], strides = [1, 1]} : vector<2x128xf32> to vector<2x14xf32>
    %427 = vector.extract_strided_slice %425 {offsets = [0, 14], sizes = [2, 30], strides = [1, 1]} : vector<2x128xf32> to vector<2x30xf32>
    %428 = vector.extract_strided_slice %427 {offsets = [0, 0], sizes = [2, 14], strides = [1, 1]} : vector<2x30xf32> to vector<2x14xf32>
    %429 = tpu.concatenate %426, %428 in 0 : vector<2x14xf32>, vector<2x14xf32> -> vector<4x14xf32>
    %430 = vector.extract_strided_slice %429 {offsets = [0, 0], sizes = [4, 8], strides = [1, 1]} : vector<4x14xf32> to vector<4x8xf32>
    %cst_121 = arith.constant 1.000000e-16 : f32
    %431 = vector.broadcast %cst_121 : f32 to vector<4x8xf32>
    %432 = arith.addf %430, %431 : vector<4x8xf32>
    %433 = vector.extract_strided_slice %429 {offsets = [0, 8], sizes = [4, 1], strides = [1, 1]} : vector<4x14xf32> to vector<4x1xf32>
    %cst_122 = arith.constant 0.000000e+00 : f32
    %434 = vector.broadcast %cst_122 : f32 to vector<4x1xf32>
    %435 = arith.maximumf %433, %434 : vector<4x1xf32>
    %436 = math.absf %433 : vector<4x1xf32>
    %cst_123 = arith.constant 0.000000e+00 : f32
    %437 = vector.broadcast %cst_123 : f32 to vector<4x1xf32>
    %438 = arith.subf %437, %436 : vector<4x1xf32>
    %439 = math.exp %438 : vector<4x1xf32>
    %cst_124 = arith.constant 1.000000e+00 : f32
    %440 = vector.broadcast %cst_124 : f32 to vector<4x1xf32>
    %441 = arith.addf %440, %439 : vector<4x1xf32>
    %442 = math.log %441 : vector<4x1xf32>
    %443 = arith.addf %435, %442 : vector<4x1xf32>
    %444 = vector.extract_strided_slice %429 {offsets = [0, 9], sizes = [4, 1], strides = [1, 1]} : vector<4x14xf32> to vector<4x1xf32>
    %cst_125 = arith.constant 5.000000e-01 : f32
    %445 = vector.broadcast %cst_125 : f32 to vector<4x1xf32>
    %446 = arith.mulf %445, %444 : vector<4x1xf32>
    %447 = math.tanh %446 : vector<4x1xf32>
    %cst_126 = arith.constant 1.000000e+00 : f32
    %448 = vector.broadcast %cst_126 : f32 to vector<4x1xf32>
    %449 = arith.addf %447, %448 : vector<4x1xf32>
    %cst_127 = arith.constant 5.000000e-01 : f32
    %450 = vector.broadcast %cst_127 : f32 to vector<4x1xf32>
    %451 = arith.mulf %450, %449 : vector<4x1xf32>
    %452 = vector.extract_strided_slice %429 {offsets = [0, 10], sizes = [4, 3], strides = [1, 1]} : vector<4x14xf32> to vector<4x3xf32>
    %cst_128 = arith.constant dense<0xFF800000> : vector<4xf32>
    %453 = vector.multi_reduction <maximumf>, %452, %cst_128 [1] : vector<4x3xf32> to vector<4xf32>
    %454 = vector.shape_cast %453 : vector<4xf32> to vector<4x1xf32>
    %455 = vector.broadcast %454 : vector<4x1xf32> to vector<4x3xf32>
    %456 = arith.subf %452, %455 : vector<4x3xf32>
    %457 = math.exp %456 : vector<4x3xf32>
    %cst_129 = arith.constant dense<0.000000e+00> : vector<4xf32>
    %458 = vector.multi_reduction <add>, %457, %cst_129 [1] : vector<4x3xf32> to vector<4xf32>
    %459 = vector.shape_cast %458 : vector<4xf32> to vector<4x1xf32>
    %460 = tpu.reciprocal %459 {approx = true} : vector<4x1xf32> -> vector<4x1xf32>
    %461 = vector.broadcast %460 : vector<4x1xf32> to vector<4x3xf32>
    %462 = arith.mulf %457, %461 : vector<4x3xf32>
    %463 = vector.extract_strided_slice %429 {offsets = [0, 13], sizes = [4, 1], strides = [1, 1]} : vector<4x14xf32> to vector<4x1xf32>
    %cst_130 = arith.constant 0.000000e+00 : f32
    %464 = vector.broadcast %cst_130 : f32 to vector<4x1xf32>
    %465 = arith.maximumf %463, %464 : vector<4x1xf32>
    %466 = math.absf %463 : vector<4x1xf32>
    %cst_131 = arith.constant 0.000000e+00 : f32
    %467 = vector.broadcast %cst_131 : f32 to vector<4x1xf32>
    %468 = arith.subf %467, %466 : vector<4x1xf32>
    %469 = math.exp %468 : vector<4x1xf32>
    %cst_132 = arith.constant 1.000000e+00 : f32
    %470 = vector.broadcast %cst_132 : f32 to vector<4x1xf32>
    %471 = arith.addf %470, %469 : vector<4x1xf32>
    %472 = math.log %471 : vector<4x1xf32>
    %473 = arith.addf %465, %472 : vector<4x1xf32>
    %cst_133 = arith.constant 1.000000e+00 : f32
    %474 = vector.broadcast %cst_133 : f32 to vector<4x1xf32>
    %475 = arith.addf %474, %473 : vector<4x1xf32>
    %476 = tpu.concatenate %357, %358 in 0 : vector<2x16xf32>, vector<2x16xf32> -> vector<4x16xf32>
    %cst_134 = arith.constant 1.000000e-16 : f32
    %477 = vector.broadcast %cst_134 : f32 to vector<2x16x8xf32>
    %478 = arith.addf %384, %477 : vector<2x16x8xf32>
    %479 = arith.mulf %478, %478 : vector<2x16x8xf32>
    %cst_135 = arith.constant dense<0.000000e+00> : vector<2x16xf32>
    %480 = vector.multi_reduction <add>, %479, %cst_135 [2] : vector<2x16x8xf32> to vector<2x16xf32>
    %481 = tpu.concatenate %478, %478 in 0 : vector<2x16x8xf32>, vector<2x16x8xf32> -> vector<4x16x8xf32>
    %482 = tpu.concatenate %480, %480 in 0 : vector<2x16xf32>, vector<2x16xf32> -> vector<4x16xf32>
    %483 = vector.shape_cast %432 : vector<4x8xf32> to vector<4x1x8xf32>
    %484 = vector.broadcast %483 : vector<4x1x8xf32> to vector<4x16x8xf32>
    %485 = arith.mulf %481, %484 : vector<4x16x8xf32>
    %cst_136 = arith.constant dense<0.000000e+00> : vector<4x16xf32>
    %486 = vector.multi_reduction <add>, %485, %cst_136 [2] : vector<4x16x8xf32> to vector<4x16xf32>
    %487 = arith.mulf %432, %432 : vector<4x8xf32>
    %cst_137 = arith.constant dense<0.000000e+00> : vector<4xf32>
    %488 = vector.multi_reduction <add>, %487, %cst_137 [1] : vector<4x8xf32> to vector<4xf32>
    %489 = vector.shape_cast %488 : vector<4xf32> to vector<4x1xf32>
    %490 = vector.broadcast %489 : vector<4x1xf32> to vector<4x16xf32>
    %491 = arith.mulf %482, %490 : vector<4x16xf32>
    %cst_138 = arith.constant 1.000000e-16 : f32
    %492 = vector.broadcast %cst_138 : f32 to vector<4x16xf32>
    %493 = arith.maximumf %491, %492 : vector<4x16xf32>
    %494 = math.rsqrt %493 : vector<4x16xf32>
    %495 = arith.mulf %486, %494 : vector<4x16xf32>
    %496 = vector.broadcast %443 : vector<4x1xf32> to vector<4x16xf32>
    %497 = arith.mulf %496, %495 : vector<4x16xf32>
    %cst_139 = arith.constant dense<0xFF800000> : vector<4xf32>
    %498 = vector.multi_reduction <maximumf>, %497, %cst_139 [1] : vector<4x16xf32> to vector<4xf32>
    %499 = vector.shape_cast %498 : vector<4xf32> to vector<4x1xf32>
    %500 = vector.broadcast %499 : vector<4x1xf32> to vector<4x16xf32>
    %501 = arith.subf %497, %500 : vector<4x16xf32>
    %502 = math.exp %501 : vector<4x16xf32>
    %cst_140 = arith.constant dense<0.000000e+00> : vector<4xf32>
    %503 = vector.multi_reduction <add>, %502, %cst_140 [1] : vector<4x16xf32> to vector<4xf32>
    %504 = vector.shape_cast %503 : vector<4xf32> to vector<4x1xf32>
    %505 = tpu.reciprocal %504 {approx = true} : vector<4x1xf32> -> vector<4x1xf32>
    %506 = vector.broadcast %505 : vector<4x1xf32> to vector<4x16xf32>
    %507 = arith.mulf %502, %506 : vector<4x16xf32>
    %508 = vector.broadcast %451 : vector<4x1xf32> to vector<4x16xf32>
    %509 = arith.mulf %508, %507 : vector<4x16xf32>
    %cst_141 = arith.constant 1.000000e+00 : f32
    %510 = vector.broadcast %cst_141 : f32 to vector<4x1xf32>
    %511 = arith.subf %510, %451 : vector<4x1xf32>
    %512 = vector.broadcast %511 : vector<4x1xf32> to vector<4x16xf32>
    %513 = arith.mulf %512, %476 : vector<4x16xf32>
    %514 = arith.addf %509, %513 : vector<4x16xf32>
    %515 = vector.extract_strided_slice %514 {offsets = [0, 15], sizes = [4, 1], strides = [1, 1]} : vector<4x16xf32> to vector<4x1xf32>
    %516 = vector.extract_strided_slice %514 {offsets = [0, 0], sizes = [4, 15], strides = [1, 1]} : vector<4x16xf32> to vector<4x15xf32>
    %517 = tpu.concatenate %515, %516 in 1 : vector<4x1xf32>, vector<4x15xf32> -> vector<4x16xf32>
    %518 = vector.extract_strided_slice %514 {offsets = [0, 1], sizes = [4, 15], strides = [1, 1]} : vector<4x16xf32> to vector<4x15xf32>
    %519 = vector.extract_strided_slice %514 {offsets = [0, 0], sizes = [4, 1], strides = [1, 1]} : vector<4x16xf32> to vector<4x1xf32>
    %520 = tpu.concatenate %518, %519 in 1 : vector<4x15xf32>, vector<4x1xf32> -> vector<4x16xf32>
    %521 = vector.extract_strided_slice %462 {offsets = [0, 0], sizes = [4, 1], strides = [1, 1]} : vector<4x3xf32> to vector<4x1xf32>
    %522 = vector.broadcast %521 : vector<4x1xf32> to vector<4x16xf32>
    %523 = arith.mulf %517, %522 : vector<4x16xf32>
    %524 = vector.extract_strided_slice %462 {offsets = [0, 1], sizes = [4, 1], strides = [1, 1]} : vector<4x3xf32> to vector<4x1xf32>
    %525 = vector.broadcast %524 : vector<4x1xf32> to vector<4x16xf32>
    %526 = arith.mulf %514, %525 : vector<4x16xf32>
    %527 = arith.addf %523, %526 : vector<4x16xf32>
    %528 = vector.extract_strided_slice %462 {offsets = [0, 2], sizes = [4, 1], strides = [1, 1]} : vector<4x3xf32> to vector<4x1xf32>
    %529 = vector.broadcast %528 : vector<4x1xf32> to vector<4x16xf32>
    %530 = arith.mulf %520, %529 : vector<4x16xf32>
    %531 = arith.addf %527, %530 : vector<4x16xf32>
    %cst_142 = arith.constant 9.99999935E-39 : f32
    %532 = vector.broadcast %cst_142 : f32 to vector<4x16xf32>
    %533 = arith.maximumf %531, %532 : vector<4x16xf32>
    %534 = math.log %533 : vector<4x16xf32>
    %cst_143 = arith.constant 0.000000e+00 : f32
    %535 = vector.broadcast %cst_143 : f32 to vector<4x16xf32>
    %536 = arith.cmpf ogt, %531, %535 : vector<4x16xf32>
    %537 = vector.broadcast %475 : vector<4x1xf32> to vector<4x16xf32>
    %538 = arith.mulf %537, %534 : vector<4x16xf32>
    %539 = math.exp %538 : vector<4x16xf32>
    %cst_144 = arith.constant 0.000000e+00 : f32
    %540 = vector.broadcast %cst_144 : f32 to vector<4x16xf32>
    %541 = arith.select %536, %539, %540 : vector<4x16xi1>, vector<4x16xf32>
    %cst_145 = arith.constant dense<0.000000e+00> : vector<4xf32>
    %542 = vector.multi_reduction <add>, %541, %cst_145 [1] : vector<4x16xf32> to vector<4xf32>
    %543 = vector.shape_cast %542 : vector<4xf32> to vector<4x1xf32>
    %cst_146 = arith.constant 1.000000e-16 : f32
    %544 = vector.broadcast %cst_146 : f32 to vector<4x1xf32>
    %545 = arith.addf %543, %544 : vector<4x1xf32>
    %546 = tpu.reciprocal %545 {approx = true} : vector<4x1xf32> -> vector<4x1xf32>
    %547 = vector.broadcast %546 : vector<4x1xf32> to vector<4x16xf32>
    %548 = arith.mulf %541, %547 : vector<4x16xf32>
    %549 = vector.extract_strided_slice %548 {offsets = [0, 0], sizes = [2, 16], strides = [1, 1]} : vector<4x16xf32> to vector<2x16xf32>
    %550 = vector.extract_strided_slice %548 {offsets = [2, 0], sizes = [2, 16], strides = [1, 1]} : vector<4x16xf32> to vector<2x16xf32>
    %551 = vector.shape_cast %549 : vector<2x16xf32> to vector<2x16x1xf32>
    %552 = vector.broadcast %551 : vector<2x16x1xf32> to vector<2x16x8xf32>
    %553 = arith.mulf %552, %384 : vector<2x16x8xf32>
    %cst_147 = arith.constant dense<0.000000e+00> : vector<2x8xf32>
    %554 = vector.multi_reduction <add>, %553, %cst_147 [1] : vector<2x16x8xf32> to vector<2x8xf32>
    %555 = vector.extract_strided_slice %427 {offsets = [0, 14], sizes = [2, 8], strides = [1, 1]} : vector<2x30xf32> to vector<2x8xf32>
    %cst_148 = arith.constant 5.000000e-01 : f32
    %556 = vector.broadcast %cst_148 : f32 to vector<2x8xf32>
    %557 = arith.mulf %556, %555 : vector<2x8xf32>
    %558 = math.tanh %557 : vector<2x8xf32>
    %cst_149 = arith.constant 1.000000e+00 : f32
    %559 = vector.broadcast %cst_149 : f32 to vector<2x8xf32>
    %560 = arith.addf %558, %559 : vector<2x8xf32>
    %cst_150 = arith.constant 5.000000e-01 : f32
    %561 = vector.broadcast %cst_150 : f32 to vector<2x8xf32>
    %562 = arith.mulf %561, %560 : vector<2x8xf32>
    %563 = vector.extract_strided_slice %427 {offsets = [0, 22], sizes = [2, 8], strides = [1, 1]} : vector<2x30xf32> to vector<2x8xf32>
    %564 = vector.shape_cast %550 : vector<2x16xf32> to vector<2x16x1xf32>
    %565 = vector.shape_cast %562 : vector<2x8xf32> to vector<2x1x8xf32>
    %566 = vector.broadcast %564 : vector<2x16x1xf32> to vector<2x16x8xf32>
    %567 = vector.broadcast %565 : vector<2x1x8xf32> to vector<2x16x8xf32>
    %568 = arith.mulf %566, %567 : vector<2x16x8xf32>
    %cst_151 = arith.constant 1.000000e+00 : f32
    %569 = vector.broadcast %cst_151 : f32 to vector<2x16x8xf32>
    %570 = arith.subf %569, %568 : vector<2x16x8xf32>
    %571 = arith.mulf %384, %570 : vector<2x16x8xf32>
    %572 = vector.shape_cast %563 : vector<2x8xf32> to vector<2x1x8xf32>
    %573 = vector.broadcast %564 : vector<2x16x1xf32> to vector<2x16x8xf32>
    %574 = vector.broadcast %572 : vector<2x1x8xf32> to vector<2x16x8xf32>
    %575 = arith.mulf %573, %574 : vector<2x16x8xf32>
    %576 = arith.addf %571, %575 : vector<2x16x8xf32>
    %577 = tpu.concatenate %422, %554 in 1 : vector<2x32xf32>, vector<2x8xf32> -> vector<2x40xf32>
    %cst_152 = arith.constant dense<0.000000e+00> : vector<2x8xf32>
    %578 = tpu.matmul %577, %7, %cst_152 {dimension_numbers = #tpu.dot_dimension_numbers<[1], [0], [0], [1], [0, 0, 1, 1], [], []>} : vector<2x40xf32>, vector<40x8xf32>, vector<2x8xf32> -> vector<2x8xf32>
    %579 = vector.broadcast %8 : vector<1x8xf32> to vector<2x8xf32>
    %580 = arith.addf %578, %579 : vector<2x8xf32>
    %cst_153 = arith.constant 5.000000e-01 : f32
    %581 = vector.broadcast %cst_153 : f32 to vector<2x8xf32>
    %582 = arith.mulf %581, %580 : vector<2x8xf32>
    %583 = math.tanh %582 : vector<2x8xf32>
    %cst_154 = arith.constant 1.000000e+00 : f32
    %584 = vector.broadcast %cst_154 : f32 to vector<2x8xf32>
    %585 = arith.addf %583, %584 : vector<2x8xf32>
    %cst_155 = arith.constant 5.000000e-01 : f32
    %586 = vector.broadcast %cst_155 : f32 to vector<2x8xf32>
    %587 = arith.mulf %586, %585 : vector<2x8xf32>
    %c2_156 = arith.constant 2 : index
    %c0_157 = arith.constant 0 : index
    %c0_158 = arith.constant 0 : index
    %588 = vector.load %arg13[%c2_156, %c0_157, %c0_158] : memref<4x2x8xf32, #tpu.memory_space<vmem>>, vector<1x2x8xf32>
    %589 = vector.shape_cast %588 : vector<1x2x8xf32> to vector<2x8xf32>
    %590 = vector.shape_cast %587 : vector<2x8xf32> to vector<1x2x8xf32>
    tpu.vector_store %arg13[%c2_156, %c0_157, %c0_158], %590 {strides = array<i32>} : memref<4x2x8xf32, #tpu.memory_space<vmem>>, vector<1x2x8xf32>,
    %c3 = arith.constant 3 : index
    %c0_159 = arith.constant 0 : index
    %c0_160 = arith.constant 0 : index
    %591 = vector.load %arg1[%c3, %c0_159, %c0_160] : memref<4x2x128xf32, #tpu.memory_space<vmem>>, vector<1x2x128xf32>
    %592 = vector.shape_cast %591 : vector<1x2x128xf32> to vector<2x128xf32>
    %593 = tpu.concatenate %554, %422 in 1 : vector<2x8xf32>, vector<2x32xf32> -> vector<2x40xf32>
    %cst_161 = arith.constant dense<0.000000e+00> : vector<2x128xf32>
    %594 = tpu.matmul %593, %3, %cst_161 {dimension_numbers = #tpu.dot_dimension_numbers<[1], [0], [0], [1], [0, 0, 1, 1], [], []>} : vector<2x40xf32>, vector<40x128xf32>, vector<2x128xf32> -> vector<2x128xf32>
    %595 = arith.addf %592, %594 : vector<2x128xf32>
    %596 = vector.broadcast %4 : vector<1x128xf32> to vector<2x128xf32>
    %597 = arith.addf %595, %596 : vector<2x128xf32>
    %cst_162 = arith.constant 5.000000e-01 : f32
    %598 = vector.broadcast %cst_162 : f32 to vector<2x128xf32>
    %599 = arith.mulf %598, %597 : vector<2x128xf32>
    %600 = math.tanh %599 : vector<2x128xf32>
    %cst_163 = arith.constant 1.000000e+00 : f32
    %601 = vector.broadcast %cst_163 : f32 to vector<2x128xf32>
    %602 = arith.addf %600, %601 : vector<2x128xf32>
    %cst_164 = arith.constant 5.000000e-01 : f32
    %603 = vector.broadcast %cst_164 : f32 to vector<2x128xf32>
    %604 = arith.mulf %603, %602 : vector<2x128xf32>
    %605 = math.tanh %597 : vector<2x128xf32>
    %606 = vector.extract_strided_slice %604 {offsets = [0, 0], sizes = [2, 32], strides = [1, 1]} : vector<2x128xf32> to vector<2x32xf32>
    %607 = vector.extract_strided_slice %604 {offsets = [0, 32], sizes = [2, 32], strides = [1, 1]} : vector<2x128xf32> to vector<2x32xf32>
    %608 = vector.extract_strided_slice %604 {offsets = [0, 96], sizes = [2, 32], strides = [1, 1]} : vector<2x128xf32> to vector<2x32xf32>
    %609 = vector.extract_strided_slice %605 {offsets = [0, 64], sizes = [2, 32], strides = [1, 1]} : vector<2x128xf32> to vector<2x32xf32>
    %610 = arith.mulf %607, %420 : vector<2x32xf32>
    %611 = arith.mulf %606, %609 : vector<2x32xf32>
    %612 = arith.addf %610, %611 : vector<2x32xf32>
    %613 = math.tanh %612 : vector<2x32xf32>
    %614 = arith.mulf %608, %613 : vector<2x32xf32>
    %cst_165 = arith.constant dense<0.000000e+00> : vector<2x128xf32>
    %615 = tpu.matmul %614, %5, %cst_165 {dimension_numbers = #tpu.dot_dimension_numbers<[1], [0], [0], [1], [0, 0, 1, 1], [], []>} : vector<2x32xf32>, vector<32x128xf32>, vector<2x128xf32> -> vector<2x128xf32>
    %616 = vector.broadcast %6 : vector<1x128xf32> to vector<2x128xf32>
    %617 = arith.addf %615, %616 : vector<2x128xf32>
    %618 = vector.extract_strided_slice %617 {offsets = [0, 0], sizes = [2, 14], strides = [1, 1]} : vector<2x128xf32> to vector<2x14xf32>
    %619 = vector.extract_strided_slice %617 {offsets = [0, 14], sizes = [2, 30], strides = [1, 1]} : vector<2x128xf32> to vector<2x30xf32>
    %620 = vector.extract_strided_slice %619 {offsets = [0, 0], sizes = [2, 14], strides = [1, 1]} : vector<2x30xf32> to vector<2x14xf32>
    %621 = tpu.concatenate %618, %620 in 0 : vector<2x14xf32>, vector<2x14xf32> -> vector<4x14xf32>
    %622 = vector.extract_strided_slice %621 {offsets = [0, 0], sizes = [4, 8], strides = [1, 1]} : vector<4x14xf32> to vector<4x8xf32>
    %cst_166 = arith.constant 1.000000e-16 : f32
    %623 = vector.broadcast %cst_166 : f32 to vector<4x8xf32>
    %624 = arith.addf %622, %623 : vector<4x8xf32>
    %625 = vector.extract_strided_slice %621 {offsets = [0, 8], sizes = [4, 1], strides = [1, 1]} : vector<4x14xf32> to vector<4x1xf32>
    %cst_167 = arith.constant 0.000000e+00 : f32
    %626 = vector.broadcast %cst_167 : f32 to vector<4x1xf32>
    %627 = arith.maximumf %625, %626 : vector<4x1xf32>
    %628 = math.absf %625 : vector<4x1xf32>
    %cst_168 = arith.constant 0.000000e+00 : f32
    %629 = vector.broadcast %cst_168 : f32 to vector<4x1xf32>
    %630 = arith.subf %629, %628 : vector<4x1xf32>
    %631 = math.exp %630 : vector<4x1xf32>
    %cst_169 = arith.constant 1.000000e+00 : f32
    %632 = vector.broadcast %cst_169 : f32 to vector<4x1xf32>
    %633 = arith.addf %632, %631 : vector<4x1xf32>
    %634 = math.log %633 : vector<4x1xf32>
    %635 = arith.addf %627, %634 : vector<4x1xf32>
    %636 = vector.extract_strided_slice %621 {offsets = [0, 9], sizes = [4, 1], strides = [1, 1]} : vector<4x14xf32> to vector<4x1xf32>
    %cst_170 = arith.constant 5.000000e-01 : f32
    %637 = vector.broadcast %cst_170 : f32 to vector<4x1xf32>
    %638 = arith.mulf %637, %636 : vector<4x1xf32>
    %639 = math.tanh %638 : vector<4x1xf32>
    %cst_171 = arith.constant 1.000000e+00 : f32
    %640 = vector.broadcast %cst_171 : f32 to vector<4x1xf32>
    %641 = arith.addf %639, %640 : vector<4x1xf32>
    %cst_172 = arith.constant 5.000000e-01 : f32
    %642 = vector.broadcast %cst_172 : f32 to vector<4x1xf32>
    %643 = arith.mulf %642, %641 : vector<4x1xf32>
    %644 = vector.extract_strided_slice %621 {offsets = [0, 10], sizes = [4, 3], strides = [1, 1]} : vector<4x14xf32> to vector<4x3xf32>
    %cst_173 = arith.constant dense<0xFF800000> : vector<4xf32>
    %645 = vector.multi_reduction <maximumf>, %644, %cst_173 [1] : vector<4x3xf32> to vector<4xf32>
    %646 = vector.shape_cast %645 : vector<4xf32> to vector<4x1xf32>
    %647 = vector.broadcast %646 : vector<4x1xf32> to vector<4x3xf32>
    %648 = arith.subf %644, %647 : vector<4x3xf32>
    %649 = math.exp %648 : vector<4x3xf32>
    %cst_174 = arith.constant dense<0.000000e+00> : vector<4xf32>
    %650 = vector.multi_reduction <add>, %649, %cst_174 [1] : vector<4x3xf32> to vector<4xf32>
    %651 = vector.shape_cast %650 : vector<4xf32> to vector<4x1xf32>
    %652 = tpu.reciprocal %651 {approx = true} : vector<4x1xf32> -> vector<4x1xf32>
    %653 = vector.broadcast %652 : vector<4x1xf32> to vector<4x3xf32>
    %654 = arith.mulf %649, %653 : vector<4x3xf32>
    %655 = vector.extract_strided_slice %621 {offsets = [0, 13], sizes = [4, 1], strides = [1, 1]} : vector<4x14xf32> to vector<4x1xf32>
    %cst_175 = arith.constant 0.000000e+00 : f32
    %656 = vector.broadcast %cst_175 : f32 to vector<4x1xf32>
    %657 = arith.maximumf %655, %656 : vector<4x1xf32>
    %658 = math.absf %655 : vector<4x1xf32>
    %cst_176 = arith.constant 0.000000e+00 : f32
    %659 = vector.broadcast %cst_176 : f32 to vector<4x1xf32>
    %660 = arith.subf %659, %658 : vector<4x1xf32>
    %661 = math.exp %660 : vector<4x1xf32>
    %cst_177 = arith.constant 1.000000e+00 : f32
    %662 = vector.broadcast %cst_177 : f32 to vector<4x1xf32>
    %663 = arith.addf %662, %661 : vector<4x1xf32>
    %664 = math.log %663 : vector<4x1xf32>
    %665 = arith.addf %657, %664 : vector<4x1xf32>
    %cst_178 = arith.constant 1.000000e+00 : f32
    %666 = vector.broadcast %cst_178 : f32 to vector<4x1xf32>
    %667 = arith.addf %666, %665 : vector<4x1xf32>
    %668 = tpu.concatenate %549, %550 in 0 : vector<2x16xf32>, vector<2x16xf32> -> vector<4x16xf32>
    %cst_179 = arith.constant 1.000000e-16 : f32
    %669 = vector.broadcast %cst_179 : f32 to vector<2x16x8xf32>
    %670 = arith.addf %576, %669 : vector<2x16x8xf32>
    %671 = arith.mulf %670, %670 : vector<2x16x8xf32>
    %cst_180 = arith.constant dense<0.000000e+00> : vector<2x16xf32>
    %672 = vector.multi_reduction <add>, %671, %cst_180 [2] : vector<2x16x8xf32> to vector<2x16xf32>
    %673 = tpu.concatenate %670, %670 in 0 : vector<2x16x8xf32>, vector<2x16x8xf32> -> vector<4x16x8xf32>
    %674 = tpu.concatenate %672, %672 in 0 : vector<2x16xf32>, vector<2x16xf32> -> vector<4x16xf32>
    %675 = vector.shape_cast %624 : vector<4x8xf32> to vector<4x1x8xf32>
    %676 = vector.broadcast %675 : vector<4x1x8xf32> to vector<4x16x8xf32>
    %677 = arith.mulf %673, %676 : vector<4x16x8xf32>
    %cst_181 = arith.constant dense<0.000000e+00> : vector<4x16xf32>
    %678 = vector.multi_reduction <add>, %677, %cst_181 [2] : vector<4x16x8xf32> to vector<4x16xf32>
    %679 = arith.mulf %624, %624 : vector<4x8xf32>
    %cst_182 = arith.constant dense<0.000000e+00> : vector<4xf32>
    %680 = vector.multi_reduction <add>, %679, %cst_182 [1] : vector<4x8xf32> to vector<4xf32>
    %681 = vector.shape_cast %680 : vector<4xf32> to vector<4x1xf32>
    %682 = vector.broadcast %681 : vector<4x1xf32> to vector<4x16xf32>
    %683 = arith.mulf %674, %682 : vector<4x16xf32>
    %cst_183 = arith.constant 1.000000e-16 : f32
    %684 = vector.broadcast %cst_183 : f32 to vector<4x16xf32>
    %685 = arith.maximumf %683, %684 : vector<4x16xf32>
    %686 = math.rsqrt %685 : vector<4x16xf32>
    %687 = arith.mulf %678, %686 : vector<4x16xf32>
    %688 = vector.broadcast %635 : vector<4x1xf32> to vector<4x16xf32>
    %689 = arith.mulf %688, %687 : vector<4x16xf32>
    %cst_184 = arith.constant dense<0xFF800000> : vector<4xf32>
    %690 = vector.multi_reduction <maximumf>, %689, %cst_184 [1] : vector<4x16xf32> to vector<4xf32>
    %691 = vector.shape_cast %690 : vector<4xf32> to vector<4x1xf32>
    %692 = vector.broadcast %691 : vector<4x1xf32> to vector<4x16xf32>
    %693 = arith.subf %689, %692 : vector<4x16xf32>
    %694 = math.exp %693 : vector<4x16xf32>
    %cst_185 = arith.constant dense<0.000000e+00> : vector<4xf32>
    %695 = vector.multi_reduction <add>, %694, %cst_185 [1] : vector<4x16xf32> to vector<4xf32>
    %696 = vector.shape_cast %695 : vector<4xf32> to vector<4x1xf32>
    %697 = tpu.reciprocal %696 {approx = true} : vector<4x1xf32> -> vector<4x1xf32>
    %698 = vector.broadcast %697 : vector<4x1xf32> to vector<4x16xf32>
    %699 = arith.mulf %694, %698 : vector<4x16xf32>
    %700 = vector.broadcast %643 : vector<4x1xf32> to vector<4x16xf32>
    %701 = arith.mulf %700, %699 : vector<4x16xf32>
    %cst_186 = arith.constant 1.000000e+00 : f32
    %702 = vector.broadcast %cst_186 : f32 to vector<4x1xf32>
    %703 = arith.subf %702, %643 : vector<4x1xf32>
    %704 = vector.broadcast %703 : vector<4x1xf32> to vector<4x16xf32>
    %705 = arith.mulf %704, %668 : vector<4x16xf32>
    %706 = arith.addf %701, %705 : vector<4x16xf32>
    %707 = vector.extract_strided_slice %706 {offsets = [0, 15], sizes = [4, 1], strides = [1, 1]} : vector<4x16xf32> to vector<4x1xf32>
    %708 = vector.extract_strided_slice %706 {offsets = [0, 0], sizes = [4, 15], strides = [1, 1]} : vector<4x16xf32> to vector<4x15xf32>
    %709 = tpu.concatenate %707, %708 in 1 : vector<4x1xf32>, vector<4x15xf32> -> vector<4x16xf32>
    %710 = vector.extract_strided_slice %706 {offsets = [0, 1], sizes = [4, 15], strides = [1, 1]} : vector<4x16xf32> to vector<4x15xf32>
    %711 = vector.extract_strided_slice %706 {offsets = [0, 0], sizes = [4, 1], strides = [1, 1]} : vector<4x16xf32> to vector<4x1xf32>
    %712 = tpu.concatenate %710, %711 in 1 : vector<4x15xf32>, vector<4x1xf32> -> vector<4x16xf32>
    %713 = vector.extract_strided_slice %654 {offsets = [0, 0], sizes = [4, 1], strides = [1, 1]} : vector<4x3xf32> to vector<4x1xf32>
    %714 = vector.broadcast %713 : vector<4x1xf32> to vector<4x16xf32>
    %715 = arith.mulf %709, %714 : vector<4x16xf32>
    %716 = vector.extract_strided_slice %654 {offsets = [0, 1], sizes = [4, 1], strides = [1, 1]} : vector<4x3xf32> to vector<4x1xf32>
    %717 = vector.broadcast %716 : vector<4x1xf32> to vector<4x16xf32>
    %718 = arith.mulf %706, %717 : vector<4x16xf32>
    %719 = arith.addf %715, %718 : vector<4x16xf32>
    %720 = vector.extract_strided_slice %654 {offsets = [0, 2], sizes = [4, 1], strides = [1, 1]} : vector<4x3xf32> to vector<4x1xf32>
    %721 = vector.broadcast %720 : vector<4x1xf32> to vector<4x16xf32>
    %722 = arith.mulf %712, %721 : vector<4x16xf32>
    %723 = arith.addf %719, %722 : vector<4x16xf32>
    %cst_187 = arith.constant 9.99999935E-39 : f32
    %724 = vector.broadcast %cst_187 : f32 to vector<4x16xf32>
    %725 = arith.maximumf %723, %724 : vector<4x16xf32>
    %726 = math.log %725 : vector<4x16xf32>
    %cst_188 = arith.constant 0.000000e+00 : f32
    %727 = vector.broadcast %cst_188 : f32 to vector<4x16xf32>
    %728 = arith.cmpf ogt, %723, %727 : vector<4x16xf32>
    %729 = vector.broadcast %667 : vector<4x1xf32> to vector<4x16xf32>
    %730 = arith.mulf %729, %726 : vector<4x16xf32>
    %731 = math.exp %730 : vector<4x16xf32>
    %cst_189 = arith.constant 0.000000e+00 : f32
    %732 = vector.broadcast %cst_189 : f32 to vector<4x16xf32>
    %733 = arith.select %728, %731, %732 : vector<4x16xi1>, vector<4x16xf32>
    %cst_190 = arith.constant dense<0.000000e+00> : vector<4xf32>
    %734 = vector.multi_reduction <add>, %733, %cst_190 [1] : vector<4x16xf32> to vector<4xf32>
    %735 = vector.shape_cast %734 : vector<4xf32> to vector<4x1xf32>
    %cst_191 = arith.constant 1.000000e-16 : f32
    %736 = vector.broadcast %cst_191 : f32 to vector<4x1xf32>
    %737 = arith.addf %735, %736 : vector<4x1xf32>
    %738 = tpu.reciprocal %737 {approx = true} : vector<4x1xf32> -> vector<4x1xf32>
    %739 = vector.broadcast %738 : vector<4x1xf32> to vector<4x16xf32>
    %740 = arith.mulf %733, %739 : vector<4x16xf32>
    %741 = vector.extract_strided_slice %740 {offsets = [0, 0], sizes = [2, 16], strides = [1, 1]} : vector<4x16xf32> to vector<2x16xf32>
    %742 = vector.extract_strided_slice %740 {offsets = [2, 0], sizes = [2, 16], strides = [1, 1]} : vector<4x16xf32> to vector<2x16xf32>
    %743 = vector.shape_cast %741 : vector<2x16xf32> to vector<2x16x1xf32>
    %744 = vector.broadcast %743 : vector<2x16x1xf32> to vector<2x16x8xf32>
    %745 = arith.mulf %744, %576 : vector<2x16x8xf32>
    %cst_192 = arith.constant dense<0.000000e+00> : vector<2x8xf32>
    %746 = vector.multi_reduction <add>, %745, %cst_192 [1] : vector<2x16x8xf32> to vector<2x8xf32>
    %747 = vector.extract_strided_slice %619 {offsets = [0, 14], sizes = [2, 8], strides = [1, 1]} : vector<2x30xf32> to vector<2x8xf32>
    %cst_193 = arith.constant 5.000000e-01 : f32
    %748 = vector.broadcast %cst_193 : f32 to vector<2x8xf32>
    %749 = arith.mulf %748, %747 : vector<2x8xf32>
    %750 = math.tanh %749 : vector<2x8xf32>
    %cst_194 = arith.constant 1.000000e+00 : f32
    %751 = vector.broadcast %cst_194 : f32 to vector<2x8xf32>
    %752 = arith.addf %750, %751 : vector<2x8xf32>
    %cst_195 = arith.constant 5.000000e-01 : f32
    %753 = vector.broadcast %cst_195 : f32 to vector<2x8xf32>
    %754 = arith.mulf %753, %752 : vector<2x8xf32>
    %755 = vector.extract_strided_slice %619 {offsets = [0, 22], sizes = [2, 8], strides = [1, 1]} : vector<2x30xf32> to vector<2x8xf32>
    %756 = vector.shape_cast %742 : vector<2x16xf32> to vector<2x16x1xf32>
    %757 = vector.shape_cast %754 : vector<2x8xf32> to vector<2x1x8xf32>
    %758 = vector.broadcast %756 : vector<2x16x1xf32> to vector<2x16x8xf32>
    %759 = vector.broadcast %757 : vector<2x1x8xf32> to vector<2x16x8xf32>
    %760 = arith.mulf %758, %759 : vector<2x16x8xf32>
    %cst_196 = arith.constant 1.000000e+00 : f32
    %761 = vector.broadcast %cst_196 : f32 to vector<2x16x8xf32>
    %762 = arith.subf %761, %760 : vector<2x16x8xf32>
    %763 = arith.mulf %576, %762 : vector<2x16x8xf32>
    %764 = vector.shape_cast %755 : vector<2x8xf32> to vector<2x1x8xf32>
    %765 = vector.broadcast %756 : vector<2x16x1xf32> to vector<2x16x8xf32>
    %766 = vector.broadcast %764 : vector<2x1x8xf32> to vector<2x16x8xf32>
    %767 = arith.mulf %765, %766 : vector<2x16x8xf32>
    %768 = arith.addf %763, %767 : vector<2x16x8xf32>
    %769 = tpu.concatenate %614, %746 in 1 : vector<2x32xf32>, vector<2x8xf32> -> vector<2x40xf32>
    %cst_197 = arith.constant dense<0.000000e+00> : vector<2x8xf32>
    %770 = tpu.matmul %769, %7, %cst_197 {dimension_numbers = #tpu.dot_dimension_numbers<[1], [0], [0], [1], [0, 0, 1, 1], [], []>} : vector<2x40xf32>, vector<40x8xf32>, vector<2x8xf32> -> vector<2x8xf32>
    %771 = vector.broadcast %8 : vector<1x8xf32> to vector<2x8xf32>
    %772 = arith.addf %770, %771 : vector<2x8xf32>
    %cst_198 = arith.constant 5.000000e-01 : f32
    %773 = vector.broadcast %cst_198 : f32 to vector<2x8xf32>
    %774 = arith.mulf %773, %772 : vector<2x8xf32>
    %775 = math.tanh %774 : vector<2x8xf32>
    %cst_199 = arith.constant 1.000000e+00 : f32
    %776 = vector.broadcast %cst_199 : f32 to vector<2x8xf32>
    %777 = arith.addf %775, %776 : vector<2x8xf32>
    %cst_200 = arith.constant 5.000000e-01 : f32
    %778 = vector.broadcast %cst_200 : f32 to vector<2x8xf32>
    %779 = arith.mulf %778, %777 : vector<2x8xf32>
    %c3_201 = arith.constant 3 : index
    %c0_202 = arith.constant 0 : index
    %c0_203 = arith.constant 0 : index
    %780 = vector.load %arg13[%c3_201, %c0_202, %c0_203] : memref<4x2x8xf32, #tpu.memory_space<vmem>>, vector<1x2x8xf32>
    %781 = vector.shape_cast %780 : vector<1x2x8xf32> to vector<2x8xf32>
    %782 = vector.shape_cast %779 : vector<2x8xf32> to vector<1x2x8xf32>
    tpu.vector_store %arg13[%c3_201, %c0_202, %c0_203], %782 {strides = array<i32>} : memref<4x2x8xf32, #tpu.memory_space<vmem>>, vector<1x2x8xf32>,
    %783 = tpu.concatenate %741, %742 in 1 : vector<2x16xf32>, vector<2x16xf32> -> vector<2x32xf32>
    %c0_204 = arith.constant 0 : index
    %c0_205 = arith.constant 0 : index
    %784 = vector.load %arg19[%c0_204, %c0_205] : memref<2x8xf32, #tpu.memory_space<vmem>>, vector<2x8xf32>
    tpu.vector_store %arg19[%c0_204, %c0_205], %746 {strides = array<i32>} : memref<2x8xf32, #tpu.memory_space<vmem>>, vector<2x8xf32>,
    %c0_206 = arith.constant 0 : index
    %c0_207 = arith.constant 0 : index
    %785 = vector.load %arg20[%c0_206, %c0_207] : memref<2x32xf32, #tpu.memory_space<vmem>>, vector<2x32xf32>
    tpu.vector_store %arg20[%c0_206, %c0_207], %614 {strides = array<i32>} : memref<2x32xf32, #tpu.memory_space<vmem>>, vector<2x32xf32>,
    %c0_208 = arith.constant 0 : index
    %c0_209 = arith.constant 0 : index
    %786 = vector.load %arg21[%c0_208, %c0_209] : memref<2x32xf32, #tpu.memory_space<vmem>>, vector<2x32xf32>
    tpu.vector_store %arg21[%c0_208, %c0_209], %612 {strides = array<i32>} : memref<2x32xf32, #tpu.memory_space<vmem>>, vector<2x32xf32>,
    %c0_210 = arith.constant 0 : index
    %c0_211 = arith.constant 0 : index
    %787 = vector.load %arg22[%c0_210, %c0_211] : memref<2x32xf32, #tpu.memory_space<vmem>>, vector<2x32xf32>
    tpu.vector_store %arg22[%c0_210, %c0_211], %783 {strides = array<i32>} : memref<2x32xf32, #tpu.memory_space<vmem>>, vector<2x32xf32>,
    %c0_212 = arith.constant 0 : index
    %c0_213 = arith.constant 0 : index
    %c0_214 = arith.constant 0 : index
    %788 = vector.load %arg23[%c0_212, %c0_213, %c0_214] : memref<2x16x8xf32, #tpu.memory_space<vmem>>, vector<2x16x8xf32>
    tpu.vector_store %arg23[%c0_212, %c0_213, %c0_214], %768 {strides = array<i32>} : memref<2x16x8xf32, #tpu.memory_space<vmem>>, vector<2x16x8xf32>,
    %c0_i32_215 = arith.constant 0 : i32
    %789 = arith.cmpi eq, %arg0, %c0_i32_215 : i32
    %790 = arith.extui %789 : i1 to i32
    %c0_i32_216 = arith.constant 0 : i32
    %791 = arith.cmpi ne, %790, %c0_i32_216 : i32
    scf.if %791 {
      %c0_217 = arith.constant 0 : index
      %c0_218 = arith.constant 0 : index
      %792 = vector.load %arg14[%c0_217, %c0_218] : memref<2x8xf32, #tpu.memory_space<vmem>>, vector<2x8xf32>
      tpu.vector_store %arg14[%c0_217, %c0_218], %746 {strides = array<i32>} : memref<2x8xf32, #tpu.memory_space<vmem>>, vector<2x8xf32>,
      %c0_219 = arith.constant 0 : index
      %c0_220 = arith.constant 0 : index
      %793 = vector.load %arg15[%c0_219, %c0_220] : memref<2x32xf32, #tpu.memory_space<vmem>>, vector<2x32xf32>
      tpu.vector_store %arg15[%c0_219, %c0_220], %614 {strides = array<i32>} : memref<2x32xf32, #tpu.memory_space<vmem>>, vector<2x32xf32>,
      %c0_221 = arith.constant 0 : index
      %c0_222 = arith.constant 0 : index
      %794 = vector.load %arg16[%c0_221, %c0_222] : memref<2x32xf32, #tpu.memory_space<vmem>>, vector<2x32xf32>
      tpu.vector_store %arg16[%c0_221, %c0_222], %612 {strides = array<i32>} : memref<2x32xf32, #tpu.memory_space<vmem>>, vector<2x32xf32>,
      %c0_223 = arith.constant 0 : index
      %c0_224 = arith.constant 0 : index
      %795 = vector.load %arg17[%c0_223, %c0_224] : memref<2x32xf32, #tpu.memory_space<vmem>>, vector<2x32xf32>
      tpu.vector_store %arg17[%c0_223, %c0_224], %783 {strides = array<i32>} : memref<2x32xf32, #tpu.memory_space<vmem>>, vector<2x32xf32>,
      %c0_225 = arith.constant 0 : index
      %c0_226 = arith.constant 0 : index
      %c0_227 = arith.constant 0 : index
      %796 = vector.load %arg18[%c0_225, %c0_226, %c0_227] : memref<2x16x8xf32, #tpu.memory_space<vmem>>, vector<2x16x8xf32>
      tpu.vector_store %arg18[%c0_225, %c0_226, %c0_227], %768 {strides = array<i32>} : memref<2x16x8xf32, #tpu.memory_space<vmem>>, vector<2x16x8xf32>,
    } else {
    }
    return
  }
  func.func @transform_0(%arg0: i32) -> (i32, i32, i32) {
    %c0_i32 = arith.constant 0 : i32
    %c0_i32_0 = arith.constant 0 : i32
    %c0_i32_1 = arith.constant 0 : i32
    return %arg0, %c0_i32, %c0_i32_0 : i32, i32, i32
  }
  func.func @transform_1(%arg0: i32) -> (i32, i32) {
    %c0_i32 = arith.constant 0 : i32
    %c0_i32_0 = arith.constant 0 : i32
    %c0_i32_1 = arith.constant 0 : i32
    return %c0_i32, %c0_i32_0 : i32, i32
  }
  func.func @transform_2(%arg0: i32) -> (i32, i32) {
    %c0_i32 = arith.constant 0 : i32
    %c0_i32_0 = arith.constant 0 : i32
    %c0_i32_1 = arith.constant 0 : i32
    return %c0_i32, %c0_i32_0 : i32, i32
  }
  func.func @transform_3(%arg0: i32) -> (i32, i32) {
    %c0_i32 = arith.constant 0 : i32
    %c0_i32_0 = arith.constant 0 : i32
    %c0_i32_1 = arith.constant 0 : i32
    return %c0_i32, %c0_i32_0 : i32, i32
  }
  func.func @transform_4(%arg0: i32) -> (i32, i32) {
    %c0_i32 = arith.constant 0 : i32
    %c0_i32_0 = arith.constant 0 : i32
    %c0_i32_1 = arith.constant 0 : i32
    return %c0_i32, %c0_i32_0 : i32, i32
  }
  func.func @transform_5(%arg0: i32) -> (i32, i32, i32) {
    %c0_i32 = arith.constant 0 : i32
    %c0_i32_0 = arith.constant 0 : i32
    %c0_i32_1 = arith.constant 0 : i32
    %c0_i32_2 = arith.constant 0 : i32
    return %c0_i32, %c0_i32_0, %c0_i32_1 : i32, i32, i32
  }
  func.func @transform_6(%arg0: i32) -> (i32, i32) {
    %c0_i32 = arith.constant 0 : i32
    %c0_i32_0 = arith.constant 0 : i32
    %c0_i32_1 = arith.constant 0 : i32
    return %c0_i32, %c0_i32_0 : i32, i32
  }
  func.func @transform_7(%arg0: i32) -> (i32, i32) {
    %c0_i32 = arith.constant 0 : i32
    %c0_i32_0 = arith.constant 0 : i32
    %c0_i32_1 = arith.constant 0 : i32
    return %c0_i32, %c0_i32_0 : i32, i32
  }
  func.func @transform_8(%arg0: i32) -> (i32, i32) {
    %c0_i32 = arith.constant 0 : i32
    %c0_i32_0 = arith.constant 0 : i32
    %c0_i32_1 = arith.constant 0 : i32
    return %c0_i32, %c0_i32_0 : i32, i32
  }
  func.func @transform_9(%arg0: i32) -> (i32, i32) {
    %c0_i32 = arith.constant 0 : i32
    %c0_i32_0 = arith.constant 0 : i32
    %c0_i32_1 = arith.constant 0 : i32
    return %c0_i32, %c0_i32_0 : i32, i32
  }
  func.func @transform_10(%arg0: i32) -> (i32, i32) {
    %c0_i32 = arith.constant 0 : i32
    %c0_i32_0 = arith.constant 0 : i32
    %c0_i32_1 = arith.constant 0 : i32
    return %c0_i32, %c0_i32_0 : i32, i32
  }
  func.func @transform_11(%arg0: i32) -> (i32, i32) {
    %c0_i32 = arith.constant 0 : i32
    %c0_i32_0 = arith.constant 0 : i32
    %c0_i32_1 = arith.constant 0 : i32
    return %c0_i32, %c0_i32_0 : i32, i32
  }
  func.func @transform_12(%arg0: i32) -> (i32, i32, i32) {
    %c0_i32 = arith.constant 0 : i32
    %c0_i32_0 = arith.constant 0 : i32
    %c0_i32_1 = arith.constant 0 : i32
    return %arg0, %c0_i32, %c0_i32_0 : i32, i32, i32
  }
  func.func @transform_13(%arg0: i32) -> (i32, i32) {
    %c0_i32 = arith.constant 0 : i32
    %c0_i32_0 = arith.constant 0 : i32
    %c0_i32_1 = arith.constant 0 : i32
    return %c0_i32, %c0_i32_0 : i32, i32
  }
  func.func @transform_14(%arg0: i32) -> (i32, i32) {
    %c0_i32 = arith.constant 0 : i32
    %c0_i32_0 = arith.constant 0 : i32
    %c0_i32_1 = arith.constant 0 : i32
    return %c0_i32, %c0_i32_0 : i32, i32
  }
  func.func @transform_15(%arg0: i32) -> (i32, i32) {
    %c0_i32 = arith.constant 0 : i32
    %c0_i32_0 = arith.constant 0 : i32
    %c0_i32_1 = arith.constant 0 : i32
    return %c0_i32, %c0_i32_0 : i32, i32
  }
  func.func @transform_16(%arg0: i32) -> (i32, i32) {
    %c0_i32 = arith.constant 0 : i32
    %c0_i32_0 = arith.constant 0 : i32
    %c0_i32_1 = arith.constant 0 : i32
    return %c0_i32, %c0_i32_0 : i32, i32
  }
  func.func @transform_17(%arg0: i32) -> (i32, i32, i32) {
    %c0_i32 = arith.constant 0 : i32
    %c0_i32_0 = arith.constant 0 : i32
    %c0_i32_1 = arith.constant 0 : i32
    %c0_i32_2 = arith.constant 0 : i32
    return %c0_i32, %c0_i32_0, %c0_i32_1 : i32, i32, i32
  }
}

</mosaic_0001>

<bundles_post_ra>
// kernel: run.1
= control target key start
LH: loop header
LB: loop body
LE: loop exit
PB: predicated region body
PF: predicated region fallthrough
CT: control target
= control target key end

     0   :  { %s5502_s0 = inlined_call_operand.vmem [shape: f32[4,2,128], index: 0, kind: input, shape index: {}]   ;;  %s5503_s1 = inlined_call_operand.hbm [shape: f32[2,8], index: 1, kind: input, shape index: {}]   ;;  %s5504_s2 = inlined_call_operand.hbm [shape: f32[2,32], index: 2, kind: input, shape index: {}]   ;;  %s5505_s3 = inlined_call_operand.hbm [shape: f32[2,32], index: 3, kind: input, shape index: {}]   ;;  %s5506_s4 = inlined_call_operand.hbm [shape: f32[2,32], index: 4, kind: input, shape index: {}]   ;;  %s5507_s5 = inlined_call_operand.vmem [shape: f32[2,16,8], index: 5, kind: input, shape index: {}]   ;;  %s5508_s6 = inlined_call_operand.vmem [shape: f32[40,128], index: 6, kind: input, shape index: {}]   ;;  %s5509_s7 = inlined_call_operand.vmem [shape: f32[1,128], index: 7, kind: input, shape index: {}]   ;;  %s5510_s8 = inlined_call_operand.hbm [shape: f32[32,128], index: 8, kind: input, shape index: {}]   ;;  %s5511_s9 = inlined_call_operand.vmem [shape: f32[1,128], index: 9, kind: input, shape index: {}]   ;;  %s5512_s10 = inlined_call_operand.vmem [shape: f32[40,8], index: 10, kind: input, shape index: {}]   ;;  %s5513_s11 = inlined_call_operand.vmem [shape: f32[1,8], index: 11, kind: input, shape index: {}]   ;;  %s5514_s12 = inlined_call_operand.hbm [shape: f32[4,2,8], index: 12, kind: output, shape index: {0}]   ;;  %s5515_s13 = inlined_call_operand.hbm [shape: f32[2,8], index: 13, kind: output, shape index: {1}]   ;;  %s5516_s14 = inlined_call_operand.hbm [shape: f32[2,32], index: 14, kind: output, shape index: {2}]   ;;  %s5517_s15 = inlined_call_operand.hbm [shape: f32[2,32], index: 15, kind: output, shape index: {3}]   ;;  %s5518_s16 = inlined_call_operand.hbm [shape: f32[2,32], index: 16, kind: output, shape index: {4}]   ;;  %s5519_s17 = inlined_call_operand.vmem [shape: f32[2,16,8], index: 17, kind: output, shape index: {5}]  }
   0x1   :  { %5524 = sst [smem:[#allocation29_spill]] %s5502_s0 }
   0x2   :  { %5525 = sst [smem:[#allocation30_spill]] %s5503_s1 }
   0x3   :  { %23 = vsyncpa [#allocation8], 0 }
   0x4   :  { %24 = vsyncpa [#allocation11], 0 }
   0x5   :  { %25 = vsyncpa [#allocation14], 0 }
   0x6   :  { %26 = vsyncpa [#allocation9], 0 }
   0x7   :  { %27 = vsyncpa [#allocation18], 0 }
   0x8   :  { %28 = vsyncpa [#allocation21], 0  ;;  %s4319_s24 = smov [#allocation10]   ;;  %s4320_s26 = smov [#allocation13]  }
   0x9   :  { %s47_s25 = sshll.u32 %s4319_s24, 4  ;;  %s67_s27 = sshll.u32 %s4320_s26, 4  ;;  %s48_s25 = int_to_ptr.vmem [resolvable:$true] %s47_s25  ;;  %s68_s27 = int_to_ptr.vmem [resolvable:$true] %s67_s27 }
   0xa   :  { %s4115_s28 = scalar_lea.vmem %s48_s25, 32  ;;  %p4120_p1 = scmp.lt.s32.totalorder %s48_s25, %s48_s25 }
   0xb   :  { %p4116_p0 = scmp.ne.s32.totalorder %s48_s25, %s4115_s28  ;;  %p4121_p2 = scmp.lt.s32.totalorder %s4115_s28, %s4115_s28 }
   0xd   :  { %p4122_p3 = por %p4121_p2, %p4120_p1 }
   0xf   :  { %p4123_p4 = pnand %p4122_p3, %p4116_p0 }
  0x11   :  { %4126 = shalt.err (!%p4123_p4)
}
  0x12   :  { %50 = dma.hbm_to_vmem [thread:$0]  %s5504_s2, 32, %s48_s25, [#allocation11]  }
  0x13   :  { %s4135_s30 = scalar_lea.vmem %s68_s27, 32  ;;  %p4140_p6 = scmp.lt.s32.totalorder %s68_s27, %s68_s27 }
  0x14   :  { %p4136_p5 = scmp.ne.s32.totalorder %s68_s27, %s4135_s30  ;;  %p4141_p7 = scmp.lt.s32.totalorder %s4135_s30, %s4135_s30 }
  0x16   :  { %p4142_p8 = por %p4141_p7, %p4140_p6 }
  0x18   :  { %p4143_p9 = pnand %p4142_p8, %p4136_p5 }
  0x1a   :  { %4146 = shalt.err (!%p4143_p9)
}
  0x1b   :  { %70 = dma.hbm_to_vmem [thread:$0]  %s5506_s4, 32, %s68_s27, [#allocation14]  }
  0x1c   :  { %s4321_s1 = smov [#allocation7]   ;;  %s4322_s21 = smov [#allocation12]  }
  0x1d   :  { %s37_s20 = sshll.u32 %s4321_s1, 4  ;;  %s57_s22 = sshll.u32 %s4322_s21, 4  ;;  %s38_s20 = int_to_ptr.vmem [resolvable:$true] %s37_s20  ;;  %s58_s22 = int_to_ptr.vmem [resolvable:$true] %s57_s22 }
  0x1e   :  { %s4155_s23 = scalar_lea.vmem %s38_s20, 32  ;;  %p4160_p11 = scmp.lt.s32.totalorder %s38_s20, %s38_s20 }
  0x1f   :  { %p4156_p10 = scmp.ne.s32.totalorder %s38_s20, %s4155_s23  ;;  %p4161_p12 = scmp.lt.s32.totalorder %s4155_s23, %s4155_s23 }
  0x21   :  { %p4162_p13 = por %p4161_p12, %p4160_p11 }
  0x23   :  { %p4163_p0 = pnand %p4162_p13, %p4156_p10 }
  0x25   :  { %4166 = shalt.err (!%p4163_p0)
}
  0x26   :  { %s5526_s25 = sld [smem:[#allocation30_spill]]  ;;  %s4175_s26 = scalar_lea.vmem %s58_s22, 32 }
  0x27   :  { %p4176_p1 = scmp.ne.s32.totalorder %s58_s22, %s4175_s26  ;;  %p4180_p2 = scmp.lt.s32.totalorder %s58_s22, %s58_s22 }
  0x28   :  { %p4181_p3 = scmp.lt.s32.totalorder %s4175_s26, %s4175_s26 }
  0x2a   :  { %p4182_p4 = por %p4181_p3, %p4180_p2 }
  0x2c   :  { %40 = dma.hbm_to_vmem [thread:$0]  %s5526_s25, 32, %s38_s20, [#allocation8]  }
  0x2d   :  { %p4183_p5 = pnand %p4182_p4, %p4176_p1 }
  0x2f   :  { %4186 = shalt.err (!%p4183_p5)
}
  0x30   :  { %60 = dma.hbm_to_vmem [thread:$0]  %s5505_s3, 32, %s58_s22, [#allocation11]  }
  0x31   :  { %s4323_s28 = smov [#allocation15]  }
  0x32   :  { %s82_s29 = sshll.u32 %s4323_s28, 4  ;;  %s83_s29 = int_to_ptr.vmem [resolvable:$true] %s82_s29 }
  0x33   :  { %s4195_s0 = scalar_lea.vmem %s83_s29, 512  ;;  %p4200_p7 = scmp.lt.s32.totalorder %s83_s29, %s83_s29 }
  0x34   :  { %p4196_p6 = scmp.ne.s32.totalorder %s83_s29, %s4195_s0  ;;  %p4201_p8 = scmp.lt.s32.totalorder %s4195_s0, %s4195_s0 }
  0x36   :  { %p4202_p9 = por %p4201_p8, %p4200_p7 }
  0x38   :  { %p4203_p10 = pnand %p4202_p9, %p4196_p6 }
  0x3a   :  { %4206 = shalt.err (!%p4203_p10)
}
  0x3b   :  { %s4324_s30 = smov 128   ;;  %s4325_s18 = smov 8  }
  0x3c   :  { %88 = dma.hbm_to_vmem [thread:$0]  %s5510_s8, 512, %s83_s29, [#allocation14], %s4324_s30, %s4324_s30, %s4325_s18  }
  0x3d   :  { %4307 = dma.done.wait [#allocation8], 32  }
  0x3e   :  { %4308 = vsyncadd [#allocation8], 4294967264 }
  0x3f   :  { %4309 = dma.done.wait [#allocation11], 64  }
  0x40   :  { %4310 = vsyncadd [#allocation11], 4294967232 }
  0x41   :  { %4311 = dma.done.wait [#allocation14], 544  }
  0x42   :  { %4312 = vsyncadd [#allocation14], 4294966752  ;;  %v4326_v0 = vmov 0.0   ;;  %vm4327_vm0 = vmmov 0   ;;  %vm5521_vm1 = vcmask 254976   ;;  %vm115_vm2 = vcmask 58368  }
  0x43   :  { %3741 = vmatprep.subr.mxu0 %v4326_v0  ;;  %3754 = vmatprep.subr.mxu1 %v4326_v0  ;;  %v117_v1 = vld [vmem:[#allocation10] sm:$0x3]  ;;  %v137_v2 = vld [vmem:[%s5508_s6 + $0x20] sm:$0xff]  ;;  %v136_v3 = vld [vmem:[%s5508_s6 + $0x18] sm:$0xff]  ;;  %s4328_s4 = smov 32   ;;  %vm128_vm3 = vcmask 64512  }
  0x44   :  { %3751 = vmatprep.mubr.msk.f32.mxu0 %vm4327_vm0, %v4326_v0  ;;  %3762 = vmatprep.mubr.msk.f32.mxu1 %vm4327_vm0, %v4326_v0  ;;  %119 = vst.msk [vmem:[#allocation3] sm:$0x3] %vm5521_vm1, %v117_v1  ;;  %v114_v4 = vld [vmem:[#allocation7] sm:$0x3]  ;;  %v135_v5 = vld [vmem:[%s5508_s6 + $0x10] sm:$0xff]  ;;  %v133_v8 = vld [vmem:[%s5508_s6] sm:$0xff]  ;;  %v424_v1 = vlaneseq }
  0x45   :  { %3742 = vmatpush3.msra.mxu0 %v137_v2  ;;  %116 = vst.msk [vmem:[#allocation2] sm:$0x3] %vm115_vm2, %v114_v4  ;;  %v120_v6 = vld [vmem:[#allocation12] sm:$0x3]  ;;  %vm165_vm4 = vcmask 326656   ;;  %s5527_s29 = sld [smem:[#allocation29_spill]] }
  0x46   :  { %3743 = vmatprep.subr.mxu0 %v4326_v0  ;;  %121 = vst.msk [vmem:[#allocation4] sm:$0x3] %vm5521_vm1, %v120_v6  ;;  %v134_v7 = vld [vmem:[%s5508_s6 + $0x8] sm:$0xff]  ;;  %v4508_v15 = vld [vmem:[%s5509_s7] ss:$0 sm:$0xff]  ;;  %v4522_v33 = vld [vmem:[#allocation15 + $0x8] sm:$0xff] }
  0x47   :  { %3744 = vmatpush3.msra.mxu0 %v136_v3  ;;  %v4516_v31 = vld [vmem:[#allocation15 + $0x18] sm:$0xff]  ;;  %v4518_v32 = vld [vmem:[#allocation15 + $0x10] sm:$0xff]  ;;  %v4526_v34 = vld [vmem:[#allocation15] sm:$0xff]  ;;  %vm282_vm5 = vcmask 261120   ;;  %v4589_v4 = vshrl.u32 %v424_v1, 7  ;;  %vm360_vm6 = vcmask 1041408  }
  0x48   :  { %3745 = vmatprep.subr.mxu0 %v4326_v0  ;;  %3755 = vmatpush3.msra.mxu1 %v4516_v31  ;;  %v124_v39 = vld [vmem:[%s5507_s5] sm:$0xff]  ;;  %v125_v40 = vld [vmem:[%s5507_s5 + $0x8] sm:$0xff]  ;;  %v127_v45 = vld [vmem:[%s5507_s5 + $0x18] sm:$0xff]  ;;  %vm531_vm7 = vcmask 60416   ;;  %vm435_vm8 = vcmask 130112   ;;  %vm446_vm9 = vcmask 1041409  }
  0x49   :  { %3746 = vmatpush3.msra.mxu0 %v135_v5  ;;  %3756 = vmatprep.subr.mxu1 %v4326_v0  ;;  %129 = vst.msk [vmem:[#allocation6] sm:$0xff] %vm128_vm3, %v124_v39  ;;  %130 = vst.msk [vmem:[#allocation6 + $0x8] sm:$0xff] %vm128_vm3, %v125_v40  ;;  %v126_v46 = vld [vmem:[%s5507_s5 + $0x10] sm:$0xff]  ;;  %v4574_v51 = vld [vmem:[%s5511_s9] ss:$0 sm:$0xff]  ;;  %s4330_s5 = smov 114  }
  0x4a   :  { %3747 = vmatprep.subr.mxu0 %v4326_v0  ;;  %3757 = vmatpush3.msra.mxu1 %v4518_v32  ;;  %132 = vst.msk [vmem:[#allocation6 + $0x18] sm:$0xff] %vm128_vm3, %v127_v45  ;;  %131 = vst.msk [vmem:[#allocation6 + $0x10] sm:$0xff] %vm128_vm3, %v126_v46  ;;  %vm449_vm10 = vcmask 1043459   ;;  %vm376_vm11 = vcmask 101456   ;;  %vm673_vm12 = vcmask 1042434   ;;  %vm678_vm13 = vcmask 125952  }
  0x4b   :  { %3748 = vmatpush3.msra.mxu0 %v134_v7  ;;  %v151_v9 = vld [vmem:[#allocation3] sm:$0x3]  ;;  %v158_v14 = vld [vmem:[%s5527_s29] sm:$0x3]  ;;  %3758 = vmatprep.subr.mxu1 %v4326_v0  ;;  %s4335_s25 = smov 118   ;;  %s4336_s26 = smov 112  }
  0x4c   :  { %3749 = vmatprep.subr.mxu0 %v4326_v0  ;;  %160 = vrot.lane.b32.xlu0 %v151_v9, %s4325_s18  ;;  %v150_v11 = vld [vmem:[#allocation2] sm:$0x3]  ;;  %s4329_s18 = smov 64   ;;  %vm5523_vm14 = vcmask 19456   ;;  %s4340_s27 = smov 1   ;;  %vm5522_vm15 = vcmask 7168  }
  0x4d   :  { %3750 = vmatpush3.msra.mxu0 %v133_v8  ;;  %v152_v10 = vld [vmem:[#allocation4] sm:$0x3]  ;;  %3759 = vmatpush3.msra.mxu1 %v4522_v33  ;;  %s4341_s28 = smov 113   ;;  %s4343_s0 = smov 15  }
  0x4e   :  { %3778 = vmatprep.subr.mxu0 %v4326_v0  ;;  %253 = vrot.lane.b32.xlu1 %v152_v10, %s4328_s4  ;;  %s4344_s30 = smov 127   ;;  %s4345_s19 = smov 40  }
  0x4f   :  { %3760 = vmatprep.subr.mxu1 %v4326_v0  ;;  %s4346_s8 = smov 100  }
  0x50   :  { %3761 = vmatpush3.msra.mxu1 %v4526_v34  ;;  %v4551_v41 = vld [vmem:[#allocation6] sm:$0xff]  ;;  %v4581_v56 = vld [vmem:[#allocation6 + $0x8] sm:$0xff] }
  0x51   :  { %3765 = vmatprep.subr.mxu1 %v4326_v0  ;;  %v4554_v42 = vadd.f32 1e-16, %v4551_v41  ;;  %v4567_v47 = vld [vmem:[#allocation6 + $0x18] sm:$0xff]  ;;  %v401_v57 = vadd.f32 1e-16, %v4581_v56  ;;  %v4584_v58 = vld [vmem:[#allocation6 + $0x10] sm:$0xff] }
  0x52   :  { %v403_v48 = vadd.f32 1e-16, %v4567_v47  ;;  %v402_v60 = vadd.f32 1e-16, %v4584_v58 }
  0x53   :  { %v404_v43 = vmul.f32 %v4554_v42, %v4554_v42  ;;  %v405_v59 = vmul.f32 %v401_v57, %v401_v57 }
  0x54   :  { %v407_v49 = vmul.f32 %v403_v48, %v403_v48  ;;  %v406_v62 = vmul.f32 %v402_v60, %v402_v60 }
  0x55   :  { %v408_v44 = vsel %vm128_vm3, %v404_v43, 0.0  ;;  %v411_v61 = vsel %vm128_vm3, %v405_v59, 0.0 }
  0x56   :  { %v417_v50 = vsel %vm128_vm3, %v407_v49, 0.0  ;;  %v414_v63 = vsel %vm128_vm3, %v406_v62, 0.0 }
  0xbe   :  { %v161_v12 = vpop.permute.xlu0 %160 }
  0xbf   :  { %v164_v13 = vsel %vm128_vm3, %v150_v11, %v161_v12 }
  0xc0   :  { %3752 = vmatmul.mubr.msk.f32.vlgmr.msra.gmra.mxu0 %vm165_vm4, %v164_v13  ;;  %v254_v27 = vpop.permute.xlu1 %253 }
  0xc1   :  { %3779 = vmatpush3.msra.mxu0 %v137_v2  ;;  %3788 = vmatprep.mubr.msk.f32.mxu0 %vm4327_vm0, %v4326_v0  ;;  %v4331_v2 = vmov 1966171168  }
  0xc2   :  { %3780 = vmatprep.subr.mxu0 %v4326_v0 }
  0xc3   :  { %3781 = vmatpush3.msra.mxu0 %v136_v3  ;;  %v455_v3 = vunpack.c.l.s4 %v4331_v2 }
  0xc4   :  { %3782 = vmatprep.subr.mxu0 %v4326_v0 }
  0xc5   :  { %3783 = vmatpush3.msra.mxu0 %v135_v5  ;;  %v456_v5 = vunpack.c.0.s8 %v455_v3 }
  0xc6   :  { %3784 = vmatprep.subr.mxu0 %v4326_v0 }
  0xc7   :  { %3785 = vmatpush3.msra.mxu0 %v134_v7 }
  0xc8   :  { %3786 = vmatprep.subr.mxu0 %v4326_v0 }
  0xc9   :  { %3787 = vmatpush3.msra.mxu0 %v133_v8  ;;  %v4596_v8 = vsub.s32 %v456_v5, %v4589_v4 }
  0xca   :  { %3802 = vmatprep.subr.mxu0 %v4326_v0 }
 0x180   :  { %v235_v16 = vpop.f32.mrf.mxu0 }
 0x181   :  { %v239_v17 = vadd.f32 %v235_v16, %v158_v14  ;;  %v4603_v14 = vsub.s32 0, %v4589_v4 }
 0x182   :  { %v3753_v18 = vpop.f32.mrf.mxu0 }
 0x183   :  { %v246_v19 = vadd.f32 %v4508_v15, %v239_v17 }
 0x185   :  { %3962 = vtanh.f32 %v246_v19  ;;  %v247_v21 = vmul.f32 0.5, %v246_v19 }
 0x187   :  { %3964 = vtanh.f32 %v247_v21 }
 0x192   :  { %v3963_v20 = vpop.eup %3962 }
 0x193   :  { %258 = vrot.lane.b32.xlu0 %v3963_v20, %s4329_s18 }
 0x194   :  { %v3965_v22 = vpop.eup %3964 }
 0x195   :  { %v249_v23 = vadd.f32 1.0, %v3965_v22 }
 0x197   :  { %v250_v24 = vmul.f32 0.5, %v249_v23 }
 0x199   :  { %v256_v28 = vmul.f32 %v254_v27, %v250_v24 }
 0x205   :  { %v259_v25 = vpop.permute.xlu0 %258 }
 0x206   :  { %v261_v26 = vmul.f32 %v259_v25, %v250_v24 }
 0x208   :  { %263 = vrot.lane.b32.xlu1 %v261_v26, %s4328_s4 }
 0x27a   :  { %v264_v29 = vpop.permute.xlu1 %263 }
 0x27b   :  { %v4513_v30 = vadd.f32 %v264_v29, %v256_v28 }
 0x27d   :  { %3966 = vtanh.f32 %v4513_v30 }
 0x28a   :  { %v3967_v35 = vpop.eup %3966 }
 0x28b   :  { %269 = vrot.lane.b32.xlu0 %v3967_v35, %s4329_s18 }
 0x2fd   :  { %v270_v36 = vpop.permute.xlu0 %269 }
 0x2fe   :  { %v4533_v37 = vmul.f32 %v270_v36, %v250_v24 }
 0x300   :  { %280 = vrot.lane.b32.xlu1 %v4533_v37, %s4328_s4 }
 0x324   :  { %409 = vadd.xlane.f32.xlu1 %v408_v44 }
 0x328   :  { %418 = vadd.xlane.f32.xlu1 %v417_v50 }
 0x372   :  { %v4537_v38 = vpop.permute.xlu1 %280 }
 0x373   :  { %3763 = vmatmul.mubr.msk.f32.vlgmr.msra.gmra.mxu1 %vm282_vm5, %v4537_v38 }
 0x374   :  { %3775 = vmatprep.mubr.msk.f32.mxu1 %vm4327_vm0, %v4326_v0 }
 0x433   :  { %v351_v52 = vpop.f32.mrf.mxu1 }
 0x434   :  { %v4577_v53 = vadd.f32 %v4574_v51, %v351_v52  ;;  %v425_v52 = vand.u32 127, %v424_v1 }
 0x435   :  { %v3764_v54 = vpop.f32.mrf.mxu1 }
 0x436   :  { %v356_v55 = vrot.slane %v4577_v53, 6  ;;  %v410_v54 = vpop.xlane.xlu1 %409  ;;  %v4624_v59 = vsub.s32 %v425_v52, %v4589_v4 }
 0x438   :  { %357 = vrot.lane.b32.xlu0 %v356_v55, %s4330_s5  ;;  %v430_v55 = vadd.s32 4294967288, %v425_v52  ;;  %v429_v62 = vrot.slane %v410_v54, %v4624_v59 }
 0x457   :  { %412 = vadd.xlane.f32.xlu0 %v411_v61 }
 0x45b   :  { %415 = vadd.xlane.f32.xlu0 %v414_v63 }
 0x4aa   :  { %v358_v6 = vpop.permute.xlu0 %357 }
 0x4ab   :  { %v4593_v7 = vsel %vm360_vm6, %v4577_v53, %v358_v6 }
 0x4ac   :  { %v362_v9 = vadd.f32 1e-16, %v4593_v7 }
 0x4ae   :  { %v530_v10 = vmul.f32 %v362_v9, %v362_v9  ;;  %v460_v11 = vrot.slane %v362_v9, %v4596_v8 }
 0x4b0   :  { %v532_v12 = vsel %vm531_vm7, %v530_v10, 0.0  ;;  %v468_v13 = vrot.slane %v460_v11, %v4596_v8  ;;  %v461_v16 = vcombine.high %v460_v11, %v460_v11 }
 0x4b1   :  { %533 = vadd.xlane.f32.xlu0 %v532_v12 }
 0x4b2   :  { %v481_v17 = vrot.slane %v468_v13, %v4603_v14  ;;  %v475_v18 = vrot.slane %v461_v16, %v4596_v8  ;;  %v476_v19 = vcombine.high %v468_v13, %v468_v13  ;;  %v4332_v13 = vmov 0  }
 0x4b3   :  { %3927 = vset.pattern.permute.xlu1 %v4332_v13  ;;  %3926 = vset.pattern.permute.xlu0 %v4332_v13 }
 0x4b4   :  { %v499_v20 = vmul.f32 %v481_v17, %v401_v57  ;;  %v498_v21 = vmul.f32 %v481_v17, %v4554_v42  ;;  %v485_v22 = vrot.slane %v475_v18, %v4603_v14  ;;  %v489_v23 = vrot.slane %v476_v19, %v4603_v14 }
 0x4b5   :  { %v477_v24 = vcombine.high %v475_v18, %v475_v18  ;;  %v4639_v18 = vsub.s32 2, %v4589_v4  ;;  %v4642_v19 = vsub.s32 1, %v4589_v4 }
 0x4b6   :  { %v509_v25 = vsel %vm128_vm3, %v499_v20, 0.0  ;;  %v506_v26 = vsel %vm128_vm3, %v498_v21, 0.0  ;;  %v501_v27 = vmul.f32 %v485_v22, %v403_v48  ;;  %v500_v28 = vmul.f32 %v485_v22, %v402_v60 }
 0x4b7   :  { %510 = vadd.xlane.f32.xlu0 %v509_v25  ;;  %507 = vadd.xlane.f32.xlu1 %v506_v26  ;;  %v503_v29 = vmul.f32 %v489_v23, %v401_v57  ;;  %v502_v39 = vmul.f32 %v489_v23, %v4554_v42  ;;  %v493_v40 = vrot.slane %v477_v24, %v4603_v14  ;;  %v4647_v22 = vsub.s32 3, %v4589_v4 }
 0x4b8   :  { %v515_v35 = vsel %vm128_vm3, %v501_v27, 0.0  ;;  %v512_v36 = vsel %vm128_vm3, %v500_v28, 0.0  ;;  %v4621_v57 = vsub.s32 %v430_v55, %v4589_v4  ;;  %v364_v24 = vand.u32 2147483647, %v4593_v7 }
 0x4b9   :  { %v521_v43 = vsel %vm128_vm3, %v503_v29, 0.0  ;;  %v518_v44 = vsel %vm128_vm3, %v502_v39, 0.0  ;;  %v505_v45 = vmul.f32 %v493_v40, %v403_v48  ;;  %v504_v46 = vmul.f32 %v493_v40, %v402_v60  ;;  %v419_v60 = vpop.xlane.xlu1 %418 }
 0x4ba   :  { %v444_v2 = vrot.slane %v419_v60, %v4621_v57  ;;  %v365_v25 = vsub.f32 0.0, %v364_v24 }
 0x4bb   :  { %516 = vadd.xlane.f32.xlu0 %v515_v35  ;;  %513 = vadd.xlane.f32.xlu1 %v512_v36  ;;  %v527_v49 = vsel %vm128_vm3, %v505_v45, 0.0  ;;  %v524_v50 = vsel %vm128_vm3, %v504_v46, 0.0 }
 0x4bc   :  { %v366_v26 = vmul.f32 1.442695, %v365_v25 }
 0x4bf   :  { %522 = vadd.xlane.f32.xlu0 %v521_v43  ;;  %519 = vadd.xlane.f32.xlu1 %v518_v44 }
 0x4c3   :  { %528 = vadd.xlane.f32.xlu0 %v527_v49  ;;  %525 = vadd.xlane.f32.xlu1 %v524_v50 }
 0x4e0   :  { %v413_v42 = vpop.xlane.xlu0 %412 }
 0x4e1   :  { %v434_v61 = vrot.slane %v413_v42, %v4621_v57 }
 0x4e3   :  { %v436_v1 = vsel %vm435_vm8, %v434_v61, %v429_v62 }
 0x4e4   :  { %v416_v48 = vpop.xlane.xlu0 %415 }
 0x4e5   :  { %v440_v63 = vrot.slane %v416_v48, %v4624_v59 }
 0x4e7   :  { %v445_v3 = vsel %vm435_vm8, %v444_v2, %v440_v63 }
 0x4e8   :  { %v447_v5 = vsel %vm446_vm9, %v445_v3, %v436_v1  ;;  %v450_v6 = vsel %vm449_vm10, %v445_v3, %v436_v1 }
 0x4e9   :  { %v452_v10 = vsel %vm360_vm6, %v447_v5, %v450_v6  ;;  %v363_v6 = vmax.f32 %v4593_v7, 0.0 }
 0x53a   :  { %v534_v9 = vpop.xlane.xlu0 %533 }
 0x53b   :  { %v535_v11 = vmul.f32 %v534_v9, %v452_v10 }
 0x53d   :  { %v536_v12 = vmax.f32 %v535_v11, 1e-16  ;;  %v4333_v11 = vmov 8  }
 0x53f   :  { %3968 = vrsqrt.f32 %v536_v12  ;;  %v377_v12 = vsel %vm376_vm11, %v4593_v7, -inf }
 0x540   :  { %3970 = vpow2.f32 %v366_v26  ;;  %v511_v27 = vpop.xlane.xlu0 %510  ;;  %v508_v28 = vpop.xlane.xlu1 %507 }
 0x544   :  { %v517_v29 = vpop.xlane.xlu0 %516  ;;  %v514_v35 = vpop.xlane.xlu1 %513 }
 0x548   :  { %v523_v36 = vpop.xlane.xlu0 %522  ;;  %v520_v4 = vpop.xlane.xlu1 %519 }
 0x54c   :  { %v3969_v16 = vpop.eup %3968  ;;  %v529_v43 = vpop.xlane.xlu0 %528 }
 0x54d   :  { %v542_v17 = vrot.slane %v3969_v16, %v4603_v14  ;;  %v564_v20 = vrot.slane %v3969_v16, %v4639_v18  ;;  %v553_v21 = vrot.slane %v3969_v16, %v4642_v19  ;;  %v575_v23 = vrot.slane %v3969_v16, %v4647_v22  ;;  %v3971_v39 = vpop.eup %3970  ;;  %v526_v44 = vpop.xlane.xlu1 %525 }
 0x54e   :  { %v368_v40 = vadd.f32 1.0, %v3971_v39  ;;  %v4334_v16 = vmov 9  }
 0x54f   :  { %548 = vbcast.lane.b32.xlu0 %v542_v17, 264  ;;  %544 = vbcast.lane.b32.xlu1 %v542_v17, 256  ;;  %v122_v17 = vld [vmem:[#allocation13] sm:$0x3] }
 0x550   :  { %3972 = vlog2.f32 %v368_v40  ;;  %123 = vst.msk [vmem:[#allocation5] sm:$0x3] %vm5521_vm1, %v122_v17  ;;  %vm719_vm1 = vcmask 121856  }
 0x553   :  { %566 = vbcast.lane.b32.xlu0 %v564_v20, 256  ;;  %555 = vbcast.lane.b32.xlu1 %v553_v21, 256 }
 0x557   :  { %577 = vbcast.lane.b32.xlu0 %v575_v23, 256  ;;  %559 = vbcast.lane.b32.xlu1 %v553_v21, 264 }
 0x55b   :  { %570 = vbcast.lane.b32.xlu1 %v564_v20, 264 }
 0x55d   :  { %v3973_v62 = vpop.eup %3972 }
 0x55e   :  { %v370_v3 = vmul.f32 0.6931472, %v3973_v62 }
 0x55f   :  { %581 = vbcast.lane.b32.xlu1 %v575_v23, 264 }
 0x560   :  { %v4652_v10 = vadd.f32 %v370_v3, %v363_v6 }
 0x5c1   :  { %v549_v45 = vpop.permute.xlu0 %548  ;;  %v545_v46 = vpop.permute.xlu1 %544 }
 0x5c2   :  { %v592_v49 = vmul.f32 %v549_v45, %v511_v27  ;;  %v591_v50 = vmul.f32 %v545_v46, %v508_v28 }
 0x5c4   :  { %616 = vperm.xlu1 %3927, %v592_v49   ;;  %613 = vperm.xlu0 %3926, %v591_v50  }
 0x5c5   :  { %v567_v52 = vpop.permute.xlu0 %566  ;;  %v556_v42 = vpop.permute.xlu1 %555 }
 0x5c6   :  { %v593_v54 = vmul.f32 %v556_v42, %v514_v35  ;;  %v595_v48 = vmul.f32 %v567_v52, %v520_v4 }
 0x5c8   :  { %619 = vperm.xlu1 %3927, %v593_v54  }
 0x5c9   :  { %v560_v55 = vpop.permute.xlu1 %559  ;;  %v578_v61 = vpop.permute.xlu0 %577 }
 0x5ca   :  { %v594_v60 = vmul.f32 %v560_v55, %v517_v29  ;;  %v597_v2 = vmul.f32 %v578_v61, %v526_v44  ;;  %v372_v61 = vmul.f32 0.5, %v4593_v7 }
 0x5cc   :  { %625 = vperm.xlu1 %3927, %v595_v48   ;;  %622 = vperm.xlu0 %3926, %v594_v60   ;;  %3974 = vtanh.f32 %v372_v61 }
 0x5cd   :  { %v571_v63 = vpop.permute.xlu1 %570 }
 0x5ce   :  { %v596_v1 = vmul.f32 %v571_v63, %v523_v36 }
 0x5d0   :  { %631 = vperm.xlu1 %3927, %v597_v2   ;;  %628 = vperm.xlu0 %3926, %v596_v1  }
 0x5d1   :  { %v582_v5 = vpop.permute.xlu1 %581 }
 0x5d2   :  { %v598_v9 = vmul.f32 %v582_v5, %v529_v43 }
 0x5d4   :  { %3928 = vset.pattern.permute.xlu1 %v4333_v11  ;;  %634 = vperm.xlu0 %3926, %v598_v9   ;;  %v153_v9 = vld [vmem:[#allocation5] sm:$0x3] }
 0x5d5   :  { %601 = vperm.xlu1 %3928, %v4652_v10   ;;  %v395_v17 = vrot.slane %v153_v9, 6 }
 0x5d8   :  { %3930 = vset.pattern.permute.xlu0 %v4334_v16 }
 0x5d9   :  { %3929 = vset.pattern.permute.xlu1 %v4334_v16  ;;  %v3975_v1 = vpop.eup %3974 }
 0x5da   :  { %v374_v3 = vadd.f32 1.0, %v3975_v1 }
 0x5dc   :  { %v375_v5 = vmul.f32 0.5, %v374_v3 }
 0x5f3   :  { %378 = vmax.xlane.f32.xlu0 %v377_v12  ;;  %v696_v12 = vsub.f32 1.0, %v375_v5 }
 0x63f   :  { %v617_v20 = vpop.permute.xlu1 %616  ;;  %v614_v21 = vpop.permute.xlu0 %613 }
 0x640   :  { %v639_v28 = vrot.slane %v614_v21, %v4624_v59  ;;  %v643_v29 = vrot.slane %v617_v20, %v4621_v57 }
 0x642   :  { %v644_v45 = vsel %vm435_vm8, %v643_v29, %v639_v28  ;;  %v4338_v28 = vmov 10  }
 0x643   :  { %v620_v23 = vpop.permute.xlu1 %619 }
 0x644   :  { %v648_v35 = vrot.slane %v620_v23, %v4624_v59 }
 0x647   :  { %v623_v24 = vpop.permute.xlu0 %622  ;;  %v626_v25 = vpop.permute.xlu1 %625 }
 0x648   :  { %v652_v26 = vrot.slane %v623_v24, %v4621_v57  ;;  %v657_v4 = vrot.slane %v626_v25, %v4624_v59 }
 0x64a   :  { %v653_v40 = vsel %vm435_vm8, %v652_v26, %v648_v35 }
 0x64b   :  { %v629_v27 = vpop.permute.xlu0 %628  ;;  %v632_v39 = vpop.permute.xlu1 %631  ;;  %v672_v50 = vsel %vm446_vm9, %v653_v40, %v644_v45 }
 0x64c   :  { %v661_v36 = vrot.slane %v629_v27, %v4621_v57  ;;  %v666_v46 = vrot.slane %v632_v39, %v4624_v59  ;;  %v4337_v27 = vmov 11  }
 0x64e   :  { %v662_v43 = vsel %vm435_vm8, %v661_v36, %v657_v4 }
 0x64f   :  { %v635_v44 = vpop.permute.xlu0 %634  ;;  %v674_v42 = vsel %vm673_vm12, %v662_v43, %v672_v50 }
 0x650   :  { %v670_v49 = vrot.slane %v635_v44, %v4621_v57  ;;  %v602_v55 = vpop.permute.xlu1 %601 }
 0x652   :  { %v671_v52 = vsel %vm435_vm8, %v670_v49, %v666_v46 }
 0x653   :  { %v675_v54 = vsel %vm449_vm10, %v671_v52, %v674_v42  ;;  %v4339_v52 = vmov 12  }
 0x654   :  { %v677_v48 = vmul.f32 %v675_v54, %v602_v55  ;;  %v4342_v54 = vmov 13   ;;  %v393_v55 = vadd.f32 1.0, %v4652_v10 }
 0x656   :  { %v679_v60 = vsel %vm678_vm13, %v677_v48, -inf }
 0x657   :  { %680 = vmax.xlane.f32.xlu1 %v679_v60 }
 0x67c   :  { %v379_v62 = vpop.xlane.xlu0 %378 }
 0x67d   :  { %v380_v63 = vsub.f32 %v4593_v7, %v379_v62 }
 0x67f   :  { %v381_v2 = vmul.f32 1.442695, %v380_v63 }
 0x681   :  { %3976 = vpow2.f32 %v381_v2 }
 0x68e   :  { %v3977_v6 = vpop.eup %3976 }
 0x68f   :  { %384 = vrot.lane.b32.xlu0 %v3977_v6, %s4335_s25 }
 0x693   :  { %699 = vperm.xlu0 %3930, %v696_v12  }
 0x697   :  { %396 = vrot.lane.b32.xlu0 %v395_v17, %s4336_s26 }
 0x698   :  { %3932 = vset.pattern.permute.xlu0 %v4337_v27 }
 0x6e0   :  { %v681_v20 = vpop.xlane.xlu1 %680 }
 0x6e1   :  { %v682_v21 = vsub.f32 %v677_v48, %v681_v20 }
 0x6e3   :  { %v683_v23 = vmul.f32 1.442695, %v682_v21 }
 0x6e5   :  { %3978 = vpow2.f32 %v683_v23 }
 0x6f2   :  { %v3979_v25 = vpop.eup %3978 }
 0x6f3   :  { %v685_v26 = vsel %vm678_vm13, %v3979_v25, 0.0 }
 0x701   :  { %v385_v7 = vpop.permute.xlu0 %384 }
 0x702   :  { %v388_v24 = vsel %vm5523_vm14, %v385_v7, 0.0 }
 0x703   :  { %389 = vadd.xlane.f32.xlu1 %v388_v24 }
 0x707   :  { %686 = vadd.xlane.f32.xlu1 %v685_v26 }
 0x70e   :  { %v700_v36 = vpop.permute.xlu0 %699 }
 0x712   :  { %v397_v39 = vpop.permute.xlu0 %396 }
 0x713   :  { %v399_v44 = vsel %vm360_vm6, %v153_v9, %v397_v39 }
 0x714   :  { %v702_v49 = vmul.f32 %v700_v36, %v399_v44 }
 0x718   :  { %692 = vperm.xlu1 %3929, %v375_v5  }
 0x71c   :  { %3931 = vset.pattern.permute.xlu1 %v4338_v28 }
 0x78c   :  { %v390_v29 = vpop.xlane.xlu1 %389 }
 0x78d   :  { %3980 = vrcp.f32 %v390_v29 }
 0x790   :  { %v687_v35 = vpop.xlane.xlu1 %686 }
 0x791   :  { %3982 = vrcp.f32 %v687_v35 }
 0x794   :  { %v693_v46 = vpop.permute.xlu1 %692 }
 0x79a   :  { %v3981_v4 = vpop.eup %3980 }
 0x79b   :  { %v392_v40 = vmul.f32 %v3981_v4, %v3977_v6 }
 0x79d   :  { %728 = vperm.xlu0 %3932, %v392_v40   ;;  %723 = vperm.xlu1 %3931, %v392_v40  }
 0x79e   :  { %v3983_v43 = vpop.eup %3982 }
 0x79f   :  { %v689_v45 = vmul.f32 %v3983_v43, %v3979_v25 }
 0x7a1   :  { %v695_v50 = vmul.f32 %v693_v46, %v689_v45  ;;  %3933 = vset.pattern.permute.xlu1 %v4339_v52  ;;  %3936 = vset.pattern.permute.xlu0 %v4332_v13  ;;  %v4708_v45 = vld [vmem:[%s5512_s10 + $0x20] sm:$0xff]  ;;  %v4713_v46 = vld [vmem:[%s5512_s10 + $0x18] sm:$0xff] }
 0x7a2   :  { %734 = vperm.xlu1 %3933, %v392_v40   ;;  %3766 = vmatpush3.msra.mxu1 %v4708_v45 }
 0x7a3   :  { %v703_v42 = vadd.f32 %v702_v49, %v695_v50  ;;  %3767 = vmatprep.subr.mxu1 %v4326_v0  ;;  %v4720_v49 = vld [vmem:[%s5512_s10 + $0x10] sm:$0xff] }
 0x7a4   :  { %3768 = vmatpush3.msra.mxu1 %v4713_v46 }
 0x7a5   :  { %708 = vrot.lane.b32.xlu0 %v703_v42, %s4340_s27  ;;  %3769 = vmatprep.subr.mxu1 %v4326_v0 }
 0x7a6   :  { %705 = vrot.lane.b32.xlu1 %v703_v42, %s4341_s28  ;;  %3770 = vmatpush3.msra.mxu1 %v4720_v49 }
 0x7a7   :  { %3934 = vset.pattern.permute.xlu1 %v4342_v54  ;;  %3771 = vmatprep.subr.mxu1 %v4326_v0 }
 0x7a9   :  { %716 = vrot.lane.b32.xlu0 %v703_v42, %s4343_s0 }
 0x7aa   :  { %713 = vrot.lane.b32.xlu1 %v703_v42, %s4344_s30 }
 0x7ae   :  { %745 = vperm.xlu1 %3934, %v393_v55  }
 0x7b2   :  { %3935 = vset.pattern.permute.xlu1 %v4332_v13 }
 0x818   :  { %v724_v48 = vpop.permute.xlu1 %723  ;;  %v729_v60 = vpop.permute.xlu0 %728 }
 0x819   :  { %v731_v3 = vmul.f32 %v729_v60, %v703_v42 }
 0x81c   :  { %v709_v62 = vpop.permute.xlu0 %708 }
 0x81d   :  { %v735_v61 = vpop.permute.xlu1 %734 }
 0x820   :  { %v717_v5 = vpop.permute.xlu0 %716 }
 0x821   :  { %v706_v63 = vpop.permute.xlu1 %705 }
 0x822   :  { %v712_v2 = vsel %vm5522_vm15, %v706_v63, %v709_v62 }
 0x823   :  { %v726_v1 = vmul.f32 %v724_v48, %v712_v2 }
 0x825   :  { %v714_v6 = vpop.permute.xlu1 %713  ;;  %v732_v12 = vadd.f32 %v731_v3, %v726_v1 }
 0x826   :  { %v720_v9 = vsel %vm719_vm1, %v714_v6, %v717_v5 }
 0x827   :  { %v737_v10 = vmul.f32 %v735_v61, %v720_v9 }
 0x829   :  { %v738_v17 = vadd.f32 %v737_v10, %v732_v12  ;;  %v746_v7 = vpop.permute.xlu1 %745 }
 0x82b   :  { %v739_v20 = vmax.f32 %v738_v17, 1e-38  ;;  %vm742_vm15 = vcmp.gt.f32.partialorder %v738_v17, 0.0 }
 0x82d   :  { %3984 = vlog2.f32 %v739_v20 }
 0x83a   :  { %v3985_v21 = vpop.eup %3984 }
 0x83b   :  { %v741_v23 = vmul.f32 0.6931472, %v3985_v21  ;;  %v4744_v21 = vld [vmem:[%s5512_s10] sm:$0xff] }
 0x83d   :  { %v748_v24 = vmul.f32 %v746_v7, %v741_v23 }
 0x83f   :  { %v749_v25 = vmul.f32 1.442695, %v748_v24 }
 0x841   :  { %3986 = vpow2.f32 %v749_v25 }
 0x84e   :  { %v3987_v26 = vpop.eup %3986 }
 0x84f   :  { %v751_v29 = vsel %vm742_vm15, %v3987_v26, 0.0  ;;  %vm5528_vm15 = vcmask 7168  }
 0x850   :  { %v752_v35 = vsel %vm678_vm13, %v751_v29, 0.0 }
 0x851   :  { %753 = vadd.xlane.f32.xlu0 %v752_v35 }
 0x8da   :  { %v754_v36 = vpop.xlane.xlu0 %753 }
 0x8db   :  { %v755_v4 = vadd.f32 1e-16, %v754_v36 }
 0x8dd   :  { %3988 = vrcp.f32 %v755_v4 }
 0x8ea   :  { %v3989_v39 = vpop.eup %3988 }
 0x8eb   :  { %v4697_v40 = vmul.f32 %v3989_v39, %v751_v29 }
 0x8ed   :  { %v761_v43 = vrot.slane %v4697_v40, %v4603_v14  ;;  %v772_v44 = vrot.slane %v4697_v40, %v4642_v19 }
 0x8ef   :  { %763 = vbcast.lane.b32.xlu1 %v761_v43, 256 }
 0x8f3   :  { %767 = vbcast.lane.b32.xlu1 %v761_v43, 264 }
 0x8f7   :  { %774 = vbcast.lane.b32.xlu1 %v772_v44, 256 }
 0x8fb   :  { %778 = vbcast.lane.b32.xlu1 %v772_v44, 264 }
 0x8ff   :  { %1041 = vrot.lane.b32.xlu1 %v4533_v37, %s4345_s19  ;;  %v4727_v37 = vld [vmem:[%s5512_s10 + $0x8] sm:$0xff] }
 0x900   :  { %3772 = vmatpush3.msra.mxu1 %v4727_v37 }
 0x901   :  { %3773 = vmatprep.subr.mxu1 %v4326_v0 }
 0x902   :  { %3774 = vmatpush3.msra.mxu1 %v4744_v21 }
 0x903   :  { %3791 = vmatprep.subr.mxu1 %v4326_v0 }
 0x961   :  { %v764_v50 = vpop.permute.xlu1 %763 }
 0x962   :  { %v780_v42 = vmul.f32 %v764_v50, %v4551_v41 }
 0x964   :  { %v784_v60 = vsel %vm128_vm3, %v780_v42, 0.0 }
 0x965   :  { %v768_v55 = vpop.permute.xlu1 %767 }
 0x966   :  { %v781_v48 = vmul.f32 %v768_v55, %v4581_v56 }
 0x968   :  { %v785_v61 = vsel %vm128_vm3, %v781_v48, 0.0 }
 0x969   :  { %v786_v62 = vadd.f32 %v785_v61, %v784_v60  ;;  %v775_v63 = vpop.permute.xlu1 %774 }
 0x96a   :  { %v782_v1 = vmul.f32 %v775_v63, %v4584_v58 }
 0x96b   :  { %v787_v2 = vrot.slane %v786_v62, 4 }
 0x96c   :  { %v793_v9 = vsel %vm128_vm3, %v782_v1, 0.0 }
 0x96d   :  { %v788_v3 = vadd.f32 %v787_v2, %v786_v62  ;;  %v779_v5 = vpop.permute.xlu1 %778 }
 0x96e   :  { %v783_v6 = vmul.f32 %v779_v5, %v4567_v47 }
 0x96f   :  { %v789_v10 = vrot.slane %v788_v3, 2 }
 0x970   :  { %v794_v12 = vsel %vm128_vm3, %v783_v6, 0.0 }
 0x971   :  { %v795_v17 = vadd.f32 %v794_v12, %v793_v9  ;;  %v790_v23 = vadd.f32 %v789_v10, %v788_v3  ;;  %v1042_v39 = vpop.permute.xlu1 %1041 }
 0x973   :  { %v796_v20 = vrot.slane %v795_v17, 4  ;;  %v791_v26 = vrot.slane %v790_v23, 1 }
 0x975   :  { %v797_v7 = vadd.f32 %v796_v20, %v795_v17  ;;  %v792_v35 = vadd.f32 %v791_v26, %v790_v23  ;;  %v802_v26 = vmul.f32 0.5, %v4577_v53 }
 0x977   :  { %v798_v24 = vrot.slane %v797_v7, 2 }
 0x979   :  { %v799_v25 = vadd.f32 %v798_v24, %v797_v7 }
 0x97b   :  { %v800_v29 = vrot.slane %v799_v25, 1 }
 0x97d   :  { %v801_v36 = vadd.f32 %v800_v29, %v799_v25  ;;  %v809_v25 = vrot.slane %v4697_v40, %v4639_v18 }
 0x97f   :  { %v948_v4 = vsel %vm446_vm9, %v801_v36, %v792_v35 }
 0x980   :  { %v1044_v43 = vsel %vm128_vm3, %v948_v4, %v1042_v39  ;;  %949 = vrot.lane.b32.xlu0 %v948_v4, %s4328_s4 }
 0x981   :  { %3789 = vmatmul.mubr.msk.f32.vlgmr.msra.gmra.mxu0 %vm165_vm4, %v1044_v43 }
 0x982   :  { %3803 = vmatpush3.msra.mxu0 %v4708_v45  ;;  %3812 = vmatprep.mubr.msk.f32.mxu0 %vm4327_vm0, %v4326_v0 }
 0x983   :  { %3804 = vmatprep.subr.mxu0 %v4326_v0 }
 0x984   :  { %3805 = vmatpush3.msra.mxu0 %v4713_v46 }
 0x985   :  { %3806 = vmatprep.subr.mxu0 %v4326_v0 }
 0x986   :  { %3807 = vmatpush3.msra.mxu0 %v4720_v49 }
 0x987   :  { %3808 = vmatprep.subr.mxu0 %v4326_v0 }
 0x988   :  { %3809 = vmatpush3.msra.mxu0 %v4727_v37 }
 0x989   :  { %3810 = vmatprep.subr.mxu0 %v4326_v0 }
 0x98a   :  { %3811 = vmatpush3.msra.mxu0 %v4744_v21 }
 0x98b   :  { %3828 = vmatprep.subr.mxu0 %v4326_v0 }
 0x9f2   :  { %v950_v44 = vpop.permute.xlu0 %949 }
 0x9f3   :  { %v952_v50 = vsel %vm282_vm5, %v4537_v38, %v950_v44  ;;  %v4813_v44 = vld [vmem:[%s5508_s6 + $0x20] sm:$0xff] }
 0x9f4   :  { %3776 = vmatmul.mubr.msk.f32.vlgmr.msra.gmra.mxu1 %vm165_vm4, %v952_v50 }
 0x9f5   :  { %3792 = vmatpush3.msra.mxu1 %v4516_v31  ;;  %3799 = vmatprep.mubr.msk.f32.mxu1 %vm4327_vm0, %v4326_v0  ;;  %v3661_v31 = vld [vmem:[%s5527_s29 + $0x2] sm:$0x3] }
 0x9f6   :  { %3793 = vmatprep.subr.mxu1 %v4326_v0 }
 0x9f7   :  { %3794 = vmatpush3.msra.mxu1 %v4518_v32 }
 0x9f8   :  { %3795 = vmatprep.subr.mxu1 %v4326_v0 }
 0x9f9   :  { %3796 = vmatpush3.msra.mxu1 %v4522_v33 }
 0x9fa   :  { %3797 = vmatprep.subr.mxu1 %v4326_v0 }
 0x9fb   :  { %3798 = vmatpush3.msra.mxu1 %v4526_v34  ;;  %v4785_v34 = vld [vmem:[%s5513_s11] ss:$0 sm:$0xff] }
 0x9fc   :  { %3815 = vmatprep.subr.mxu1 %v4326_v0 }
 0xa41   :  { %v1114_v38 = vpop.f32.mrf.mxu0 }
 0xa42   :  { %v1118_v42 = vadd.f32 %v3661_v31, %v1114_v38 }
 0xa43   :  { %v3790_v55 = vpop.f32.mrf.mxu0 }
 0xa44   :  { %v1119_v48 = vadd.f32 %v4508_v15, %v1118_v42  ;;  %v4823_v42 = vld [vmem:[%s5508_s6 + $0x18] sm:$0xff] }
 0xa46   :  { %3990 = vtanh.f32 %v1119_v48  ;;  %v1120_v33 = vmul.f32 0.5, %v1119_v48  ;;  %v4830_v48 = vld [vmem:[%s5508_s6 + $0x10] sm:$0xff] }
 0xa48   :  { %3992 = vtanh.f32 %v1120_v33 }
 0xa53   :  { %v3991_v32 = vpop.eup %3990 }
 0xa54   :  { %1127 = vrot.lane.b32.xlu1 %v3991_v32, %s4329_s18 }
 0xa55   :  { %v3993_v2 = vpop.eup %3992 }
 0xa56   :  { %v1122_v1 = vadd.f32 1.0, %v3993_v2  ;;  %v4848_v2 = vld [vmem:[%s5508_s6] sm:$0xff] }
 0xa58   :  { %v1123_v15 = vmul.f32 0.5, %v1122_v1 }
 0xa5a   :  { %v1125_v10 = vmul.f32 %v1123_v15, %v4513_v30  ;;  %v820_v30 = vrot.slane %v4697_v40, %v4647_v22 }
 0xab4   :  { %v1028_v60 = vpop.f32.mrf.mxu1 }
 0xab5   :  { %v1029_v61 = vadd.f32 %v4785_v34, %v1028_v60 }
 0xab6   :  { %v3777_v62 = vpop.f32.mrf.mxu1 }
 0xab7   :  { %v1032_v63 = vmul.f32 0.5, %v1029_v61  ;;  %v4838_v61 = vld [vmem:[%s5508_s6 + $0x8] sm:$0xff]  ;;  %v895_v62 = vrot.slane %v4577_v53, %v4596_v8  ;;  %s4347_s6 = smov 92  }
 0xab9   :  { %3994 = vtanh.f32 %v1032_v63  ;;  %v903_v53 = vrot.slane %v895_v62, %v4596_v8 }
 0xac6   :  { %v3995_v3 = vpop.eup %3994  ;;  %v1128_v5 = vpop.permute.xlu1 %1127 }
 0xac7   :  { %v1034_v6 = vadd.f32 1.0, %v3995_v3  ;;  %v1130_v9 = vmul.f32 %v1128_v5, %v1123_v15  ;;  %v896_v5 = vcombine.high %v895_v62, %v895_v62 }
 0xac9   :  { %v1035_v12 = vmul.f32 0.5, %v1034_v6  ;;  %1132 = vrot.lane.b32.xlu1 %v1130_v9, %s4328_s4 }
 0xacb   :  { %1037 = vst.msk [vmem:[#allocation16] sm:$0x3] %vm115_vm2, %v1035_v12 }
 0xb3b   :  { %v1133_v17 = vpop.permute.xlu1 %1132 }
 0xb3c   :  { %v4791_v20 = vadd.f32 %v1133_v17, %v1125_v10  ;;  %v914_v10 = vrot.slane %v903_v53, %v4603_v14  ;;  %v910_v17 = vrot.slane %v896_v5, %v4596_v8 }
 0xb3e   :  { %3996 = vtanh.f32 %v4791_v20 }
 0xb3f   :  { %3998 = vtanh.f32 %v802_v26 }
 0xb4b   :  { %v3997_v23 = vpop.eup %3996 }
 0xb4c   :  { %1138 = vrot.lane.b32.xlu1 %v3997_v23, %s4329_s18  ;;  %v3999_v29 = vpop.eup %3998 }
 0xb4d   :  { %v804_v35 = vadd.f32 1.0, %v3999_v29 }
 0xb4f   :  { %v805_v36 = vmul.f32 0.5, %v804_v35 }
 0xb51   :  { %v835_v4 = vrot.slane %v805_v36, %v4596_v8 }
 0xb53   :  { %v843_v39 = vrot.slane %v835_v4, %v4596_v8  ;;  %v836_v31 = vcombine.high %v835_v4, %v835_v4 }
 0xb55   :  { %v854_v50 = vrot.slane %v843_v39, %v4603_v14  ;;  %v850_v33 = vrot.slane %v836_v31, %v4596_v8 }
 0xb57   :  { %v858_v1 = vrot.slane %v850_v33, %v4603_v14 }
 0xbbe   :  { %v1139_v7 = vpop.permute.xlu1 %1138 }
 0xbbf   :  { %v4795_v24 = vmul.f32 %v1139_v7, %v1123_v15 }
 0xbc1   :  { %1143 = vrot.lane.b32.xlu1 %v4795_v24, %s4328_s4 }
 0xbc5   :  { %811 = vbcast.lane.b32.xlu1 %v809_v25, 256 }
 0xbc9   :  { %815 = vbcast.lane.b32.xlu1 %v809_v25, 264 }
 0xbcd   :  { %822 = vbcast.lane.b32.xlu1 %v820_v30, 256 }
 0xbd1   :  { %826 = vbcast.lane.b32.xlu1 %v820_v30, 264  ;;  %v918_v30 = vrot.slane %v910_v17, %v4603_v14 }
 0xc33   :  { %v4806_v43 = vpop.permute.xlu1 %1143 }
 0xc34   :  { %3800 = vmatmul.mubr.msk.f32.vlgmr.msra.gmra.mxu1 %vm282_vm5, %v4806_v43 }
 0xc35   :  { %3816 = vmatpush3.msra.mxu1 %v4813_v44  ;;  %3825 = vmatprep.mubr.msk.f32.mxu1 %vm4327_vm0, %v4326_v0 }
 0xc36   :  { %3817 = vmatprep.subr.mxu1 %v4326_v0 }
 0xc37   :  { %v812_v38 = vpop.permute.xlu1 %811  ;;  %3818 = vmatpush3.msra.mxu1 %v4823_v42 }
 0xc38   :  { %v861_v55 = vmul.f32 %v854_v50, %v812_v38  ;;  %3819 = vmatprep.subr.mxu1 %v4326_v0  ;;  %v921_v7 = vmul.f32 %v914_v10, %v812_v38 }
 0xc39   :  { %3820 = vmatpush3.msra.mxu1 %v4830_v48 }
 0xc3a   :  { %v865_v32 = vsub.f32 1.0, %v861_v55  ;;  %3821 = vmatprep.subr.mxu1 %v4326_v0 }
 0xc3b   :  { %v816_v60 = vpop.permute.xlu1 %815  ;;  %3822 = vmatpush3.msra.mxu1 %v4838_v61 }
 0xc3c   :  { %v862_v63 = vmul.f32 %v854_v50, %v816_v60  ;;  %873 = vrot.lane.b32.xlu1 %v865_v32, %s4346_s8  ;;  %3823 = vmatprep.subr.mxu1 %v4326_v0  ;;  %v922_v26 = vmul.f32 %v914_v10, %v816_v60 }
 0xc3d   :  { %3824 = vmatpush3.msra.mxu1 %v4848_v2 }
 0xc3e   :  { %v866_v15 = vsub.f32 1.0, %v862_v63  ;;  %3839 = vmatprep.subr.mxu1 %v4326_v0 }
 0xc3f   :  { %v823_v3 = vpop.permute.xlu1 %822 }
 0xc40   :  { %v863_v6 = vmul.f32 %v858_v1, %v823_v3  ;;  %875 = vrot.lane.b32.xlu0 %v866_v15, %s4346_s8  ;;  %v923_v29 = vmul.f32 %v918_v30, %v823_v3 }
 0xc42   :  { %v867_v9 = vsub.f32 1.0, %v863_v6 }
 0xc43   :  { %v827_v12 = vpop.permute.xlu1 %826 }
 0xc44   :  { %v864_v23 = vmul.f32 %v858_v1, %v827_v12  ;;  %877 = vrot.lane.b32.xlu1 %v867_v9, %s4346_s8  ;;  %v924_v35 = vmul.f32 %v918_v30, %v827_v12 }
 0xc46   :  { %v868_v25 = vsub.f32 1.0, %v864_v23 }
 0xc48   :  { %929 = vrot.lane.b32.xlu1 %v921_v7, %s4347_s6  ;;  %879 = vrot.lane.b32.xlu0 %v868_v25, %s4346_s8 }
 0xc4c   :  { %933 = vrot.lane.b32.xlu1 %v923_v29, %s4347_s6  ;;  %931 = vrot.lane.b32.xlu0 %v922_v26, %s4347_s6 }
 0xc50   :  { %935 = vrot.lane.b32.xlu0 %v924_v35, %s4347_s6 }
 0xcae   :  { %v874_v36 = vpop.permute.xlu1 %873 }
 0xcaf   :  { %v885_v50 = vmul.f32 %v874_v36, %v4551_v41 }
 0xcb2   :  { %v876_v4 = vpop.permute.xlu0 %875 }
 0xcb3   :  { %v886_v25 = vmul.f32 %v876_v4, %v4581_v56 }
 0xcb6   :  { %v878_v39 = vpop.permute.xlu1 %877 }
 0xcb7   :  { %v887_v32 = vmul.f32 %v878_v39, %v4584_v58 }
 0xcba   :  { %v880_v31 = vpop.permute.xlu0 %879  ;;  %v930_v38 = vpop.permute.xlu1 %929 }
 0xcbb   :  { %v4865_v55 = vadd.f32 %v930_v38, %v885_v50  ;;  %v888_v15 = vmul.f32 %v880_v31, %v4567_v47 }
 0xcbd   :  { %v1253_v33 = vadd.f32 1e-16, %v4865_v55 }
 0xcbe   :  { %v932_v60 = vpop.permute.xlu0 %931  ;;  %v934_v62 = vpop.permute.xlu1 %933 }
 0xcbf   :  { %v4869_v63 = vadd.f32 %v934_v62, %v887_v32  ;;  %v1257_v1 = vmul.f32 %v1253_v33, %v1253_v33  ;;  %v4885_v30 = vadd.f32 %v932_v60, %v886_v25 }
 0xcc1   :  { %v1255_v3 = vadd.f32 1e-16, %v4869_v63  ;;  %v1261_v53 = vsel %vm128_vm3, %v1257_v1, 0.0  ;;  %v1254_v26 = vadd.f32 1e-16, %v4885_v30 }
 0xcc2   :  { %v936_v41 = vpop.permute.xlu0 %935  ;;  %1262 = vadd.xlane.f32.xlu0 %v1261_v53 }
 0xcc3   :  { %v4874_v5 = vadd.f32 %v936_v41, %v888_v15  ;;  %v1259_v6 = vmul.f32 %v1255_v3, %v1255_v3  ;;  %v1258_v29 = vmul.f32 %v1254_v26, %v1254_v26 }
 0xcc5   :  { %v1256_v58 = vadd.f32 1e-16, %v4874_v5  ;;  %v1267_v9 = vsel %vm128_vm3, %v1259_v6, 0.0  ;;  %v1264_v35 = vsel %vm128_vm3, %v1258_v29, 0.0 }
 0xcc6   :  { %1268 = vadd.xlane.f32.xlu0 %v1267_v9 }
 0xcc7   :  { %v1260_v12 = vmul.f32 %v1256_v58, %v1256_v58 }
 0xcc9   :  { %v1270_v10 = vsel %vm128_vm3, %v1260_v12, 0.0 }
 0xcca   :  { %1271 = vadd.xlane.f32.xlu0 %v1270_v10 }
 0xcf4   :  { %v1213_v17 = vpop.f32.mrf.mxu1 }
 0xcf5   :  { %v4880_v47 = vadd.f32 %v4574_v51, %v1213_v17 }
 0xcf6   :  { %v3801_v23 = vpop.f32.mrf.mxu1 }
 0xcf7   :  { %v1218_v7 = vrot.slane %v4880_v47, 6 }
 0xcf9   :  { %1219 = vrot.lane.b32.xlu1 %v1218_v7, %s4330_s5 }
 0xd1d   :  { %1265 = vadd.xlane.f32.xlu1 %v1264_v35 }
 0xd6b   :  { %v1220_v36 = vpop.permute.xlu1 %1219 }
 0xd6c   :  { %v4891_v51 = vsel %vm360_vm6, %v4880_v47, %v1220_v36 }
 0xd6d   :  { %v1223_v39 = vadd.f32 1e-16, %v4891_v51 }
 0xd6f   :  { %v1377_v50 = vmul.f32 %v1223_v39, %v1223_v39  ;;  %v1307_v31 = vrot.slane %v1223_v39, %v4596_v8 }
 0xd71   :  { %v1378_v56 = vsel %vm531_vm7, %v1377_v50, 0.0  ;;  %v1315_v4 = vrot.slane %v1307_v31, %v4596_v8  ;;  %v1308_v38 = vcombine.high %v1307_v31, %v1307_v31 }
 0xd72   :  { %1379 = vadd.xlane.f32.xlu0 %v1378_v56 }
 0xd73   :  { %v1328_v32 = vrot.slane %v1315_v4, %v4603_v14  ;;  %v1322_v60 = vrot.slane %v1308_v38, %v4596_v8  ;;  %v1323_v62 = vcombine.high %v1315_v4, %v1315_v4  ;;  %v1263_v4 = vpop.xlane.xlu0 %1262 }
 0xd75   :  { %v1346_v1 = vmul.f32 %v1328_v32, %v1254_v26  ;;  %v1345_v15 = vmul.f32 %v1328_v32, %v1253_v33  ;;  %v1332_v53 = vrot.slane %v1322_v60, %v4603_v14  ;;  %v1336_v41 = vrot.slane %v1323_v62, %v4603_v14 }
 0xd76   :  { %v1324_v6 = vcombine.high %v1322_v60, %v1322_v60  ;;  %v1280_v62 = vrot.slane %v1263_v4, %v4624_v59 }
 0xd77   :  { %v1356_v9 = vsel %vm128_vm3, %v1346_v1, 0.0  ;;  %v1353_v12 = vsel %vm128_vm3, %v1345_v15, 0.0  ;;  %v1348_v10 = vmul.f32 %v1332_v53, %v1256_v58  ;;  %v1347_v17 = vmul.f32 %v1332_v53, %v1255_v3 }
 0xd78   :  { %1357 = vadd.xlane.f32.xlu0 %v1356_v9  ;;  %1354 = vadd.xlane.f32.xlu1 %v1353_v12  ;;  %v1350_v23 = vmul.f32 %v1336_v41, %v1254_v26  ;;  %v1349_v29 = vmul.f32 %v1336_v41, %v1253_v33  ;;  %v1340_v35 = vrot.slane %v1324_v6, %v4603_v14  ;;  %v1269_v33 = vpop.xlane.xlu0 %1268 }
 0xd79   :  { %v1362_v7 = vsel %vm128_vm3, %v1348_v10, 0.0  ;;  %v1359_v25 = vsel %vm128_vm3, %v1347_v17, 0.0 }
 0xd7a   :  { %v1368_v36 = vsel %vm128_vm3, %v1350_v23, 0.0  ;;  %v1365_v39 = vsel %vm128_vm3, %v1349_v29, 0.0  ;;  %v1352_v50 = vmul.f32 %v1340_v35, %v1256_v58  ;;  %v1351_v31 = vmul.f32 %v1340_v35, %v1255_v3 }
 0xd7b   :  { %v1289_v3 = vrot.slane %v1269_v33, %v4624_v59  ;;  %v1225_v35 = vand.u32 2147483647, %v4891_v51 }
 0xd7c   :  { %1363 = vadd.xlane.f32.xlu0 %v1362_v7  ;;  %1360 = vadd.xlane.f32.xlu1 %v1359_v25  ;;  %v1374_v56 = vsel %vm128_vm3, %v1352_v50, 0.0  ;;  %v1371_v26 = vsel %vm128_vm3, %v1351_v31, 0.0  ;;  %v1272_v32 = vpop.xlane.xlu0 %1271 }
 0xd7d   :  { %v1293_v1 = vrot.slane %v1272_v32, %v4621_v57 }
 0xd7f   :  { %v1294_v15 = vsel %vm435_vm8, %v1293_v1, %v1289_v3 }
 0xd80   :  { %1369 = vadd.xlane.f32.xlu0 %v1368_v36  ;;  %1366 = vadd.xlane.f32.xlu1 %v1365_v39  ;;  %v1226_v36 = vsub.f32 0.0, %v1225_v35 }
 0xd82   :  { %v1227_v39 = vmul.f32 1.442695, %v1226_v36 }
 0xd84   :  { %1375 = vadd.xlane.f32.xlu0 %v1374_v56  ;;  %1372 = vadd.xlane.f32.xlu1 %v1371_v26 }
 0xda6   :  { %v1266_v38 = vpop.xlane.xlu1 %1265 }
 0xda7   :  { %v1284_v60 = vrot.slane %v1266_v38, %v4621_v57 }
 0xda9   :  { %v1285_v58 = vsel %vm435_vm8, %v1284_v60, %v1280_v62 }
 0xdaa   :  { %v1295_v53 = vsel %vm446_vm9, %v1294_v15, %v1285_v58  ;;  %v1297_v41 = vsel %vm449_vm10, %v1294_v15, %v1285_v58 }
 0xdab   :  { %v1299_v9 = vsel %vm360_vm6, %v1295_v53, %v1297_v41 }
 0xdfb   :  { %v1380_v6 = vpop.xlane.xlu0 %1379 }
 0xdfc   :  { %v1381_v12 = vmul.f32 %v1380_v6, %v1299_v9 }
 0xdfe   :  { %v1382_v10 = vmax.f32 %v1381_v12, 1e-16 }
 0xe00   :  { %4000 = vrsqrt.f32 %v1382_v10 }
 0xe01   :  { %v1358_v50 = vpop.xlane.xlu0 %1357  ;;  %v1355_v31 = vpop.xlane.xlu1 %1354  ;;  %4002 = vpow2.f32 %v1227_v39 }
 0xe05   :  { %v1364_v56 = vpop.xlane.xlu0 %1363  ;;  %v1361_v26 = vpop.xlane.xlu1 %1360 }
 0xe09   :  { %v1370_v4 = vpop.xlane.xlu0 %1369  ;;  %v1367_v33 = vpop.xlane.xlu1 %1366 }
 0xe0d   :  { %v4001_v17 = vpop.eup %4000  ;;  %v1376_v32 = vpop.xlane.xlu0 %1375 }
 0xe0e   :  { %v1388_v23 = vrot.slane %v4001_v17, %v4603_v14  ;;  %v1410_v7 = vrot.slane %v4001_v17, %v4639_v18  ;;  %v1399_v25 = vrot.slane %v4001_v17, %v4642_v19  ;;  %v1421_v29 = vrot.slane %v4001_v17, %v4647_v22  ;;  %v4003_v38 = vpop.eup %4002  ;;  %v1373_v60 = vpop.xlane.xlu1 %1372 }
 0xe0f   :  { %v1229_v62 = vadd.f32 1.0, %v4003_v38 }
 0xe10   :  { %1394 = vbcast.lane.b32.xlu0 %v1388_v23, 264  ;;  %1390 = vbcast.lane.b32.xlu1 %v1388_v23, 256 }
 0xe11   :  { %4004 = vlog2.f32 %v1229_v62 }
 0xe14   :  { %1416 = vbcast.lane.b32.xlu0 %v1410_v7, 264  ;;  %1401 = vbcast.lane.b32.xlu1 %v1399_v25, 256 }
 0xe18   :  { %1427 = vbcast.lane.b32.xlu0 %v1421_v29, 264  ;;  %1405 = vbcast.lane.b32.xlu1 %v1399_v25, 264 }
 0xe1c   :  { %1412 = vbcast.lane.b32.xlu1 %v1410_v7, 256 }
 0xe1e   :  { %v4005_v25 = vpop.eup %4004 }
 0xe1f   :  { %v1231_v39 = vmul.f32 0.6931472, %v4005_v25 }
 0xe20   :  { %1423 = vbcast.lane.b32.xlu1 %v1421_v29, 256 }
 0xe82   :  { %v1395_v1 = vpop.permute.xlu0 %1394  ;;  %v1391_v3 = vpop.permute.xlu1 %1390 }
 0xe83   :  { %v1438_v58 = vmul.f32 %v1395_v1, %v1358_v50  ;;  %v1437_v15 = vmul.f32 %v1391_v3, %v1355_v31  ;;  %v1224_v50 = vmax.f32 %v4891_v51, 0.0 }
 0xe85   :  { %1462 = vperm.xlu0 %3936, %v1438_v58   ;;  %1459 = vperm.xlu1 %3935, %v1437_v15   ;;  %v4925_v31 = vadd.f32 %v1231_v39, %v1224_v50 }
 0xe86   :  { %v1402_v53 = vpop.permute.xlu1 %1401  ;;  %v1417_v6 = vpop.permute.xlu0 %1416 }
 0xe87   :  { %v1439_v41 = vmul.f32 %v1402_v53, %v1361_v26  ;;  %v1442_v17 = vmul.f32 %v1417_v6, %v1370_v4 }
 0xe89   :  { %1465 = vperm.xlu1 %3935, %v1439_v41  }
 0xe8a   :  { %v1406_v9 = vpop.permute.xlu1 %1405  ;;  %v1428_v7 = vpop.permute.xlu0 %1427 }
 0xe8b   :  { %v1440_v12 = vmul.f32 %v1406_v9, %v1364_v56  ;;  %v1444_v35 = vmul.f32 %v1428_v7, %v1376_v32  ;;  %v1237_v56 = vsel %vm376_vm11, %v4891_v51, -inf }
 0xe8d   :  { %1468 = vperm.xlu1 %3935, %v1440_v12  }
 0xe8e   :  { %v1413_v10 = vpop.permute.xlu1 %1412 }
 0xe8f   :  { %v1441_v23 = vmul.f32 %v1413_v10, %v1367_v33 }
 0xe91   :  { %1474 = vperm.xlu1 %3935, %v1442_v17   ;;  %1471 = vperm.xlu0 %3936, %v1441_v23  }
 0xe92   :  { %v1424_v29 = vpop.permute.xlu1 %1423 }
 0xe93   :  { %v1443_v36 = vmul.f32 %v1424_v29, %v1373_v60 }
 0xe95   :  { %1480 = vperm.xlu1 %3935, %v1444_v35   ;;  %1477 = vperm.xlu0 %3936, %v1443_v36  }
 0xe99   :  { %3937 = vset.pattern.permute.xlu0 %v4333_v11  ;;  %3938 = vset.pattern.permute.xlu1 %v4334_v16 }
 0xe9a   :  { %1447 = vperm.xlu0 %3937, %v4925_v31  }
 0xe9e   :  { %3939 = vset.pattern.permute.xlu0 %v4334_v16 }
 0xeb9   :  { %1238 = vmax.xlane.f32.xlu1 %v1237_v56  ;;  %v1233_v56 = vmul.f32 0.5, %v4891_v51 }
 0xebb   :  { %4006 = vtanh.f32 %v1233_v56 }
 0xf00   :  { %v1460_v26 = vpop.permute.xlu1 %1459  ;;  %v1463_v33 = vpop.permute.xlu0 %1462 }
 0xf01   :  { %v1489_v60 = vrot.slane %v1463_v33, %v4621_v57  ;;  %v1485_v3 = vrot.slane %v1460_v26, %v4624_v59 }
 0xf03   :  { %v1490_v10 = vsel %vm435_vm8, %v1489_v60, %v1485_v3 }
 0xf04   :  { %v1466_v4 = vpop.permute.xlu1 %1465 }
 0xf05   :  { %v1494_v58 = vrot.slane %v1466_v4, %v4624_v59 }
 0xf08   :  { %v1469_v38 = vpop.permute.xlu1 %1468 }
 0xf09   :  { %v1498_v32 = vrot.slane %v1469_v38, %v4621_v57  ;;  %v4007_v38 = vpop.eup %4006 }
 0xf0b   :  { %v1499_v41 = vsel %vm435_vm8, %v1498_v32, %v1494_v58  ;;  %v1235_v32 = vadd.f32 1.0, %v4007_v38 }
 0xf0c   :  { %v1472_v62 = vpop.permute.xlu0 %1471  ;;  %v1475_v1 = vpop.permute.xlu1 %1474  ;;  %v1518_v7 = vsel %vm446_vm9, %v1499_v41, %v1490_v10 }
 0xf0d   :  { %v1503_v15 = vrot.slane %v1472_v62, %v4624_v59  ;;  %v1507_v53 = vrot.slane %v1475_v1, %v4621_v57  ;;  %v1236_v60 = vmul.f32 0.5, %v1235_v32 }
 0xf0f   :  { %v1508_v6 = vsel %vm435_vm8, %v1507_v53, %v1503_v15  ;;  %v1540_v1 = vsub.f32 1.0, %v1236_v60 }
 0xf10   :  { %v1478_v9 = vpop.permute.xlu0 %1477  ;;  %v1481_v12 = vpop.permute.xlu1 %1480  ;;  %v1519_v29 = vsel %vm673_vm12, %v1508_v6, %v1518_v7 }
 0xf11   :  { %v1512_v17 = vrot.slane %v1478_v9, %v4624_v59  ;;  %v1516_v23 = vrot.slane %v1481_v12, %v4621_v57 }
 0xf13   :  { %v1517_v25 = vsel %vm435_vm8, %v1516_v23, %v1512_v17 }
 0xf14   :  { %v1520_v35 = vsel %vm449_vm10, %v1517_v25, %v1519_v29 }
 0xf15   :  { %v1448_v36 = vpop.permute.xlu0 %1447 }
 0xf16   :  { %v1522_v39 = vmul.f32 %v1520_v35, %v1448_v36 }
 0xf18   :  { %v1523_v50 = vsel %vm678_vm13, %v1522_v39, -inf }
 0xf19   :  { %1524 = vmax.xlane.f32.xlu0 %v1523_v50  ;;  %v1252_v50 = vadd.f32 1.0, %v4925_v31 }
 0xf42   :  { %v1239_v26 = vpop.xlane.xlu1 %1238 }
 0xf43   :  { %v1240_v4 = vsub.f32 %v4891_v51, %v1239_v26 }
 0xf45   :  { %v1241_v33 = vmul.f32 1.442695, %v1240_v4 }
 0xf47   :  { %4008 = vpow2.f32 %v1241_v33 }
 0xf54   :  { %v4009_v62 = vpop.eup %4008 }
 0xf55   :  { %1244 = vrot.lane.b32.xlu0 %v4009_v62, %s4335_s25 }
 0xf59   :  { %1543 = vperm.xlu0 %3939, %v1540_v1  }
 0xf5d   :  { %3942 = vset.pattern.permute.xlu0 %v4339_v52 }
 0xfa2   :  { %v1525_v3 = vpop.xlane.xlu0 %1524 }
 0xfa3   :  { %v1526_v58 = vsub.f32 %v1522_v39, %v1525_v3 }
 0xfa5   :  { %v1527_v15 = vmul.f32 1.442695, %v1526_v58 }
 0xfa7   :  { %4010 = vpow2.f32 %v1527_v15 }
 0xfb4   :  { %v4011_v51 = vpop.eup %4010 }
 0xfb5   :  { %v1529_v6 = vsel %vm678_vm13, %v4011_v51, 0.0 }
 0xfc7   :  { %v1245_v53 = vpop.permute.xlu0 %1244 }
 0xfc8   :  { %v1247_v41 = vsel %vm5523_vm14, %v1245_v53, 0.0 }
 0xfc9   :  { %1248 = vadd.xlane.f32.xlu1 %v1247_v41 }
 0xfcd   :  { %1530 = vadd.xlane.f32.xlu1 %v1529_v6 }
 0xfd4   :  { %v1544_v7 = vpop.permute.xlu0 %1543 }
 0xfd5   :  { %v1546_v35 = vmul.f32 %v1544_v7, %v4697_v40 }
 0xfde   :  { %1536 = vperm.xlu1 %3938, %v1236_v60  }
 0xfe2   :  { %3940 = vset.pattern.permute.xlu1 %v4338_v28 }
0x1052   :  { %v1249_v9 = vpop.xlane.xlu1 %1248 }
0x1053   :  { %4012 = vrcp.f32 %v1249_v9 }
0x1056   :  { %v1531_v12 = vpop.xlane.xlu1 %1530 }
0x1057   :  { %4014 = vrcp.f32 %v1531_v12 }
0x105a   :  { %v1537_v29 = vpop.permute.xlu1 %1536 }
0x1060   :  { %v4013_v10 = vpop.eup %4012 }
0x1061   :  { %v1251_v17 = vmul.f32 %v4013_v10, %v4009_v62 }
0x1063   :  { %1576 = vperm.xlu0 %3942, %v1251_v17   ;;  %1565 = vperm.xlu1 %3940, %v1251_v17  }
0x1064   :  { %v4015_v23 = vpop.eup %4014 }
0x1065   :  { %v1533_v25 = vmul.f32 %v4015_v23, %v4011_v51 }
0x1067   :  { %v1539_v36 = vmul.f32 %v1537_v29, %v1533_v25  ;;  %3941 = vset.pattern.permute.xlu1 %v4337_v27  ;;  %3943 = vset.pattern.permute.xlu0 %v4342_v54 }
0x1068   :  { %1570 = vperm.xlu1 %3941, %v1251_v17  }
0x1069   :  { %v1547_v39 = vadd.f32 %v1546_v35, %v1539_v36 }
0x106b   :  { %1556 = vrot.lane.b32.xlu0 %v1547_v39, %s4344_s30 }
0x106c   :  { %1549 = vrot.lane.b32.xlu1 %v1547_v39, %s4341_s28 }
0x106d   :  { %3944 = vset.pattern.permute.xlu1 %v4332_v13 }
0x106f   :  { %1587 = vperm.xlu0 %3943, %v1252_v50  }
0x1070   :  { %1552 = vrot.lane.b32.xlu1 %v1547_v39, %s4340_s27 }
0x1073   :  { %3945 = vset.pattern.permute.xlu0 %v4332_v13 }
0x1074   :  { %1559 = vrot.lane.b32.xlu1 %v1547_v39, %s4343_s0 }
0x10de   :  { %v1566_v40 = vpop.permute.xlu1 %1565  ;;  %v1577_v4 = vpop.permute.xlu0 %1576 }
0x10e2   :  { %v1557_v60 = vpop.permute.xlu0 %1556 }
0x10e3   :  { %v1571_v56 = vpop.permute.xlu1 %1570 }
0x10e4   :  { %v1573_v62 = vmul.f32 %v1571_v56, %v1547_v39 }
0x10e7   :  { %v1550_v26 = vpop.permute.xlu1 %1549 }
0x10ea   :  { %v1588_v6 = vpop.permute.xlu0 %1587 }
0x10eb   :  { %v1553_v33 = vpop.permute.xlu1 %1552 }
0x10ec   :  { %v1555_v38 = vsel %vm5528_vm15, %v1550_v26, %v1553_v33 }
0x10ed   :  { %v1568_v32 = vmul.f32 %v1566_v40, %v1555_v38 }
0x10ef   :  { %v1560_v31 = vpop.permute.xlu1 %1559  ;;  %v1574_v3 = vadd.f32 %v1573_v62, %v1568_v32 }
0x10f0   :  { %v1562_v1 = vsel %vm719_vm1, %v1557_v60, %v1560_v31 }
0x10f1   :  { %v1579_v58 = vmul.f32 %v1577_v4, %v1562_v1 }
0x10f3   :  { %v1580_v15 = vadd.f32 %v1579_v58, %v1574_v3 }
0x10f5   :  { %v1581_v53 = vmax.f32 %v1580_v15, 1e-38  ;;  %vm1584_vm14 = vcmp.gt.f32.partialorder %v1580_v15, 0.0 }
0x10f7   :  { %4016 = vlog2.f32 %v1581_v53 }
0x1104   :  { %v4017_v41 = vpop.eup %4016 }
0x1105   :  { %v1583_v51 = vmul.f32 0.6931472, %v4017_v41 }
0x1107   :  { %v1590_v9 = vmul.f32 %v1588_v6, %v1583_v51 }
0x1109   :  { %v1591_v12 = vmul.f32 1.442695, %v1590_v9 }
0x110b   :  { %4018 = vpow2.f32 %v1591_v12 }
0x1118   :  { %v4019_v10 = vpop.eup %4018 }
0x1119   :  { %v1593_v17 = vsel %vm1584_vm14, %v4019_v10, 0.0  ;;  %vm5529_vm14 = vcmask 19456  }
0x111a   :  { %v1594_v23 = vsel %vm678_vm13, %v1593_v17, 0.0 }
0x111b   :  { %1595 = vadd.xlane.f32.xlu1 %v1594_v23 }
0x11a4   :  { %v1596_v7 = vpop.xlane.xlu1 %1595 }
0x11a5   :  { %v1597_v25 = vadd.f32 1e-16, %v1596_v7 }
0x11a7   :  { %4020 = vrcp.f32 %v1597_v25 }
0x11b4   :  { %v4021_v29 = vpop.eup %4020 }
0x11b5   :  { %v4969_v35 = vmul.f32 %v4021_v29, %v1593_v17 }
0x11b7   :  { %v1603_v36 = vrot.slane %v4969_v35, %v4603_v14  ;;  %v1614_v39 = vrot.slane %v4969_v35, %v4642_v19 }
0x11b9   :  { %1605 = vbcast.lane.b32.xlu0 %v1603_v36, 256 }
0x11bd   :  { %1609 = vbcast.lane.b32.xlu0 %v1603_v36, 264 }
0x11c1   :  { %1616 = vbcast.lane.b32.xlu0 %v1614_v39, 256 }
0x11c5   :  { %1620 = vbcast.lane.b32.xlu0 %v1614_v39, 264 }
0x11c9   :  { %1877 = vrot.lane.b32.xlu0 %v4795_v24, %s4345_s19 }
0x122b   :  { %v1606_v50 = vpop.permute.xlu0 %1605 }
0x122c   :  { %v1622_v40 = vmul.f32 %v1606_v50, %v4865_v55 }
0x122e   :  { %v1626_v4 = vsel %vm128_vm3, %v1622_v40, 0.0 }
0x122f   :  { %v1610_v56 = vpop.permute.xlu0 %1609 }
0x1230   :  { %v1623_v26 = vmul.f32 %v1610_v56, %v4885_v30 }
0x1232   :  { %v1627_v33 = vsel %vm128_vm3, %v1623_v26, 0.0  ;;  %v5028_v26 = vld [vmem:[%s5509_s7] ss:$0 sm:$0xff] }
0x1233   :  { %v1628_v38 = vadd.f32 %v1627_v33, %v1626_v4  ;;  %v1617_v32 = vpop.permute.xlu0 %1616 }
0x1234   :  { %v1624_v62 = vmul.f32 %v1617_v32, %v4869_v63 }
0x1235   :  { %v1629_v60 = vrot.slane %v1628_v38, 4 }
0x1236   :  { %v1635_v24 = vsel %vm128_vm3, %v1624_v62, 0.0 }
0x1237   :  { %v1630_v31 = vadd.f32 %v1629_v60, %v1628_v38  ;;  %v1621_v1 = vpop.permute.xlu0 %1620 }
0x1238   :  { %v1625_v3 = vmul.f32 %v1621_v1, %v4874_v5 }
0x1239   :  { %v1631_v15 = vrot.slane %v1630_v31, 2 }
0x123a   :  { %v1636_v58 = vsel %vm128_vm3, %v1625_v3, 0.0 }
0x123b   :  { %v1637_v53 = vadd.f32 %v1636_v58, %v1635_v24  ;;  %v1632_v51 = vadd.f32 %v1631_v15, %v1630_v31  ;;  %v1878_v29 = vpop.permute.xlu0 %1877 }
0x123d   :  { %v1638_v41 = vrot.slane %v1637_v53, 4  ;;  %v1633_v10 = vrot.slane %v1632_v51, 1 }
0x123f   :  { %v1639_v6 = vadd.f32 %v1638_v41, %v1637_v53  ;;  %v1634_v23 = vadd.f32 %v1633_v10, %v1632_v51 }
0x1241   :  { %v1640_v9 = vrot.slane %v1639_v6, 2 }
0x1243   :  { %v1641_v12 = vadd.f32 %v1640_v9, %v1639_v6 }
0x1245   :  { %v1642_v17 = vrot.slane %v1641_v12, 1 }
0x1247   :  { %v1643_v7 = vadd.f32 %v1642_v17, %v1641_v12 }
0x1249   :  { %v1790_v25 = vsel %vm446_vm9, %v1643_v7, %v1634_v23  ;;  %v1651_v23 = vrot.slane %v4969_v35, %v4639_v18  ;;  %v1644_v7 = vmul.f32 0.5, %v4880_v47 }
0x124a   :  { %v1880_v36 = vsel %vm128_vm3, %v1790_v25, %v1878_v29  ;;  %1791 = vrot.lane.b32.xlu1 %v1790_v25, %s4328_s4 }
0x124b   :  { %3826 = vmatmul.mubr.msk.f32.vlgmr.msra.gmra.mxu1 %vm165_vm4, %v1880_v36 }
0x124c   :  { %3840 = vmatpush3.msra.mxu1 %v4708_v45  ;;  %3849 = vmatprep.mubr.msk.f32.mxu1 %vm4327_vm0, %v4326_v0 }
0x124d   :  { %3841 = vmatprep.subr.mxu1 %v4326_v0 }
0x124e   :  { %3842 = vmatpush3.msra.mxu1 %v4713_v46  ;;  %v5004_v46 = vld [vmem:[#allocation15 + $0x18] sm:$0xff] }
0x124f   :  { %3843 = vmatprep.subr.mxu1 %v4326_v0 }
0x1250   :  { %3844 = vmatpush3.msra.mxu1 %v4720_v49  ;;  %v5010_v49 = vld [vmem:[#allocation15 + $0x10] sm:$0xff] }
0x1251   :  { %3845 = vmatprep.subr.mxu1 %v4326_v0 }
0x1252   :  { %3846 = vmatpush3.msra.mxu1 %v4727_v37  ;;  %v5014_v37 = vld [vmem:[#allocation15 + $0x8] sm:$0xff] }
0x1253   :  { %3847 = vmatprep.subr.mxu1 %v4326_v0 }
0x1254   :  { %3848 = vmatpush3.msra.mxu1 %v4744_v21  ;;  %v5018_v21 = vld [vmem:[#allocation15] sm:$0xff] }
0x1255   :  { %3865 = vmatprep.subr.mxu1 %v4326_v0 }
0x12bc   :  { %v1792_v45 = vpop.permute.xlu1 %1791 }
0x12bd   :  { %v1794_v39 = vsel %vm282_vm5, %v4806_v43, %v1792_v45  ;;  %v3665_v43 = vld [vmem:[%s5527_s29 + $0x4] sm:$0x3] }
0x12be   :  { %3813 = vmatmul.mubr.msk.f32.vlgmr.msra.gmra.mxu0 %vm165_vm4, %v1794_v39 }
0x12bf   :  { %3829 = vmatpush3.msra.mxu0 %v5004_v46  ;;  %3836 = vmatprep.mubr.msk.f32.mxu0 %vm4327_vm0, %v4326_v0 }
0x12c0   :  { %3830 = vmatprep.subr.mxu0 %v4326_v0 }
0x12c1   :  { %3831 = vmatpush3.msra.mxu0 %v5010_v49 }
0x12c2   :  { %3832 = vmatprep.subr.mxu0 %v4326_v0 }
0x12c3   :  { %3833 = vmatpush3.msra.mxu0 %v5014_v37 }
0x12c4   :  { %3834 = vmatprep.subr.mxu0 %v4326_v0 }
0x12c5   :  { %3835 = vmatpush3.msra.mxu0 %v5018_v21 }
0x12c6   :  { %3852 = vmatprep.subr.mxu0 %v4326_v0 }
0x130b   :  { %v1950_v50 = vpop.f32.mrf.mxu1 }
0x130c   :  { %v1954_v40 = vadd.f32 %v3665_v43, %v1950_v50 }
0x130d   :  { %v3827_v56 = vpop.f32.mrf.mxu1 }
0x130e   :  { %v1955_v4 = vadd.f32 %v5028_v26, %v1954_v40 }
0x1310   :  { %4022 = vtanh.f32 %v1955_v4  ;;  %v1956_v38 = vmul.f32 0.5, %v1955_v4 }
0x1312   :  { %4024 = vtanh.f32 %v1956_v38 }
0x131d   :  { %v4023_v33 = vpop.eup %4022 }
0x131e   :  { %1963 = vrot.lane.b32.xlu0 %v4023_v33, %s4329_s18 }
0x131f   :  { %v4025_v1 = vpop.eup %4024 }
0x1320   :  { %v1958_v3 = vadd.f32 1.0, %v4025_v1 }
0x1322   :  { %v1959_v24 = vmul.f32 0.5, %v1958_v3 }
0x1324   :  { %v1961_v6 = vmul.f32 %v1959_v24, %v4791_v20  ;;  %v1662_v20 = vrot.slane %v4969_v35, %v4647_v22 }
0x137e   :  { %v1864_v32 = vpop.f32.mrf.mxu0 }
0x137f   :  { %v1865_v60 = vadd.f32 %v4785_v34, %v1864_v32  ;;  %v1737_v32 = vrot.slane %v4880_v47, %v4596_v8 }
0x1380   :  { %v3814_v62 = vpop.f32.mrf.mxu0 }
0x1381   :  { %v1868_v31 = vmul.f32 0.5, %v1865_v60  ;;  %v1738_v1 = vcombine.high %v1737_v32, %v1737_v32 }
0x1383   :  { %4026 = vtanh.f32 %v1868_v31  ;;  %v1745_v31 = vrot.slane %v1737_v32, %v4596_v8 }
0x1390   :  { %v4027_v58 = vpop.eup %4026  ;;  %v1964_v15 = vpop.permute.xlu0 %1963 }
0x1391   :  { %v1870_v53 = vadd.f32 1.0, %v4027_v58  ;;  %v1966_v41 = vmul.f32 %v1964_v15, %v1959_v24  ;;  %v1752_v58 = vrot.slane %v1738_v1, %v4596_v8 }
0x1393   :  { %v1871_v51 = vmul.f32 0.5, %v1870_v53  ;;  %1968 = vrot.lane.b32.xlu0 %v1966_v41, %s4328_s4  ;;  %v1760_v41 = vrot.slane %v1752_v58, %v4603_v14 }
0x1395   :  { %1873 = vst.msk [vmem:[#allocation16 + $0x2] sm:$0x3] %vm115_vm2, %v1871_v51 }
0x1405   :  { %v1969_v9 = vpop.permute.xlu0 %1968 }
0x1406   :  { %v5036_v12 = vadd.f32 %v1969_v9, %v1961_v6 }
0x1408   :  { %4028 = vtanh.f32 %v5036_v12 }
0x1409   :  { %4030 = vtanh.f32 %v1644_v7 }
0x1415   :  { %v4029_v34 = vpop.eup %4028 }
0x1416   :  { %1974 = vrot.lane.b32.xlu0 %v4029_v34, %s4329_s18  ;;  %v4031_v25 = vpop.eup %4030 }
0x1417   :  { %v1646_v29 = vadd.f32 1.0, %v4031_v25 }
0x1419   :  { %v1647_v36 = vmul.f32 0.5, %v1646_v29 }
0x141b   :  { %v1677_v45 = vrot.slane %v1647_v36, %v4596_v8 }
0x141d   :  { %v1685_v39 = vrot.slane %v1677_v45, %v4596_v8  ;;  %v1678_v40 = vcombine.high %v1677_v45, %v1677_v45 }
0x141f   :  { %v1696_v50 = vrot.slane %v1685_v39, %v4603_v14  ;;  %v1692_v38 = vrot.slane %v1678_v40, %v4596_v8 }
0x1488   :  { %v1975_v10 = vpop.permute.xlu0 %1974 }
0x1489   :  { %v5040_v17 = vmul.f32 %v1975_v10, %v1959_v24  ;;  %v1756_v24 = vrot.slane %v1745_v31, %v4603_v14 }
0x148b   :  { %1979 = vrot.lane.b32.xlu0 %v5040_v17, %s4328_s4 }
0x148f   :  { %1653 = vbcast.lane.b32.xlu0 %v1651_v23, 256 }
0x1493   :  { %1657 = vbcast.lane.b32.xlu0 %v1651_v23, 264 }
0x1497   :  { %1664 = vbcast.lane.b32.xlu0 %v1662_v20, 256 }
0x149b   :  { %1668 = vbcast.lane.b32.xlu0 %v1662_v20, 264 }
0x14fd   :  { %v5051_v43 = vpop.permute.xlu0 %1979 }
0x14fe   :  { %3837 = vmatmul.mubr.msk.f32.vlgmr.msra.gmra.mxu0 %vm282_vm5, %v5051_v43 }
0x14ff   :  { %3853 = vmatpush3.msra.mxu0 %v4813_v44  ;;  %3862 = vmatprep.mubr.msk.f32.mxu0 %vm4327_vm0, %v4326_v0 }
0x1500   :  { %3854 = vmatprep.subr.mxu0 %v4326_v0 }
0x1501   :  { %v1654_v56 = vpop.permute.xlu0 %1653  ;;  %3855 = vmatpush3.msra.mxu0 %v4823_v42 }
0x1502   :  { %v1703_v4 = vmul.f32 %v1696_v50, %v1654_v56  ;;  %3856 = vmatprep.subr.mxu0 %v4326_v0 }
0x1503   :  { %3857 = vmatpush3.msra.mxu0 %v4830_v48  ;;  %v1700_v48 = vrot.slane %v1692_v38, %v4603_v14 }
0x1504   :  { %v1707_v33 = vsub.f32 1.0, %v1703_v4  ;;  %3858 = vmatprep.subr.mxu0 %v4326_v0 }
0x1505   :  { %v1658_v44 = vpop.permute.xlu0 %1657  ;;  %3859 = vmatpush3.msra.mxu0 %v4838_v61 }
0x1506   :  { %v1704_v60 = vmul.f32 %v1696_v50, %v1658_v44  ;;  %1715 = vrot.lane.b32.xlu1 %v1707_v33, %s4346_s8  ;;  %3860 = vmatprep.subr.mxu0 %v4326_v0  ;;  %v1764_v51 = vmul.f32 %v1756_v24, %v1658_v44 }
0x1507   :  { %3861 = vmatpush3.msra.mxu0 %v4848_v2  ;;  %v1763_v2 = vmul.f32 %v1756_v24, %v1654_v56 }
0x1508   :  { %v1708_v42 = vsub.f32 1.0, %v1704_v60  ;;  %3876 = vmatprep.subr.mxu0 %v4326_v0 }
0x1509   :  { %v1665_v62 = vpop.permute.xlu0 %1664 }
0x150a   :  { %v1705_v61 = vmul.f32 %v1700_v48, %v1665_v62  ;;  %1717 = vrot.lane.b32.xlu0 %v1708_v42, %s4346_s8  ;;  %v1765_v6 = vmul.f32 %v1760_v41, %v1665_v62 }
0x150c   :  { %v1709_v47 = vsub.f32 1.0, %v1705_v61 }
0x150d   :  { %v1669_v3 = vpop.permute.xlu0 %1668 }
0x150e   :  { %v1706_v15 = vmul.f32 %v1700_v48, %v1669_v3  ;;  %1719 = vrot.lane.b32.xlu1 %v1709_v47, %s4346_s8  ;;  %v1766_v9 = vmul.f32 %v1760_v41, %v1669_v3 }
0x1510   :  { %v1710_v53 = vsub.f32 1.0, %v1706_v15 }
0x1512   :  { %1771 = vrot.lane.b32.xlu1 %v1763_v2, %s4347_s6  ;;  %1721 = vrot.lane.b32.xlu0 %v1710_v53, %s4346_s8 }
0x1516   :  { %1775 = vrot.lane.b32.xlu1 %v1765_v6, %s4347_s6  ;;  %1773 = vrot.lane.b32.xlu0 %v1764_v51, %s4347_s6 }
0x151a   :  { %1777 = vrot.lane.b32.xlu0 %v1766_v9, %s4347_s6 }
0x1578   :  { %v1716_v34 = vpop.permute.xlu1 %1715 }
0x1579   :  { %v1727_v20 = vmul.f32 %v1716_v34, %v4865_v55 }
0x157c   :  { %v1718_v10 = vpop.permute.xlu0 %1717 }
0x157d   :  { %v1728_v47 = vmul.f32 %v1718_v10, %v4885_v30 }
0x1580   :  { %v1720_v23 = vpop.permute.xlu1 %1719 }
0x1581   :  { %v1729_v36 = vmul.f32 %v1720_v23, %v4869_v63 }
0x1584   :  { %v1772_v7 = vpop.permute.xlu1 %1771  ;;  %v1722_v25 = vpop.permute.xlu0 %1721 }
0x1585   :  { %v5085_v29 = vadd.f32 %v1772_v7, %v1727_v20  ;;  %v1730_v4 = vmul.f32 %v1722_v25, %v4874_v5  ;;  %v5102_v5 = vld [vmem:[%s5511_s9] ss:$0 sm:$0xff] }
0x1587   :  { %v2089_v45 = vadd.f32 1e-16, %v5085_v29 }
0x1588   :  { %v1776_v39 = vpop.permute.xlu1 %1775  ;;  %v1774_v50 = vpop.permute.xlu0 %1773 }
0x1589   :  { %v5089_v40 = vadd.f32 %v1776_v39, %v1729_v36  ;;  %v2093_v56 = vmul.f32 %v2089_v45, %v2089_v45  ;;  %v5110_v3 = vadd.f32 %v1774_v50, %v1728_v47 }
0x158b   :  { %v2091_v33 = vadd.f32 1e-16, %v5089_v40  ;;  %v2097_v38 = vsel %vm128_vm3, %v2093_v56, 0.0  ;;  %v2090_v24 = vadd.f32 1e-16, %v5110_v3 }
0x158c   :  { %2098 = vadd.xlane.f32.xlu0 %v2097_v38  ;;  %v1778_v55 = vpop.permute.xlu0 %1777 }
0x158d   :  { %v5094_v44 = vadd.f32 %v1778_v55, %v1730_v4  ;;  %v2095_v32 = vmul.f32 %v2091_v33, %v2091_v33  ;;  %v2094_v58 = vmul.f32 %v2090_v24, %v2090_v24 }
0x158f   :  { %v2092_v63 = vadd.f32 1e-16, %v5094_v44  ;;  %v2103_v60 = vsel %vm128_vm3, %v2095_v32, 0.0  ;;  %v2100_v15 = vsel %vm128_vm3, %v2094_v58, 0.0 }
0x1590   :  { %2104 = vadd.xlane.f32.xlu0 %v2103_v60 }
0x1591   :  { %v2096_v42 = vmul.f32 %v2092_v63, %v2092_v63 }
0x1593   :  { %v2106_v48 = vsel %vm128_vm3, %v2096_v42, 0.0 }
0x1594   :  { %2107 = vadd.xlane.f32.xlu0 %v2106_v48 }
0x15be   :  { %v2049_v62 = vpop.f32.mrf.mxu0 }
0x15bf   :  { %v5105_v31 = vadd.f32 %v5102_v5, %v2049_v62 }
0x15c0   :  { %v3838_v1 = vpop.f32.mrf.mxu0 }
0x15c1   :  { %v2054_v61 = vrot.slane %v5105_v31, 6 }
0x15c3   :  { %2055 = vrot.lane.b32.xlu1 %v2054_v61, %s4330_s5 }
0x15e7   :  { %2101 = vadd.xlane.f32.xlu1 %v2100_v15 }
0x1635   :  { %v2056_v2 = vpop.permute.xlu1 %2055 }
0x1636   :  { %v5116_v53 = vsel %vm360_vm6, %v5105_v31, %v2056_v2  ;;  %v2099_v2 = vpop.xlane.xlu0 %2098 }
0x1637   :  { %v2059_v41 = vadd.f32 1e-16, %v5116_v53 }
0x1639   :  { %v2213_v51 = vmul.f32 %v2059_v41, %v2059_v41  ;;  %v2143_v6 = vrot.slane %v2059_v41, %v4596_v8 }
0x163b   :  { %v2214_v30 = vsel %vm531_vm7, %v2213_v51, 0.0  ;;  %v2151_v9 = vrot.slane %v2143_v6, %v4596_v8  ;;  %v2144_v34 = vcombine.high %v2143_v6, %v2143_v6 }
0x163c   :  { %2215 = vadd.xlane.f32.xlu1 %v2214_v30  ;;  %v2116_v30 = vrot.slane %v2099_v2, %v4624_v59 }
0x163d   :  { %v2164_v10 = vrot.slane %v2151_v9, %v4603_v14  ;;  %v2158_v23 = vrot.slane %v2144_v34, %v4596_v8  ;;  %v2159_v20 = vcombine.high %v2151_v9, %v2151_v9 }
0x163f   :  { %v2182_v7 = vmul.f32 %v2164_v10, %v2090_v24  ;;  %v2181_v25 = vmul.f32 %v2164_v10, %v2089_v45  ;;  %v2168_v36 = vrot.slane %v2158_v23, %v4603_v14  ;;  %v2172_v39 = vrot.slane %v2159_v20, %v4603_v14 }
0x1640   :  { %v2160_v50 = vcombine.high %v2158_v23, %v2158_v23 }
0x1641   :  { %v2192_v56 = vsel %vm128_vm3, %v2182_v7, 0.0  ;;  %v2189_v4 = vsel %vm128_vm3, %v2181_v25, 0.0  ;;  %v2184_v38 = vmul.f32 %v2168_v36, %v2092_v63  ;;  %v2183_v55 = vmul.f32 %v2168_v36, %v2091_v33 }
0x1642   :  { %2193 = vadd.xlane.f32.xlu1 %v2192_v56  ;;  %2190 = vadd.xlane.f32.xlu0 %v2189_v4  ;;  %v2186_v32 = vmul.f32 %v2172_v39, %v2090_v24  ;;  %v2185_v48 = vmul.f32 %v2172_v39, %v2089_v45  ;;  %v2176_v62 = vrot.slane %v2160_v50, %v4603_v14  ;;  %v2105_v45 = vpop.xlane.xlu0 %2104 }
0x1643   :  { %v2198_v60 = vsel %vm128_vm3, %v2184_v38, 0.0  ;;  %v2195_v42 = vsel %vm128_vm3, %v2183_v55, 0.0  ;;  %v2061_v55 = vand.u32 2147483647, %v5116_v53 }
0x1644   :  { %v2204_v1 = vsel %vm128_vm3, %v2186_v32, 0.0  ;;  %v2201_v61 = vsel %vm128_vm3, %v2185_v48, 0.0  ;;  %v2188_v47 = vmul.f32 %v2176_v62, %v2092_v63  ;;  %v2187_v58 = vmul.f32 %v2176_v62, %v2091_v33 }
0x1645   :  { %v2125_v33 = vrot.slane %v2105_v45, %v4624_v59  ;;  %v2062_v32 = vsub.f32 0.0, %v2061_v55  ;;  %v2073_v55 = vsel %vm376_vm11, %v5116_v53, -inf }
0x1646   :  { %2199 = vadd.xlane.f32.xlu1 %v2198_v60  ;;  %2196 = vadd.xlane.f32.xlu0 %v2195_v42  ;;  %v2210_v15 = vsel %vm128_vm3, %v2188_v47, 0.0  ;;  %v2207_v24 = vsel %vm128_vm3, %v2187_v58, 0.0  ;;  %v2108_v51 = vpop.xlane.xlu0 %2107 }
0x1647   :  { %v2129_v9 = vrot.slane %v2108_v51, %v4621_v57  ;;  %v2063_v60 = vmul.f32 1.442695, %v2062_v32 }
0x1649   :  { %v2130_v34 = vsel %vm435_vm8, %v2129_v9, %v2125_v33 }
0x164a   :  { %2205 = vadd.xlane.f32.xlu1 %v2204_v1  ;;  %2202 = vadd.xlane.f32.xlu0 %v2201_v61 }
0x164e   :  { %2211 = vadd.xlane.f32.xlu1 %v2210_v15  ;;  %2208 = vadd.xlane.f32.xlu0 %v2207_v24 }
0x1670   :  { %v2102_v41 = vpop.xlane.xlu1 %2101 }
0x1671   :  { %v2120_v6 = vrot.slane %v2102_v41, %v4621_v57 }
0x1673   :  { %v2121_v63 = vsel %vm435_vm8, %v2120_v6, %v2116_v30 }
0x1674   :  { %v2131_v10 = vsel %vm446_vm9, %v2130_v34, %v2121_v63  ;;  %v2133_v23 = vsel %vm449_vm10, %v2130_v34, %v2121_v63 }
0x1675   :  { %v2135_v20 = vsel %vm360_vm6, %v2131_v10, %v2133_v23 }
0x16c5   :  { %v2216_v7 = vpop.xlane.xlu1 %2215 }
0x16c6   :  { %v2217_v25 = vmul.f32 %v2216_v7, %v2135_v20 }
0x16c8   :  { %v2218_v36 = vmax.f32 %v2217_v25, 1e-16 }
0x16ca   :  { %4032 = vrsqrt.f32 %v2218_v36 }
0x16cb   :  { %4034 = vpow2.f32 %v2063_v60  ;;  %v2191_v42 = vpop.xlane.xlu0 %2190  ;;  %v2194_v48 = vpop.xlane.xlu1 %2193 }
0x16cf   :  { %v2197_v62 = vpop.xlane.xlu0 %2196  ;;  %v2200_v1 = vpop.xlane.xlu1 %2199 }
0x16d3   :  { %v2203_v61 = vpop.xlane.xlu0 %2202  ;;  %v2206_v47 = vpop.xlane.xlu1 %2205 }
0x16d7   :  { %v4033_v39 = vpop.eup %4032  ;;  %v2209_v24 = vpop.xlane.xlu0 %2208 }
0x16d8   :  { %v2224_v50 = vrot.slane %v4033_v39, %v4603_v14  ;;  %v2235_v56 = vrot.slane %v4033_v39, %v4642_v19  ;;  %v2246_v4 = vrot.slane %v4033_v39, %v4639_v18  ;;  %v2257_v38 = vrot.slane %v4033_v39, %v4647_v22  ;;  %v4035_v58 = vpop.eup %4034  ;;  %v2212_v2 = vpop.xlane.xlu1 %2211 }
0x16d9   :  { %v2065_v15 = vadd.f32 1.0, %v4035_v58 }
0x16da   :  { %2230 = vbcast.lane.b32.xlu1 %v2224_v50, 264  ;;  %2226 = vbcast.lane.b32.xlu0 %v2224_v50, 256 }
0x16db   :  { %4036 = vlog2.f32 %v2065_v15 }
0x16de   :  { %2237 = vbcast.lane.b32.xlu1 %v2235_v56, 256  ;;  %2241 = vbcast.lane.b32.xlu0 %v2235_v56, 264  ;;  %v2060_v56 = vmax.f32 %v5116_v53, 0.0 }
0x16e2   :  { %2248 = vbcast.lane.b32.xlu1 %v2246_v4, 256  ;;  %2252 = vbcast.lane.b32.xlu0 %v2246_v4, 264 }
0x16e6   :  { %2259 = vbcast.lane.b32.xlu1 %v2257_v38, 256  ;;  %2263 = vbcast.lane.b32.xlu0 %v2257_v38, 264 }
0x16e8   :  { %v4037_v20 = vpop.eup %4036 }
0x16e9   :  { %v2067_v50 = vmul.f32 0.6931472, %v4037_v20 }
0x16eb   :  { %v5150_v38 = vadd.f32 %v2067_v50, %v2060_v56 }
0x174c   :  { %v2227_v45 = vpop.permute.xlu0 %2226  ;;  %v2231_v41 = vpop.permute.xlu1 %2230 }
0x174d   :  { %v2273_v51 = vmul.f32 %v2227_v45, %v2191_v42  ;;  %v2274_v6 = vmul.f32 %v2231_v41, %v2194_v48 }
0x174f   :  { %2295 = vperm.xlu1 %3944, %v2273_v51   ;;  %2298 = vperm.xlu0 %3945, %v2274_v6  }
0x1750   :  { %v2242_v30 = vpop.permute.xlu0 %2241  ;;  %v2238_v9 = vpop.permute.xlu1 %2237 }
0x1751   :  { %v2275_v33 = vmul.f32 %v2238_v9, %v2197_v62  ;;  %v2276_v10 = vmul.f32 %v2242_v30, %v2200_v1 }
0x1753   :  { %2301 = vperm.xlu1 %3944, %v2275_v33  }
0x1754   :  { %v2253_v63 = vpop.permute.xlu0 %2252  ;;  %v2249_v34 = vpop.permute.xlu1 %2248 }
0x1755   :  { %v2277_v23 = vmul.f32 %v2249_v34, %v2203_v61  ;;  %v2278_v25 = vmul.f32 %v2253_v63, %v2206_v47 }
0x1757   :  { %2304 = vperm.xlu1 %3944, %v2276_v10   ;;  %2307 = vperm.xlu0 %3945, %v2277_v23  }
0x1758   :  { %v2260_v7 = vpop.permute.xlu1 %2259  ;;  %v2264_v39 = vpop.permute.xlu0 %2263 }
0x1759   :  { %v2279_v36 = vmul.f32 %v2260_v7, %v2209_v24  ;;  %v2280_v4 = vmul.f32 %v2264_v39, %v2212_v2 }
0x175b   :  { %2310 = vperm.xlu1 %3944, %v2278_v25   ;;  %2313 = vperm.xlu0 %3945, %v2279_v36   ;;  %v2069_v36 = vmul.f32 0.5, %v5116_v53 }
0x175d   :  { %4038 = vtanh.f32 %v2069_v36 }
0x175f   :  { %2316 = vperm.xlu1 %3944, %v2280_v4   ;;  %3946 = vset.pattern.permute.xlu0 %v4333_v11 }
0x1760   :  { %2283 = vperm.xlu0 %3946, %v5150_v38  }
0x1763   :  { %3948 = vset.pattern.permute.xlu1 %v4334_v16 }
0x1764   :  { %3947 = vset.pattern.permute.xlu0 %v4334_v16 }
0x176a   :  { %v4039_v4 = vpop.eup %4038 }
0x1783   :  { %2074 = vmax.xlane.f32.xlu1 %v2073_v55  ;;  %v2071_v55 = vadd.f32 1.0, %v4039_v4 }
0x17ca   :  { %v2296_v32 = vpop.permute.xlu1 %2295  ;;  %v2299_v60 = vpop.permute.xlu0 %2298 }
0x17cb   :  { %v2325_v47 = vrot.slane %v2299_v60, %v4621_v57  ;;  %v2321_v58 = vrot.slane %v2296_v32, %v4624_v59  ;;  %v2072_v32 = vmul.f32 0.5, %v2071_v55 }
0x17cd   :  { %v2326_v30 = vsel %vm435_vm8, %v2325_v47, %v2321_v58 }
0x17ce   :  { %v2302_v42 = vpop.permute.xlu1 %2301 }
0x17cf   :  { %v2330_v15 = vrot.slane %v2302_v42, %v4624_v59  ;;  %v2376_v42 = vsub.f32 1.0, %v2072_v32 }
0x17d2   :  { %v2308_v48 = vpop.permute.xlu0 %2307  ;;  %v2305_v62 = vpop.permute.xlu1 %2304 }
0x17d3   :  { %v2334_v1 = vrot.slane %v2305_v62, %v4621_v57  ;;  %v2339_v2 = vrot.slane %v2308_v48, %v4624_v59 }
0x17d5   :  { %v2335_v41 = vsel %vm435_vm8, %v2334_v1, %v2330_v15 }
0x17d6   :  { %v2311_v61 = vpop.permute.xlu1 %2310  ;;  %v2314_v45 = vpop.permute.xlu0 %2313  ;;  %v2354_v63 = vsel %vm446_vm9, %v2335_v41, %v2326_v30 }
0x17d7   :  { %v2343_v24 = vrot.slane %v2311_v61, %v4621_v57  ;;  %v2348_v9 = vrot.slane %v2314_v45, %v4624_v59 }
0x17d9   :  { %v2344_v51 = vsel %vm435_vm8, %v2343_v24, %v2339_v2 }
0x17da   :  { %v2317_v6 = vpop.permute.xlu1 %2316  ;;  %v2355_v10 = vsel %vm673_vm12, %v2344_v51, %v2354_v63 }
0x17db   :  { %v2352_v33 = vrot.slane %v2317_v6, %v4621_v57  ;;  %v2284_v23 = vpop.permute.xlu0 %2283 }
0x17dd   :  { %v2353_v34 = vsel %vm435_vm8, %v2352_v33, %v2348_v9 }
0x17de   :  { %v2356_v20 = vsel %vm449_vm10, %v2353_v34, %v2355_v10  ;;  %v2088_v34 = vadd.f32 1.0, %v5150_v38 }
0x17df   :  { %v2358_v7 = vmul.f32 %v2356_v20, %v2284_v23 }
0x17e1   :  { %v2359_v25 = vsel %vm678_vm13, %v2358_v7, -inf }
0x17e2   :  { %2360 = vmax.xlane.f32.xlu0 %v2359_v25 }
0x180c   :  { %v2075_v39 = vpop.xlane.xlu1 %2074 }
0x180d   :  { %v2076_v50 = vsub.f32 %v5116_v53, %v2075_v39 }
0x180f   :  { %v2077_v56 = vmul.f32 1.442695, %v2076_v50 }
0x1811   :  { %4040 = vpow2.f32 %v2077_v56 }
0x181e   :  { %v4041_v60 = vpop.eup %4040 }
0x181f   :  { %2080 = vrot.lane.b32.xlu1 %v4041_v60, %s4335_s25 }
0x1823   :  { %2379 = vperm.xlu1 %3948, %v2376_v42  }
0x1827   :  { %3949 = vset.pattern.permute.xlu1 %v4338_v28 }
0x186b   :  { %v2361_v48 = vpop.xlane.xlu0 %2360 }
0x186c   :  { %v2362_v62 = vsub.f32 %v2358_v7, %v2361_v48 }
0x186e   :  { %v2363_v1 = vmul.f32 1.442695, %v2362_v62 }
0x1870   :  { %4042 = vpow2.f32 %v2363_v1 }
0x187d   :  { %v4043_v53 = vpop.eup %4042 }
0x187e   :  { %v2365_v58 = vsel %vm678_vm13, %v4043_v53, 0.0 }
0x1891   :  { %v2081_v61 = vpop.permute.xlu1 %2080 }
0x1892   :  { %v2083_v47 = vsel %vm5529_vm14, %v2081_v61, 0.0 }
0x1893   :  { %2084 = vadd.xlane.f32.xlu0 %v2083_v47 }
0x1897   :  { %2366 = vadd.xlane.f32.xlu0 %v2365_v58 }
0x189e   :  { %v2380_v6 = vpop.permute.xlu1 %2379 }
0x189f   :  { %v2382_v33 = vmul.f32 %v2380_v6, %v4969_v35 }
0x18ad   :  { %2372 = vperm.xlu0 %3947, %v2072_v32  }
0x18b1   :  { %3954 = vset.pattern.permute.xlu0 %v4332_v13 }
0x191c   :  { %v2085_v15 = vpop.xlane.xlu0 %2084 }
0x191d   :  { %4044 = vrcp.f32 %v2085_v15 }
0x1920   :  { %v2367_v24 = vpop.xlane.xlu0 %2366 }
0x1921   :  { %4046 = vrcp.f32 %v2367_v24 }
0x1928   :  { %v2373_v30 = vpop.permute.xlu0 %2372 }
0x192a   :  { %v4045_v2 = vpop.eup %4044 }
0x192b   :  { %v2087_v45 = vmul.f32 %v4045_v2, %v4041_v60 }
0x192d   :  { %2401 = vperm.xlu1 %3949, %v2087_v45  }
0x192e   :  { %v4047_v41 = vpop.eup %4046 }
0x192f   :  { %v2369_v51 = vmul.f32 %v4047_v41, %v4043_v53 }
0x1931   :  { %3950 = vset.pattern.permute.xlu1 %v4337_v27  ;;  %v2375_v9 = vmul.f32 %v2373_v30, %v2369_v51 }
0x1932   :  { %2406 = vperm.xlu1 %3950, %v2087_v45  }
0x1933   :  { %v2383_v63 = vadd.f32 %v2382_v33, %v2375_v9 }
0x1936   :  { %3951 = vset.pattern.permute.xlu1 %v4339_v52 }
0x1937   :  { %2412 = vperm.xlu1 %3951, %v2087_v45  }
0x193b   :  { %2385 = vrot.lane.b32.xlu1 %v2383_v63, %s4341_s28 }
0x193c   :  { %3952 = vset.pattern.permute.xlu1 %v4342_v54 }
0x193f   :  { %2388 = vrot.lane.b32.xlu1 %v2383_v63, %s4340_s27 }
0x1943   :  { %2392 = vrot.lane.b32.xlu1 %v2383_v63, %s4344_s30 }
0x1947   :  { %2395 = vrot.lane.b32.xlu1 %v2383_v63, %s4343_s0 }
0x194b   :  { %2423 = vperm.xlu1 %3952, %v2088_v34  }
0x194f   :  { %3953 = vset.pattern.permute.xlu1 %v4332_v13 }
0x19a8   :  { %v2402_v10 = vpop.permute.xlu1 %2401 }
0x19ad   :  { %v2407_v23 = vpop.permute.xlu1 %2406 }
0x19ae   :  { %v2409_v50 = vmul.f32 %v2407_v23, %v2383_v63 }
0x19b2   :  { %v2413_v35 = vpop.permute.xlu1 %2412 }
0x19b6   :  { %v2386_v20 = vpop.permute.xlu1 %2385 }
0x19ba   :  { %v2389_v7 = vpop.permute.xlu1 %2388 }
0x19bb   :  { %v2391_v25 = vsel %vm5528_vm15, %v2386_v20, %v2389_v7 }
0x19bc   :  { %v2404_v39 = vmul.f32 %v2402_v10, %v2391_v25 }
0x19be   :  { %v2393_v36 = vpop.permute.xlu1 %2392  ;;  %v2410_v55 = vadd.f32 %v2409_v50, %v2404_v39 }
0x19c2   :  { %v2396_v56 = vpop.permute.xlu1 %2395 }
0x19c3   :  { %v2398_v4 = vsel %vm719_vm1, %v2393_v36, %v2396_v56 }
0x19c4   :  { %v2415_v32 = vmul.f32 %v2413_v35, %v2398_v4 }
0x19c6   :  { %v2416_v60 = vadd.f32 %v2415_v32, %v2410_v55  ;;  %v2424_v48 = vpop.permute.xlu1 %2423 }
0x19c8   :  { %v2417_v38 = vmax.f32 %v2416_v60, 1e-38  ;;  %vm2420_vm14 = vcmp.gt.f32.partialorder %v2416_v60, 0.0 }
0x19ca   :  { %4048 = vlog2.f32 %v2417_v38 }
0x19d7   :  { %v4049_v42 = vpop.eup %4048 }
0x19d8   :  { %v2419_v13 = vmul.f32 0.6931472, %v4049_v42 }
0x19da   :  { %v2426_v62 = vmul.f32 %v2424_v48, %v2419_v13 }
0x19dc   :  { %v2427_v1 = vmul.f32 1.442695, %v2426_v62 }
0x19de   :  { %4050 = vpow2.f32 %v2427_v1 }
0x19eb   :  { %v4051_v61 = vpop.eup %4050 }
0x19ec   :  { %v2429_v47 = vsel %vm2420_vm14, %v4051_v61, 0.0 }
0x19ed   :  { %v2430_v53 = vsel %vm678_vm13, %v2429_v47, 0.0 }
0x19ee   :  { %2431 = vadd.xlane.f32.xlu1 %v2430_v53  ;;  %v4102_v53 = vld [vmem:[%s5512_s10 + $0x18] sm:$0xff] }
0x1a77   :  { %v2432_v58 = vpop.xlane.xlu1 %2431 }
0x1a78   :  { %v2433_v15 = vadd.f32 1e-16, %v2432_v58  ;;  %v4103_v58 = vld [vmem:[%s5512_s10 + $0x10] sm:$0xff] }
0x1a7a   :  { %4052 = vrcp.f32 %v2433_v15  ;;  %v4104_v15 = vld [vmem:[%s5512_s10 + $0x8] sm:$0xff] }
0x1a87   :  { %v4053_v24 = vpop.eup %4052 }
0x1a88   :  { %v5194_v2 = vmul.f32 %v4053_v24, %v2429_v47  ;;  %v4101_v47 = vld [vmem:[%s5512_s10 + $0x20] sm:$0xff] }
0x1a89   :  { %v4105_v24 = vld [vmem:[%s5512_s10] sm:$0xff] }
0x1a8a   :  { %v2439_v45 = vrot.slane %v5194_v2, %v4603_v14  ;;  %v2450_v41 = vrot.slane %v5194_v2, %v4642_v19 }
0x1a8c   :  { %2441 = vbcast.lane.b32.xlu0 %v2439_v45, 256 }
0x1a90   :  { %2445 = vbcast.lane.b32.xlu0 %v2439_v45, 264  ;;  %v3669_v45 = vld [vmem:[%s5527_s29 + $0x6] sm:$0x3] }
0x1a94   :  { %2452 = vbcast.lane.b32.xlu0 %v2450_v41, 256 }
0x1a98   :  { %2456 = vbcast.lane.b32.xlu0 %v2450_v41, 264 }
0x1a9c   :  { %2713 = vrot.lane.b32.xlu0 %v5040_v17, %s4345_s19 }
0x1afe   :  { %v2442_v51 = vpop.permute.xlu0 %2441 }
0x1aff   :  { %v2458_v6 = vmul.f32 %v2442_v51, %v5085_v29 }
0x1b01   :  { %v2462_v33 = vsel %vm128_vm3, %v2458_v6, 0.0 }
0x1b02   :  { %v2446_v30 = vpop.permute.xlu0 %2445 }
0x1b03   :  { %v2459_v9 = vmul.f32 %v2446_v30, %v5110_v3 }
0x1b05   :  { %v2463_v63 = vsel %vm128_vm3, %v2459_v9, 0.0 }
0x1b06   :  { %v2464_v34 = vadd.f32 %v2463_v63, %v2462_v33  ;;  %v2453_v10 = vpop.permute.xlu0 %2452 }
0x1b07   :  { %v2460_v35 = vmul.f32 %v2453_v10, %v5089_v40 }
0x1b08   :  { %v2465_v23 = vrot.slane %v2464_v34, 4 }
0x1b09   :  { %v2471_v17 = vsel %vm128_vm3, %v2460_v35, 0.0 }
0x1b0a   :  { %v2466_v20 = vadd.f32 %v2465_v23, %v2464_v34  ;;  %v2457_v7 = vpop.permute.xlu0 %2456 }
0x1b0b   :  { %v2461_v25 = vmul.f32 %v2457_v7, %v5094_v44 }
0x1b0c   :  { %v2467_v39 = vrot.slane %v2466_v20, 2 }
0x1b0d   :  { %v2472_v36 = vsel %vm128_vm3, %v2461_v25, 0.0 }
0x1b0e   :  { %v2473_v50 = vadd.f32 %v2472_v36, %v2471_v17  ;;  %v2468_v4 = vadd.f32 %v2467_v39, %v2466_v20  ;;  %v2714_v1 = vpop.permute.xlu0 %2713  ;;  %v2487_v17 = vrot.slane %v5194_v2, %v4639_v18  ;;  %v2498_v36 = vrot.slane %v5194_v2, %v4647_v22 }
0x1b10   :  { %v2474_v56 = vrot.slane %v2473_v50, 4  ;;  %v2469_v38 = vrot.slane %v2468_v4, 1 }
0x1b12   :  { %v2475_v55 = vadd.f32 %v2474_v56, %v2473_v50  ;;  %v2470_v13 = vadd.f32 %v2469_v38, %v2468_v4 }
0x1b14   :  { %v2476_v32 = vrot.slane %v2475_v55, 2 }
0x1b16   :  { %v2477_v60 = vadd.f32 %v2476_v32, %v2475_v55 }
0x1b18   :  { %v2478_v42 = vrot.slane %v2477_v60, 1 }
0x1b1a   :  { %v2479_v48 = vadd.f32 %v2478_v42, %v2477_v60 }
0x1b1c   :  { %v2626_v62 = vsel %vm446_vm9, %v2479_v48, %v2470_v13 }
0x1b1d   :  { %v2716_v61 = vsel %vm128_vm3, %v2626_v62, %v2714_v1 }
0x1b1e   :  { %3863 = vmatmul.mubr.msk.f32.vlgmr.msra.gmra.mxu0 %vm165_vm4, %v2716_v61 }
0x1b1f   :  { %3877 = vmatpush3.msra.mxu0 %v4101_v47  ;;  %3886 = vmatprep.mubr.msk.f32.mxu0 %vm4327_vm0, %v4326_v0 }
0x1b20   :  { %3878 = vmatprep.subr.mxu0 %v4326_v0 }
0x1b21   :  { %3879 = vmatpush3.msra.mxu0 %v4102_v53 }
0x1b22   :  { %3880 = vmatprep.subr.mxu0 %v4326_v0 }
0x1b23   :  { %3881 = vmatpush3.msra.mxu0 %v4103_v58 }
0x1b24   :  { %3882 = vmatprep.subr.mxu0 %v4326_v0 }
0x1b25   :  { %3883 = vmatpush3.msra.mxu0 %v4104_v15 }
0x1b26   :  { %3884 = vmatprep.subr.mxu0 %v4326_v0 }
0x1b27   :  { %3885 = vmatpush3.msra.mxu0 %v4105_v24 }
0x1bde   :  { %v2786_v41 = vpop.f32.mrf.mxu0 }
0x1bdf   :  { %v2790_v51 = vadd.f32 %v3669_v45, %v2786_v41 }
0x1be0   :  { %v3864_v6 = vpop.f32.mrf.mxu0 }
0x1be1   :  { %v2791_v30 = vadd.f32 %v5028_v26, %v2790_v51 }
0x1be3   :  { %4054 = vtanh.f32 %v2791_v30  ;;  %v2792_v33 = vmul.f32 0.5, %v2791_v30 }
0x1be5   :  { %4056 = vtanh.f32 %v2792_v33 }
0x1bf0   :  { %v4055_v9 = vpop.eup %4054 }
0x1bf1   :  { %2799 = vrot.lane.b32.xlu0 %v4055_v9, %s4329_s18 }
0x1bf2   :  { %v4057_v63 = vpop.eup %4056 }
0x1bf3   :  { %v2794_v34 = vadd.f32 1.0, %v4057_v63 }
0x1bf5   :  { %v2795_v10 = vmul.f32 0.5, %v2794_v34 }
0x1bf7   :  { %v2797_v20 = vmul.f32 %v2795_v10, %v5036_v12  ;;  %v2480_v12 = vmul.f32 0.5, %v5105_v31 }
0x1c63   :  { %v2800_v23 = vpop.permute.xlu0 %2799 }
0x1c64   :  { %v2802_v35 = vmul.f32 %v2800_v23, %v2795_v10 }
0x1c66   :  { %2804 = vrot.lane.b32.xlu0 %v2802_v35, %s4328_s4 }
0x1cd8   :  { %v2805_v7 = vpop.permute.xlu0 %2804 }
0x1cd9   :  { %v5241_v25 = vadd.f32 %v2805_v7, %v2797_v20 }
0x1cdb   :  { %4058 = vtanh.f32 %v5241_v25 }
0x1cdc   :  { %4060 = vtanh.f32 %v2480_v12 }
0x1ce8   :  { %v4059_v26 = vpop.eup %4058 }
0x1ce9   :  { %2810 = vrot.lane.b32.xlu0 %v4059_v26, %s4329_s18  ;;  %v4061_v39 = vpop.eup %4060  ;;  %s4349_s18 = smov 16  }
0x1cea   :  { %v2482_v50 = vadd.f32 1.0, %v4061_v39 }
0x1cec   :  { %v2483_v56 = vmul.f32 0.5, %v2482_v50 }
0x1ced   :  { %2627 = vrot.lane.b32.xlu0 %v2626_v62, %s4328_s4 }
0x1cee   :  { %v2513_v4 = vrot.slane %v2483_v56, %v4596_v8 }
0x1cf0   :  { %v2521_v60 = vrot.slane %v2513_v4, %v4596_v8  ;;  %v2514_v48 = vcombine.high %v2513_v4, %v2513_v4 }
0x1cf1   :  { %2489 = vbcast.lane.b32.xlu0 %v2487_v17, 256 }
0x1cf2   :  { %v2532_v13 = vrot.slane %v2521_v60, %v4603_v14 }
0x1cf5   :  { %2493 = vbcast.lane.b32.xlu0 %v2487_v17, 264 }
0x1cf9   :  { %2500 = vbcast.lane.b32.xlu0 %v2498_v36, 256 }
0x1cfd   :  { %2504 = vbcast.lane.b32.xlu0 %v2498_v36, 264 }
0x1d5b   :  { %v2811_v55 = vpop.permute.xlu0 %2810 }
0x1d5c   :  { %v2813_v32 = vmul.f32 %v2811_v55, %v2795_v10 }
0x1d5e   :  { %2815 = vrot.lane.b32.xlu1 %v2813_v32, %s4328_s4 }
0x1d5f   :  { %v2628_v38 = vpop.permute.xlu0 %2627 }
0x1d60   :  { %v2630_v42 = vsel %vm282_vm5, %v5051_v43, %v2628_v38  ;;  %v2528_v43 = vrot.slane %v2514_v48, %v4596_v8 }
0x1d61   :  { %3850 = vmatmul.mubr.msk.f32.vlgmr.msra.gmra.mxu1 %vm165_vm4, %v2630_v42 }
0x1d62   :  { %3866 = vmatpush3.msra.mxu1 %v5004_v46  ;;  %3873 = vmatprep.mubr.msk.f32.mxu1 %vm4327_vm0, %v4326_v0  ;;  %v2573_v46 = vrot.slane %v5105_v31, %v4596_v8  ;;  %vm5530_vm0 = vcmask 254976  }
0x1d63   :  { %v2490_v62 = vpop.permute.xlu0 %2489  ;;  %3867 = vmatprep.subr.mxu1 %v4326_v0  ;;  %vm5531_vm15 = vmmov %vm5530_vm0 }
0x1d64   :  { %v2539_v1 = vmul.f32 %v2532_v13, %v2490_v62  ;;  %3868 = vmatpush3.msra.mxu1 %v5010_v49  ;;  %v2536_v49 = vrot.slane %v2528_v43, %v4603_v14  ;;  %v2581_v24 = vrot.slane %v2573_v46, %v4596_v8  ;;  %v2574_v45 = vcombine.high %v2573_v46, %v2573_v46  ;;  %v5316_v43 = vld [vmem:[%s5513_s11] ss:$0 sm:$0xff]  ;;  %s4348_s11 = smov 96  }
0x1d65   :  { %3869 = vmatprep.subr.mxu1 %v4326_v0 }
0x1d66   :  { %v2543_v61 = vsub.f32 1.0, %v2539_v1  ;;  %3870 = vmatpush3.msra.mxu1 %v5014_v37  ;;  %v2592_v51 = vrot.slane %v2581_v24, %v4603_v14  ;;  %v2588_v31 = vrot.slane %v2574_v45, %v4596_v8 }
0x1d67   :  { %v2494_v47 = vpop.permute.xlu0 %2493  ;;  %3871 = vmatprep.subr.mxu1 %v4326_v0 }
0x1d68   :  { %v2540_v53 = vmul.f32 %v2532_v13, %v2494_v47  ;;  %2551 = vrot.lane.b32.xlu1 %v2543_v61, %s4346_s8  ;;  %3872 = vmatpush3.msra.mxu1 %v5018_v21  ;;  %v2599_v21 = vmul.f32 %v2592_v51, %v2490_v62  ;;  %v2596_v9 = vrot.slane %v2588_v31, %v4603_v14 }
0x1d69   :  { %v2600_v33 = vmul.f32 %v2592_v51, %v2494_v47 }
0x1d6a   :  { %v2544_v58 = vsub.f32 1.0, %v2540_v53 }
0x1d6b   :  { %v2501_v15 = vpop.permute.xlu0 %2500 }
0x1d6c   :  { %v2541_v41 = vmul.f32 %v2536_v49, %v2501_v15  ;;  %2553 = vrot.lane.b32.xlu0 %v2544_v58, %s4346_s8  ;;  %v2601_v63 = vmul.f32 %v2596_v9, %v2501_v15 }
0x1d6e   :  { %v2545_v37 = vsub.f32 1.0, %v2541_v41 }
0x1d6f   :  { %v2505_v0 = vpop.permute.xlu0 %2504 }
0x1d70   :  { %v2542_v6 = vmul.f32 %v2536_v49, %v2505_v0  ;;  %2555 = vrot.lane.b32.xlu1 %v2545_v37, %s4346_s8  ;;  %v2602_v34 = vmul.f32 %v2596_v9, %v2505_v0 }
0x1d72   :  { %v2546_v30 = vsub.f32 1.0, %v2542_v6 }
0x1d74   :  { %2607 = vrot.lane.b32.xlu1 %v2599_v21, %s4347_s6  ;;  %2557 = vrot.lane.b32.xlu0 %v2546_v30, %s4346_s8 }
0x1d78   :  { %2611 = vrot.lane.b32.xlu1 %v2601_v63, %s4347_s6  ;;  %2609 = vrot.lane.b32.xlu0 %v2600_v33, %s4347_s6 }
0x1d7c   :  { %2613 = vrot.lane.b32.xlu0 %v2602_v34, %s4347_s6 }
0x1dd0   :  { %v5283_v10 = vpop.permute.xlu1 %2815 }
0x1dd1   :  { %3556 = vst.msk [vmem:[#allocation3] sm:$0x3] %vm5530_vm0, %v5283_v10  ;;  %3874 = vmatmul.mubr.msk.f32.vlgmr.msra.gmra.mxu1 %vm282_vm5, %v5283_v10 }
0x1dd2   :  { %3571 = vst.msk [vmem:[#allocation19] sm:$0x3] %vm5531_vm15, %v5283_v10 }
0x1dda   :  { %v2552_v23 = vpop.permute.xlu1 %2551 }
0x1ddb   :  { %v2563_v7 = vmul.f32 %v2552_v23, %v5085_v29 }
0x1dde   :  { %v2554_v35 = vpop.permute.xlu0 %2553 }
0x1ddf   :  { %v2564_v12 = vmul.f32 %v2554_v35, %v5110_v3 }
0x1de2   :  { %v2556_v20 = vpop.permute.xlu1 %2555 }
0x1de3   :  { %v2565_v39 = vmul.f32 %v2556_v20, %v5089_v40 }
0x1de6   :  { %v2608_v26 = vpop.permute.xlu1 %2607  ;;  %v2558_v17 = vpop.permute.xlu0 %2557 }
0x1de7   :  { %v5292_v36 = vadd.f32 %v2608_v26, %v2563_v7  ;;  %v2566_v38 = vmul.f32 %v2558_v17, %v5094_v44 }
0x1de9   :  { %v2925_v50 = vadd.f32 1e-16, %v5292_v36 }
0x1dea   :  { %v2612_v56 = vpop.permute.xlu1 %2611  ;;  %v2610_v4 = vpop.permute.xlu0 %2609 }
0x1deb   :  { %v5297_v55 = vadd.f32 %v2612_v56, %v2565_v39  ;;  %v5299_v32 = vadd.f32 %v2610_v4, %v2564_v12  ;;  %v2929_v60 = vmul.f32 %v2925_v50, %v2925_v50 }
0x1ded   :  { %v5303_v29 = vadd.f32 1e-16, %v5297_v55  ;;  %v2933_v42 = vsel %vm128_vm3, %v2929_v60, 0.0  ;;  %v2926_v0 = vadd.f32 1e-16, %v5299_v32 }
0x1dee   :  { %2934 = vadd.xlane.f32.xlu0 %v2933_v42  ;;  %v2614_v3 = vpop.permute.xlu0 %2613 }
0x1def   :  { %v5306_v13 = vadd.f32 %v2614_v3, %v2566_v38  ;;  %v2931_v40 = vmul.f32 %v5303_v29, %v5303_v29  ;;  %v2930_v51 = vmul.f32 %v2926_v0, %v2926_v0 }
0x1df1   :  { %v2928_v48 = vadd.f32 1e-16, %v5306_v13  ;;  %v2939_v62 = vsel %vm128_vm3, %v2931_v40, 0.0  ;;  %v2936_v31 = vsel %vm128_vm3, %v2930_v51, 0.0 }
0x1df2   :  { %2940 = vadd.xlane.f32.xlu0 %v2939_v62 }
0x1df3   :  { %v2932_v1 = vmul.f32 %v2928_v48, %v2928_v48 }
0x1df5   :  { %v2942_v44 = vsel %vm128_vm3, %v2932_v1, 0.0 }
0x1df6   :  { %2943 = vadd.xlane.f32.xlu0 %v2942_v44 }
0x1e21   :  { %v2700_v61 = vpop.f32.mrf.mxu1 }
0x1e22   :  { %v2701_v47 = vadd.f32 %v5316_v43, %v2700_v61 }
0x1e23   :  { %v3851_v46 = vpop.f32.mrf.mxu1 }
0x1e24   :  { %v2704_v53 = vmul.f32 0.5, %v2701_v47 }
0x1e26   :  { %4062 = vtanh.f32 %v2704_v53 }
0x1e33   :  { %v4063_v58 = vpop.eup %4062 }
0x1e34   :  { %v2706_v49 = vadd.f32 1.0, %v4063_v58 }
0x1e36   :  { %v2707_v15 = vmul.f32 0.5, %v2706_v49 }
0x1e38   :  { %2709 = vst.msk [vmem:[#allocation16 + $0x4] sm:$0x3] %vm115_vm2, %v2707_v15 }
0x1e77   :  { %v2935_v58 = vpop.xlane.xlu0 %2934 }
0x1e7b   :  { %v2941_v49 = vpop.xlane.xlu0 %2940 }
0x1e91   :  { %v2885_v24 = vpop.f32.mrf.mxu1 }
0x1e92   :  { %v5321_v45 = vadd.f32 %v5102_v5, %v2885_v24  ;;  %v2944_v24 = vpop.xlane.xlu0 %2943 }
0x1e93   :  { %v3875_v41 = vpop.f32.mrf.mxu1 }
0x1e94   :  { %v2890_v37 = vrot.slane %v5321_v45, 6 }
0x1e96   :  { %2891 = vrot.lane.b32.xlu1 %v2890_v37, %s4330_s5  ;;  %v2952_v37 = vrot.slane %v2935_v58, %v4624_v59  ;;  %s4350_s5 = smov [#allocation17]  }
0x1eba   :  { %2937 = vadd.xlane.f32.xlu1 %v2936_v31 }
0x1f08   :  { %v2892_v6 = vpop.permute.xlu1 %2891 }
0x1f09   :  { %v5329_v21 = vsel %vm360_vm6, %v5321_v45, %v2892_v6 }
0x1f0a   :  { %v2895_v30 = vadd.f32 1e-16, %v5329_v21 }
0x1f0c   :  { %v2979_v5 = vrot.slane %v2895_v30, %v4596_v8  ;;  %v3049_v9 = vmul.f32 %v2895_v30, %v2895_v30 }
0x1f0e   :  { %v3050_v33 = vsel %vm531_vm7, %v3049_v9, 0.0  ;;  %v2987_v63 = vrot.slane %v2979_v5, %v4596_v8  ;;  %v2980_v34 = vcombine.high %v2979_v5, %v2979_v5  ;;  %vm5533_vm7 = vcmask 7168  }
0x1f0f   :  { %3051 = vadd.xlane.f32.xlu0 %v3050_v33 }
0x1f10   :  { %v3000_v23 = vrot.slane %v2987_v63, %v4603_v14  ;;  %v2994_v35 = vrot.slane %v2980_v34, %v4596_v8  ;;  %v2995_v20 = vcombine.high %v2987_v63, %v2987_v63 }
0x1f12   :  { %v3017_v7 = vmul.f32 %v3000_v23, %v2925_v50  ;;  %v3018_v26 = vmul.f32 %v3000_v23, %v2926_v0  ;;  %v3004_v17 = vrot.slane %v2994_v35, %v4603_v14  ;;  %v3008_v12 = vrot.slane %v2995_v20, %v4603_v14 }
0x1f13   :  { %v2996_v39 = vcombine.high %v2994_v35, %v2994_v35 }
0x1f14   :  { %v3025_v56 = vsel %vm128_vm3, %v3017_v7, 0.0  ;;  %v3028_v4 = vsel %vm128_vm3, %v3018_v26, 0.0  ;;  %v3019_v60 = vmul.f32 %v3004_v17, %v5303_v29  ;;  %v3020_v38 = vmul.f32 %v3004_v17, %v2928_v48 }
0x1f15   :  { %3026 = vadd.xlane.f32.xlu1 %v3025_v56  ;;  %3029 = vadd.xlane.f32.xlu0 %v3028_v4  ;;  %v3021_v42 = vmul.f32 %v3008_v12, %v2925_v50  ;;  %v3022_v62 = vmul.f32 %v3008_v12, %v2926_v0  ;;  %v3012_v1 = vrot.slane %v2996_v39, %v4603_v14  ;;  %v2897_v7 = vand.u32 2147483647, %v5329_v21 }
0x1f16   :  { %v3031_v3 = vsel %vm128_vm3, %v3019_v60, 0.0  ;;  %v3034_v40 = vsel %vm128_vm3, %v3020_v38, 0.0  ;;  %v2965_v0 = vrot.slane %v2944_v24, %v4621_v57 }
0x1f17   :  { %v3037_v44 = vsel %vm128_vm3, %v3021_v42, 0.0  ;;  %v3040_v61 = vsel %vm128_vm3, %v3022_v62, 0.0  ;;  %v3023_v47 = vmul.f32 %v3012_v1, %v5303_v29  ;;  %v3024_v46 = vmul.f32 %v3012_v1, %v2928_v48 }
0x1f18   :  { %v2961_v29 = vrot.slane %v2941_v49, %v4624_v59  ;;  %v2898_v26 = vsub.f32 0.0, %v2897_v7 }
0x1f19   :  { %3032 = vadd.xlane.f32.xlu1 %v3031_v3  ;;  %3035 = vadd.xlane.f32.xlu0 %v3034_v40  ;;  %v3043_v50 = vsel %vm128_vm3, %v3023_v47, 0.0  ;;  %v3046_v53 = vsel %vm128_vm3, %v3024_v46, 0.0 }
0x1f1a   :  { %v2966_v51 = vsel %vm435_vm8, %v2965_v0, %v2961_v29  ;;  %v2899_v17 = vmul.f32 1.442695, %v2898_v26 }
0x1f1d   :  { %3038 = vadd.xlane.f32.xlu1 %v3037_v44  ;;  %3041 = vadd.xlane.f32.xlu0 %v3040_v61 }
0x1f21   :  { %3044 = vadd.xlane.f32.xlu1 %v3043_v50  ;;  %3047 = vadd.xlane.f32.xlu0 %v3046_v53 }
0x1f43   :  { %v2938_v15 = vpop.xlane.xlu1 %2937 }
0x1f44   :  { %v2956_v41 = vrot.slane %v2938_v15, %v4621_v57 }
0x1f46   :  { %v2957_v48 = vsel %vm435_vm8, %v2956_v41, %v2952_v37 }
0x1f47   :  { %v2967_v31 = vsel %vm446_vm9, %v2966_v51, %v2957_v48  ;;  %v2969_v6 = vsel %vm449_vm10, %v2966_v51, %v2957_v48 }
0x1f48   :  { %v2971_v30 = vsel %vm360_vm6, %v2967_v31, %v2969_v6  ;;  %v2896_v6 = vmax.f32 %v5329_v21, 0.0  ;;  %vm5532_vm6 = vcmask 19456  }
0x1f98   :  { %v3052_v5 = vpop.xlane.xlu0 %3051 }
0x1f99   :  { %v3053_v9 = vmul.f32 %v3052_v5, %v2971_v30  ;;  %v2909_v5 = vsel %vm376_vm11, %v5329_v21, -inf }
0x1f9b   :  { %v3054_v33 = vmax.f32 %v3053_v9, 1e-16 }
0x1f9d   :  { %4064 = vrsqrt.f32 %v3054_v33 }
0x1f9e   :  { %v3027_v12 = vpop.xlane.xlu1 %3026  ;;  %v3030_v39 = vpop.xlane.xlu0 %3029  ;;  %4066 = vpow2.f32 %v2899_v17 }
0x1fa2   :  { %v3033_v56 = vpop.xlane.xlu1 %3032  ;;  %v3036_v4 = vpop.xlane.xlu0 %3035 }
0x1fa6   :  { %v3039_v60 = vpop.xlane.xlu1 %3038  ;;  %v3042_v38 = vpop.xlane.xlu0 %3041 }
0x1faa   :  { %v4065_v63 = vpop.eup %4064  ;;  %v3045_v3 = vpop.xlane.xlu1 %3044 }
0x1fab   :  { %v3060_v34 = vrot.slane %v4065_v63, %v4603_v14  ;;  %v3082_v23 = vrot.slane %v4065_v63, %v4639_v18  ;;  %v3071_v35 = vrot.slane %v4065_v63, %v4642_v19  ;;  %v3093_v20 = vrot.slane %v4065_v63, %v4647_v22  ;;  %v4067_v42 = vpop.eup %4066  ;;  %v3048_v40 = vpop.xlane.xlu0 %3047 }
0x1fac   :  { %v2901_v62 = vadd.f32 1.0, %v4067_v42 }
0x1fad   :  { %3066 = vbcast.lane.b32.xlu0 %v3060_v34, 264  ;;  %3062 = vbcast.lane.b32.xlu1 %v3060_v34, 256 }
0x1fae   :  { %4068 = vlog2.f32 %v2901_v62 }
0x1fb1   :  { %3088 = vbcast.lane.b32.xlu0 %v3082_v23, 264  ;;  %3073 = vbcast.lane.b32.xlu1 %v3071_v35, 256 }
0x1fb5   :  { %3099 = vbcast.lane.b32.xlu0 %v3093_v20, 264  ;;  %3077 = vbcast.lane.b32.xlu1 %v3071_v35, 264 }
0x1fb9   :  { %3084 = vbcast.lane.b32.xlu1 %v3082_v23, 256 }
0x1fbb   :  { %v4069_v0 = vpop.eup %4068 }
0x1fbc   :  { %v2903_v31 = vmul.f32 0.6931472, %v4069_v0 }
0x1fbd   :  { %3095 = vbcast.lane.b32.xlu1 %v3093_v20, 256 }
0x1fbe   :  { %v5365_v30 = vadd.f32 %v2903_v31, %v2896_v6 }
0x201f   :  { %v3063_v1 = vpop.permute.xlu1 %3062  ;;  %v3067_v44 = vpop.permute.xlu0 %3066 }
0x2020   :  { %v3109_v61 = vmul.f32 %v3063_v1, %v3027_v12  ;;  %v3110_v47 = vmul.f32 %v3067_v44, %v3030_v39 }
0x2022   :  { %3131 = vperm.xlu1 %3953, %v3109_v61   ;;  %3134 = vperm.xlu0 %3954, %v3110_v47  }
0x2023   :  { %v3074_v46 = vpop.permute.xlu1 %3073  ;;  %v3089_v53 = vpop.permute.xlu0 %3088 }
0x2024   :  { %v3111_v50 = vmul.f32 %v3074_v46, %v3033_v56  ;;  %v3114_v24 = vmul.f32 %v3089_v53, %v3042_v38  ;;  %v2905_v46 = vmul.f32 0.5, %v5329_v21 }
0x2026   :  { %3137 = vperm.xlu1 %3953, %v3111_v50   ;;  %4070 = vtanh.f32 %v2905_v46 }
0x2027   :  { %v3078_v58 = vpop.permute.xlu1 %3077  ;;  %v3100_v37 = vpop.permute.xlu0 %3099 }
0x2028   :  { %v3112_v49 = vmul.f32 %v3078_v58, %v3036_v4  ;;  %v3116_v48 = vmul.f32 %v3100_v37, %v3048_v40 }
0x202a   :  { %3140 = vperm.xlu1 %3953, %v3112_v49  }
0x202b   :  { %v3085_v15 = vpop.permute.xlu1 %3084 }
0x202c   :  { %v3113_v41 = vmul.f32 %v3085_v15, %v3039_v60 }
0x202e   :  { %3143 = vperm.xlu0 %3954, %v3113_v41   ;;  %3146 = vperm.xlu1 %3953, %v3114_v24  }
0x202f   :  { %v3096_v29 = vpop.permute.xlu1 %3095 }
0x2030   :  { %v3115_v51 = vmul.f32 %v3096_v29, %v3045_v3 }
0x2032   :  { %3149 = vperm.xlu0 %3954, %v3115_v51   ;;  %3152 = vperm.xlu1 %3953, %v3116_v48  }
0x2033   :  { %v4071_v53 = vpop.eup %4070 }
0x2034   :  { %v2907_v58 = vadd.f32 1.0, %v4071_v53 }
0x2036   :  { %3955 = vset.pattern.permute.xlu0 %v4333_v11  ;;  %3956 = vset.pattern.permute.xlu1 %v4334_v16  ;;  %v2908_v49 = vmul.f32 0.5, %v2907_v58 }
0x2037   :  { %3119 = vperm.xlu0 %3955, %v5365_v30  }
0x2038   :  { %v3212_v24 = vsub.f32 1.0, %v2908_v49 }
0x203b   :  { %3957 = vset.pattern.permute.xlu0 %v4334_v16 }
0x2056   :  { %2910 = vmax.xlane.f32.xlu1 %v2909_v5 }
0x209d   :  { %v3132_v9 = vpop.permute.xlu1 %3131  ;;  %v3135_v63 = vpop.permute.xlu0 %3134 }
0x209e   :  { %v3157_v35 = vrot.slane %v3132_v9, %v4624_v59  ;;  %v3161_v7 = vrot.slane %v3135_v63, %v4621_v57 }
0x20a0   :  { %v3162_v60 = vsel %vm435_vm8, %v3161_v7, %v3157_v35 }
0x20a1   :  { %v3138_v33 = vpop.permute.xlu1 %3137 }
0x20a2   :  { %v3166_v26 = vrot.slane %v3138_v33, %v4624_v59 }
0x20a5   :  { %v3141_v34 = vpop.permute.xlu1 %3140 }
0x20a6   :  { %v3170_v23 = vrot.slane %v3141_v34, %v4621_v57 }
0x20a8   :  { %v3171_v12 = vsel %vm435_vm8, %v3170_v23, %v3166_v26 }
0x20a9   :  { %v3147_v20 = vpop.permute.xlu1 %3146  ;;  %v3144_v11 = vpop.permute.xlu0 %3143  ;;  %v3190_v3 = vsel %vm446_vm9, %v3171_v12, %v3162_v60 }
0x20aa   :  { %v3179_v16 = vrot.slane %v3147_v20, %v4621_v57  ;;  %v3175_v17 = vrot.slane %v3144_v11, %v4624_v59  ;;  %v2924_v20 = vadd.f32 1.0, %v5365_v30 }
0x20ac   :  { %v3180_v39 = vsel %vm435_vm8, %v3179_v16, %v3175_v17 }
0x20ad   :  { %v3153_v56 = vpop.permute.xlu1 %3152  ;;  %v3150_v4 = vpop.permute.xlu0 %3149  ;;  %v3191_v62 = vsel %vm673_vm12, %v3180_v39, %v3190_v3 }
0x20ae   :  { %v3188_v38 = vrot.slane %v3153_v56, %v4621_v57  ;;  %v3184_v42 = vrot.slane %v3150_v4, %v4624_v59 }
0x20b0   :  { %v3189_v40 = vsel %vm435_vm8, %v3188_v38, %v3184_v42 }
0x20b1   :  { %v3192_v1 = vsel %vm449_vm10, %v3189_v40, %v3191_v62 }
0x20b2   :  { %v3120_v44 = vpop.permute.xlu0 %3119 }
0x20b3   :  { %v3194_v61 = vmul.f32 %v3192_v1, %v3120_v44 }
0x20b5   :  { %v3195_v47 = vsel %vm678_vm13, %v3194_v61, -inf }
0x20b6   :  { %3196 = vmax.xlane.f32.xlu0 %v3195_v47 }
0x20df   :  { %v2911_v50 = vpop.xlane.xlu1 %2910 }
0x20e0   :  { %v2912_v57 = vsub.f32 %v5329_v21, %v2911_v50 }
0x20e2   :  { %v2913_v59 = vmul.f32 1.442695, %v2912_v57 }
0x20e4   :  { %4072 = vpow2.f32 %v2913_v59 }
0x20f1   :  { %v4073_v15 = vpop.eup %4072 }
0x20f2   :  { %2916 = vrot.lane.b32.xlu0 %v4073_v15, %s4335_s25  ;;  %s3596_s25 = sshll.u32 %s4350_s5, 4  ;;  %s3597_s25 = int_to_ptr.vmem [resolvable:$true] %s3596_s25 }
0x20f3   :  { %p4212_p12 = scmp.lt.s32.totalorder %s3597_s25, %s3597_s25 }
0x20f6   :  { %3215 = vperm.xlu0 %3957, %v3212_v24  }
0x20fa   :  { %3960 = vset.pattern.permute.xlu0 %v4339_v52 }
0x213f   :  { %v3197_v41 = vpop.xlane.xlu0 %3196 }
0x2140   :  { %v3198_v37 = vsub.f32 %v3194_v61, %v3197_v41 }
0x2142   :  { %v3199_v0 = vmul.f32 1.442695, %v3198_v37 }
0x2144   :  { %4074 = vpow2.f32 %v3199_v0 }
0x2151   :  { %v4075_v21 = vpop.eup %4074 }
0x2152   :  { %v3201_v51 = vsel %vm678_vm13, %v4075_v21, 0.0 }
0x2164   :  { %v2917_v29 = vpop.permute.xlu0 %2916 }
0x2165   :  { %v2919_v48 = vsel %vm5532_vm6, %v2917_v29, 0.0 }
0x2166   :  { %2920 = vadd.xlane.f32.xlu1 %v2919_v48 }
0x216a   :  { %3202 = vadd.xlane.f32.xlu1 %v3201_v51 }
0x2171   :  { %v3216_v33 = vpop.permute.xlu0 %3215 }
0x2172   :  { %v3218_v23 = vmul.f32 %v3216_v33, %v5194_v2 }
0x217b   :  { %3208 = vperm.xlu1 %3956, %v2908_v49  }
0x217f   :  { %3958 = vset.pattern.permute.xlu1 %v4338_v28 }
0x21ef   :  { %v2921_v31 = vpop.xlane.xlu1 %2920 }
0x21f0   :  { %4076 = vrcp.f32 %v2921_v31 }
0x21f3   :  { %v3203_v6 = vpop.xlane.xlu1 %3202 }
0x21f4   :  { %4078 = vrcp.f32 %v3203_v6 }
0x21f7   :  { %v3209_v34 = vpop.permute.xlu1 %3208 }
0x21fd   :  { %v4077_v52 = vpop.eup %4076 }
0x21fe   :  { %v2923_v5 = vmul.f32 %v4077_v52, %v4073_v15 }
0x2200   :  { %3248 = vperm.xlu0 %3960, %v2923_v5   ;;  %3237 = vperm.xlu1 %3958, %v2923_v5  }
0x2201   :  { %v4079_v9 = vpop.eup %4078 }
0x2202   :  { %v3205_v63 = vmul.f32 %v4079_v9, %v4075_v21 }
0x2204   :  { %v3211_v35 = vmul.f32 %v3209_v34, %v3205_v63  ;;  %3959 = vset.pattern.permute.xlu1 %v4337_v27  ;;  %3961 = vset.pattern.permute.xlu0 %v4342_v54 }
0x2205   :  { %3242 = vperm.xlu1 %3959, %v2923_v5  }
0x2206   :  { %v3219_v28 = vadd.f32 %v3218_v23, %v3211_v35 }
0x2208   :  { %3228 = vrot.lane.b32.xlu0 %v3219_v28, %s4344_s30 }
0x2209   :  { %3221 = vrot.lane.b32.xlu1 %v3219_v28, %s4341_s28 }
0x220c   :  { %3259 = vperm.xlu0 %3961, %v2924_v20  }
0x220d   :  { %3224 = vrot.lane.b32.xlu1 %v3219_v28, %s4340_s27  ;;  %s4207_s27 = scalar_lea.vmem %s3597_s25, 32 }
0x220e   :  { %p4208_p11 = scmp.ne.s32.totalorder %s3597_s25, %s4207_s27  ;;  %p4213_p13 = scmp.lt.s32.totalorder %s4207_s27, %s4207_s27 }
0x2210   :  { %p4214_p0 = por %p4213_p13, %p4212_p12 }
0x2211   :  { %3231 = vrot.lane.b32.xlu1 %v3219_v28, %s4343_s0 }
0x2212   :  { %p4215_p1 = pnand %p4214_p0, %p4208_p11 }
0x227b   :  { %v3238_v11 = vpop.permute.xlu1 %3237  ;;  %v3249_v26 = vpop.permute.xlu0 %3248 }
0x227f   :  { %v3229_v17 = vpop.permute.xlu0 %3228 }
0x2280   :  { %v3243_v2 = vpop.permute.xlu1 %3242 }
0x2281   :  { %v3245_v12 = vmul.f32 %v3243_v2, %v3219_v28 }
0x2284   :  { %v3222_v7 = vpop.permute.xlu1 %3221 }
0x2287   :  { %v3260_v40 = vpop.permute.xlu0 %3259 }
0x2288   :  { %v3225_v27 = vpop.permute.xlu1 %3224 }
0x2289   :  { %v3227_v54 = vsel %vm5533_vm7, %v3222_v7, %v3225_v27 }
0x228a   :  { %v3240_v16 = vmul.f32 %v3238_v11, %v3227_v54  ;;  %v3316_v54 = vmul.f32 0.5, %v5321_v45 }
0x228c   :  { %v3232_v39 = vpop.permute.xlu1 %3231  ;;  %v3246_v4 = vadd.f32 %v3245_v12, %v3240_v16 }
0x228d   :  { %v3234_v56 = vsel %vm719_vm1, %v3229_v17, %v3232_v39 }
0x228e   :  { %v3251_v30 = vmul.f32 %v3249_v26, %v3234_v56  ;;  %v3409_v56 = vrot.slane %v5321_v45, %v4596_v8 }
0x2290   :  { %v3252_v60 = vadd.f32 %v3251_v30, %v3246_v4 }
0x2292   :  { %v3253_v38 = vmax.f32 %v3252_v60, 1e-38  ;;  %vm3256_vm8 = vcmp.gt.f32.partialorder %v3252_v60, 0.0 }
0x2294   :  { %4080 = vlog2.f32 %v3253_v38  ;;  %v3410_v38 = vcombine.high %v3409_v56, %v3409_v56 }
0x2296   :  { %v3424_v45 = vrot.slane %v3410_v38, %v4596_v8 }
0x22a1   :  { %v4081_v42 = vpop.eup %4080 }
0x22a2   :  { %v3255_v3 = vmul.f32 0.6931472, %v4081_v42 }
0x22a4   :  { %v3262_v62 = vmul.f32 %v3260_v40, %v3255_v3  ;;  %v3417_v3 = vrot.slane %v3409_v56, %v4596_v8 }
0x22a6   :  { %v3263_v1 = vmul.f32 1.442695, %v3262_v62 }
0x22a8   :  { %4082 = vpow2.f32 %v3263_v1 }
0x22b5   :  { %v4083_v44 = vpop.eup %4082 }
0x22b6   :  { %v3265_v61 = vsel %vm3256_vm8, %v4083_v44, 0.0  ;;  %v3428_v44 = vrot.slane %v3417_v3, %v4603_v14 }
0x22b7   :  { %v3266_v47 = vsel %vm678_vm13, %v3265_v61, 0.0 }
0x22b8   :  { %3267 = vadd.xlane.f32.xlu1 %v3266_v47 }
0x2341   :  { %v3268_v46 = vpop.xlane.xlu1 %3267 }
0x2342   :  { %v3269_v50 = vadd.f32 1e-16, %v3268_v46 }
0x2344   :  { %4084 = vrcp.f32 %v3269_v50 }
0x2345   :  { %4086 = vtanh.f32 %v3316_v54 }
0x2351   :  { %v4085_v57 = vpop.eup %4084 }
0x2352   :  { %v5407_v59 = vmul.f32 %v4085_v57, %v3265_v61  ;;  %v4087_v16 = vpop.eup %4086 }
0x2353   :  { %v3318_v17 = vadd.f32 1.0, %v4087_v16 }
0x2354   :  { %v3334_v53 = vrot.slane %v5407_v59, %v4647_v22  ;;  %v3275_v58 = vrot.slane %v5407_v59, %v4603_v14  ;;  %v3286_v49 = vrot.slane %v5407_v59, %v4642_v19  ;;  %v3323_v27 = vrot.slane %v5407_v59, %v4639_v18 }
0x2355   :  { %v3319_v12 = vmul.f32 0.5, %v3318_v17 }
0x2356   :  { %3340 = vbcast.lane.b32.xlu1 %v3334_v53, 264  ;;  %3277 = vbcast.lane.b32.xlu0 %v3275_v58, 256 }
0x2357   :  { %v3349_v39 = vrot.slane %v3319_v12, %v4596_v8 }
0x2359   :  { %v3357_v4 = vrot.slane %v3349_v39, %v4596_v8  ;;  %v3350_v60 = vcombine.high %v3349_v39, %v3349_v39 }
0x235a   :  { %3281 = vbcast.lane.b32.xlu0 %v3275_v58, 264 }
0x235b   :  { %v3368_v42 = vrot.slane %v3357_v4, %v4603_v14  ;;  %v3364_v1 = vrot.slane %v3350_v60, %v4596_v8 }
0x235d   :  { %v3372_v57 = vrot.slane %v3364_v1, %v4603_v14 }
0x235e   :  { %3288 = vbcast.lane.b32.xlu0 %v3286_v49, 256 }
0x2362   :  { %3292 = vbcast.lane.b32.xlu0 %v3286_v49, 264 }
0x23c8   :  { %v3278_v15 = vpop.permute.xlu0 %3277  ;;  %v3341_v50 = vpop.permute.xlu1 %3340 }
0x23c9   :  { %v3294_v24 = vmul.f32 %v3278_v15, %v5292_v36  ;;  %v3378_v8 = vmul.f32 %v3372_v57, %v3341_v50 }
0x23cb   :  { %v3298_v0 = vsel %vm128_vm3, %v3294_v24, 0.0 }
0x23cc   :  { %v3282_v41 = vpop.permute.xlu0 %3281 }
0x23cd   :  { %v3295_v37 = vmul.f32 %v3282_v41, %v5299_v32 }
0x23cf   :  { %v3299_v22 = vsel %vm128_vm3, %v3295_v37, 0.0  ;;  %v3382_v37 = vsub.f32 1.0, %v3378_v8 }
0x23d0   :  { %v3300_v29 = vadd.f32 %v3299_v22, %v3298_v0  ;;  %v3289_v48 = vpop.permute.xlu0 %3288  ;;  %v3547_v22 = vrot.slane %v5407_v59, 2 }
0x23d1   :  { %v3296_v51 = vmul.f32 %v3289_v48, %v5297_v55 }
0x23d2   :  { %v3301_v21 = vrot.slane %v3300_v29, 4 }
0x23d3   :  { %v3307_v52 = vsel %vm128_vm3, %v3296_v51, 0.0 }
0x23d4   :  { %v3302_v31 = vadd.f32 %v3301_v21, %v3300_v29  ;;  %v3293_v6 = vpop.permute.xlu0 %3292 }
0x23d5   :  { %v3297_v19 = vmul.f32 %v3293_v6, %v5306_v13 }
0x23d6   :  { %v3303_v9 = vrot.slane %v3302_v31, 2 }
0x23d7   :  { %v3308_v5 = vsel %vm128_vm3, %v3297_v19, 0.0 }
0x23d8   :  { %v3309_v33 = vadd.f32 %v3308_v5, %v3307_v52  ;;  %v3304_v34 = vadd.f32 %v3303_v9, %v3302_v31 }
0x23da   :  { %v3310_v63 = vrot.slane %v3309_v33, 4  ;;  %v3305_v28 = vrot.slane %v3304_v34, 1 }
0x23dc   :  { %v3311_v23 = vadd.f32 %v3310_v63, %v3309_v33  ;;  %v3306_v2 = vadd.f32 %v3305_v28, %v3304_v34 }
0x23de   :  { %v3312_v35 = vrot.slane %v3311_v23, 2 }
0x23e0   :  { %v3313_v20 = vadd.f32 %v3312_v35, %v3311_v23 }
0x23e2   :  { %v3314_v11 = vrot.slane %v3313_v20, 1 }
0x23e4   :  { %v3315_v7 = vadd.f32 %v3314_v11, %v3313_v20 }
0x23e6   :  { %v3462_v26 = vsel %vm446_vm9, %v3315_v7, %v3306_v2 }
0x23e7   :  { %3463 = vrot.lane.b32.xlu0 %v3462_v26, %s4328_s4  ;;  %3554 = vst.msk [vmem:[#allocation2] sm:$0x3] %vm115_vm2, %v3462_v26  ;;  %3570 = vst.msk [vmem:[#allocation17] sm:$0x3] %vm115_vm2, %v3462_v26 }
0x23eb   :  { %3325 = vbcast.lane.b32.xlu0 %v3323_v27, 256 }
0x23ef   :  { %3329 = vbcast.lane.b32.xlu0 %v3323_v27, 264 }
0x23f3   :  { %3336 = vbcast.lane.b32.xlu0 %v3334_v53, 256  ;;  %v3432_v53 = vrot.slane %v3424_v45, %v4603_v14 }
0x23f5   :  { %v3438_v15 = vmul.f32 %v3432_v53, %v3341_v50 }
0x2459   :  { %v3464_v30 = vpop.permute.xlu0 %3463 }
0x245a   :  { %v3466_v18 = vsel %vm282_vm5, %v5283_v10, %v3464_v30 }
0x245b   :  { %3887 = vmatmul.mubr.msk.f32.vlgmr.msra.gmra.mxu0 %vm165_vm4, %v3466_v18 }
0x245d   :  { %v3326_v40 = vpop.permute.xlu0 %3325 }
0x245e   :  { %v3375_v62 = vmul.f32 %v3368_v42, %v3326_v40  ;;  %v3435_v14 = vmul.f32 %v3428_v44, %v3326_v40 }
0x2460   :  { %v3379_v61 = vsub.f32 1.0, %v3375_v62 }
0x2461   :  { %v3330_v47 = vpop.permute.xlu0 %3329 }
0x2462   :  { %v3376_v46 = vmul.f32 %v3368_v42, %v3330_v47  ;;  %v3436_v10 = vmul.f32 %v3428_v44, %v3330_v47  ;;  %3387 = vrot.lane.b32.xlu0 %v3379_v61, %s4346_s8 }
0x2464   :  { %v3380_v58 = vsub.f32 1.0, %v3376_v46  ;;  %3445 = vrot.lane.b32.xlu1 %v3436_v10, %s4347_s6 }
0x2465   :  { %v3337_v49 = vpop.permute.xlu0 %3336 }
0x2466   :  { %v3377_v24 = vmul.f32 %v3372_v57, %v3337_v49  ;;  %3389 = vrot.lane.b32.xlu0 %v3380_v58, %s4346_s8  ;;  %v3437_v0 = vmul.f32 %v3432_v53, %v3337_v49 }
0x2468   :  { %v3381_v41 = vsub.f32 1.0, %v3377_v24  ;;  %3449 = vrot.lane.b32.xlu1 %v3438_v15, %s4347_s6 }
0x246a   :  { %3391 = vrot.lane.b32.xlu0 %v3381_v41, %s4346_s8 }
0x246c   :  { %3558 = vrot.lane.b32.xlu1 %v5241_v25, %s4348_s11 }
0x246e   :  { %3393 = vrot.lane.b32.xlu0 %v3382_v37, %s4346_s8 }
0x2472   :  { %3443 = vrot.lane.b32.xlu0 %v3435_v14, %s4347_s6 }
0x2476   :  { %3447 = vrot.lane.b32.xlu0 %v3437_v0, %s4347_s6 }
0x247a   :  { %3548 = vrot.lane.b32.xlu0 %v3547_v22, %s4349_s18 }
0x247b   :  { %4218 = shalt.err (!%p4215_p1)
}
0x247c   :  { %3599 = dma.vmem_to_hbm [thread:$0]  %s3597_s25, 32, %s5515_s13, [#allocation18]  }
0x247d   :  { %s4351_s30 = smov [#allocation19]  }
0x247e   :  { %s3606_s8 = sshll.u32 %s4351_s30, 4  ;;  %s3607_s8 = int_to_ptr.vmem [resolvable:$true] %s3606_s8 }
0x247f   :  { %s4227_s6 = scalar_lea.vmem %s3607_s8, 32  ;;  %p4232_p3 = scmp.lt.s32.totalorder %s3607_s8, %s3607_s8 }
0x2480   :  { %p4228_p2 = scmp.ne.s32.totalorder %s3607_s8, %s4227_s6  ;;  %p4233_p4 = scmp.lt.s32.totalorder %s4227_s6, %s4227_s6 }
0x2482   :  { %p4234_p5 = por %p4233_p4, %p4232_p3 }
0x2484   :  { %p4235_p6 = pnand %p4234_p5, %p4228_p2 }
0x2486   :  { %4238 = shalt.err (!%p4235_p6)
}
0x2487   :  { %3609 = dma.vmem_to_hbm [thread:$0]  %s3607_s8, 32, %s5516_s14, [#allocation18]   ;;  %vm5534_vm1 = vmmov %vm5530_vm0 }
0x2488   :  { %s4352_s13 = smov [#allocation20]   ;;  %vm5535_vm4 = vmmov %vm5530_vm0 }
0x2489   :  { %s3616_s1 = sshll.u32 %s4352_s13, 4  ;;  %s3617_s1 = int_to_ptr.vmem [resolvable:$true] %s3616_s1 }
0x248a   :  { %s4247_s14 = scalar_lea.vmem %s3617_s1, 32  ;;  %p4252_p8 = scmp.lt.s32.totalorder %s3617_s1, %s3617_s1 }
0x248b   :  { %p4248_p7 = scmp.ne.s32.totalorder %s3617_s1, %s4247_s14  ;;  %p4253_p9 = scmp.lt.s32.totalorder %s4247_s14, %s4247_s14 }
0x248d   :  { %p4254_p10 = por %p4253_p9, %p4252_p8 }
0x248f   :  { %p4255_p11 = pnand %p4254_p10, %p4248_p7 }
0x24d4   :  { %v3388_v25 = vpop.permute.xlu0 %3387 }
0x24d6   :  { %v3446_v29 = vpop.permute.xlu1 %3445 }
0x24d8   :  { %v3390_v48 = vpop.permute.xlu0 %3389 }
0x24d9   :  { %v3400_v21 = vmul.f32 %v3390_v48, %v5299_v32 }
0x24da   :  { %v3450_v51 = vpop.permute.xlu1 %3449 }
0x24db   :  { %v3456_v31 = vadd.f32 %v3446_v29, %v3400_v21 }
0x24dc   :  { %v3392_v6 = vpop.permute.xlu0 %3391 }
0x24dd   :  { %3564 = vst.msk [vmem:[#allocation6 + $0x8] sm:$0xff] %vm128_vm3, %v3456_v31  ;;  %3575 = vst.msk [vmem:[%s5519_s17 + $0x8] sm:$0xff] %vm128_vm3, %v3456_v31 }
0x24de   :  { %v3559_v19 = vpop.permute.xlu1 %3558 }
0x24df   :  { %3561 = vst.msk [vmem:[#allocation4] sm:$0x3] %vm5534_vm1, %v3559_v19 }
0x24e0   :  { %3572 = vst.msk [vmem:[#allocation20] sm:$0x3] %vm5535_vm4, %v3559_v19  ;;  %v3394_v52 = vpop.permute.xlu0 %3393 }
0x24e1   :  { %4258 = shalt.err (!%p4255_p11)
}
0x24e2   :  { %3619 = dma.vmem_to_hbm [thread:$0]  %s3617_s1, 32, %s5517_s15, [#allocation21]   ;;  %v3402_v32 = vmul.f32 %v3394_v52, %v5306_v13  ;;  %v3399_v5 = vmul.f32 %v3388_v25, %v5292_v36  ;;  %v3401_v34 = vmul.f32 %v3392_v6, %v5297_v55  ;;  %vm3551_vm5 = vcmask 130048   ;;  %vm5536_vm9 = vmmov %vm5530_vm0 }
0x24e3   :  { %s4353_s7 = smov [#allocation22]   ;;  %vm5537_vm10 = vmmov %vm5530_vm0 }
0x24e4   :  { %v3458_v9 = vadd.f32 %v3450_v51, %v3402_v32  ;;  %v3444_v33 = vpop.permute.xlu0 %3443  ;;  %s3626_s26 = sshll.u32 %s4353_s7, 4  ;;  %s3627_s26 = int_to_ptr.vmem [resolvable:$true] %s3626_s26 }
0x24e5   :  { %v3455_v63 = vadd.f32 %v3444_v33, %v3399_v5  ;;  %s4267_s11 = scalar_lea.vmem %s3627_s26, 32  ;;  %p4272_p13 = scmp.lt.s32.totalorder %s3627_s26, %s3627_s26 }
0x24e6   :  { %3566 = vst.msk [vmem:[#allocation6 + $0x18] sm:$0xff] %vm128_vm3, %v3458_v9  ;;  %3577 = vst.msk [vmem:[%s5519_s17 + $0x18] sm:$0xff] %vm128_vm3, %v3458_v9  ;;  %p4268_p12 = scmp.ne.s32.totalorder %s3627_s26, %s4267_s11  ;;  %p4273_p0 = scmp.lt.s32.totalorder %s4267_s11, %s4267_s11 }
0x24e7   :  { %3563 = vst.msk [vmem:[#allocation6] sm:$0xff] %vm128_vm3, %v3455_v63  ;;  %3574 = vst.msk [vmem:[%s5519_s17] sm:$0xff] %vm128_vm3, %v3455_v63 }
0x24e8   :  { %v3448_v36 = vpop.permute.xlu0 %3447  ;;  %p4274_p1 = por %p4273_p0, %p4272_p13 }
0x24e9   :  { %v3457_v13 = vadd.f32 %v3448_v36, %v3401_v34 }
0x24ea   :  { %p4275_p2 = pnand %p4274_p1, %p4268_p12 }
0x24eb   :  { %3565 = vst.msk [vmem:[#allocation6 + $0x10] sm:$0xff] %vm128_vm3, %v3457_v13  ;;  %3576 = vst.msk [vmem:[%s5519_s17 + $0x10] sm:$0xff] %vm128_vm3, %v3457_v13 }
0x24ec   :  { %v3549_v55 = vpop.permute.xlu0 %3548 }
0x24ed   :  { %v3552_v23 = vsel %vm3551_vm5, %v5407_v59, %v3549_v55 }
0x24ee   :  { %3562 = vst.msk [vmem:[#allocation5] sm:$0x3] %vm5536_vm9, %v3552_v23 }
0x24ef   :  { %3573 = vst.msk [vmem:[#allocation22] sm:$0x3] %vm5537_vm10, %v3552_v23 }
0x24f0   :  { %4278 = shalt.err (!%p4275_p2)
}
0x24f1   :  { %3629 = dma.vmem_to_hbm [thread:$0]  %s3627_s26, 32, %s5518_s16, [#allocation21]  }
0x24f2   :  { %s4354_s17 = smov [#allocation16]  }
0x24f3   :  { %s3583_s25 = sshll.u32 %s4354_s17, 4  ;;  %s3584_s25 = int_to_ptr.vmem [resolvable:$true] %s3583_s25 }
0x24f4   :  { %s4287_s27 = scalar_lea.vmem %s3584_s25, 128  ;;  %p4292_p4 = scmp.lt.s32.totalorder %s3584_s25, %s3584_s25 }
0x24f5   :  { %p4288_p3 = scmp.ne.s32.totalorder %s3584_s25, %s4287_s27  ;;  %p4293_p5 = scmp.lt.s32.totalorder %s4287_s27, %s4287_s27 }
0x24f7   :  { %p4294_p6 = por %p4293_p5, %p4292_p4 }
0x24f9   :  { %p4295_p7 = pnand %p4294_p6, %p4288_p3 }
0x251b   :  { %v3536_v35 = vpop.f32.mrf.mxu0 }
0x251c   :  { %v3537_v28 = vadd.f32 %v5316_v43, %v3536_v35 }
0x251d   :  { %v3888_v20 = vpop.f32.mrf.mxu0 }
0x251e   :  { %v3540_v59 = vmul.f32 0.5, %v3537_v28 }
0x2520   :  { %4088 = vtanh.f32 %v3540_v59 }
0x252d   :  { %v4089_v11 = vpop.eup %4088 }
0x252e   :  { %v3542_v2 = vadd.f32 1.0, %v4089_v11 }
0x2530   :  { %v3543_v7 = vmul.f32 0.5, %v3542_v2 }
0x2532   :  { %3545 = vst.msk [vmem:[#allocation16 + $0x6] sm:$0x3] %vm115_vm2, %v3543_v7 }
0x2533   :  { %4298 = shalt.err (!%p4295_p7)
}
0x2534   :  { %s4355_s16 = smov 2  }
0x2535   :  { %3589 = dma.vmem_to_hbm [thread:$0]  %s3584_s25, 128, %s5514_s12, [#allocation9], %s4328_s4, %s4328_s4, %s4355_s16  }
0x2536   :  { %4313 = dma.done.wait [#allocation9], 128  }
0x2537   :  { %4314 = vsyncadd [#allocation9], 4294967168 }
0x2538   :  { %4315 = dma.done.wait [#allocation18], 64  }
0x2539   :  { %4316 = vsyncadd [#allocation18], 4294967232 }
0x253a   :  { %4317 = dma.done.wait [#allocation21], 64  }
0x253b   :  { %4318 = vsyncadd [#allocation21], 4294967232 }
0x253c   :  { %3649 = vsyncpa [#allocation8], 1 }
0x253d   :  { %3650 = vsyncpa [#allocation11], 1 }
0x253e   :  { %3651 = vsyncpa [#allocation14], 1 }
0x253f   :  { %3652 = vsyncpa [#allocation9], 1 }
0x2540   :  { %3653 = vsyncpa [#allocation18], 1 }
0x2541   :  { %3654 = vsyncpa [#allocation21], 1 }

</bundles_post_ra>
